<compile_context>
chip_gen: v6e
topology: v6e:2x2x1
jax: 0.10.0
libtpu: 0.0.40
codegen_flags: <defaults>
</compile_context>

<pallas_src>
import jax
import jax.numpy as jnp
from jax.experimental import pallas as pl
from jax.experimental.pallas import tpu as pltpu


def attn_kernel(h_ref, e_ref, wt_ref, b_ref, v_ref, out_ref):
    """One (T_tile, B) tile of the attention scores.

    h_ref  : (T_tile, B, 2H)  decoder hidden (compute dtype, streamed)
    e_ref  : (T_tile, B, 2H)  encoder outputs (compute dtype, streamed)
    wt_ref : (4H, 2H)         W.T  == [Wh.T ; We.T] stacked  (resident)
    b_ref  : (1, 2H)          Linear bias, f32                (resident)
    v_ref  : (1, 1, 2H)       scoring vector v, f32           (resident)
    out_ref: (T_tile, B)      softmax(scores, axis=1), f32
    """
    tt, bb, h2 = h_ref.shape
    n = tt * bb

    # Flatten leading dims (free: last dim unchanged) and fuse the two K=2H
    # matmuls into a single K=4H matmul that fills the 256-deep MXU.
    h2d = h_ref[...].reshape(n, h2)
    e2d = e_ref[...].reshape(n, h2)
    xcat = jnp.concatenate([h2d, e2d], axis=-1)                 # (n, 4H)
    pre = jnp.dot(xcat, wt_ref[...], preferred_element_type=jnp.float32)
    energy = jnp.tanh(pre + b_ref[...])                          # (n, 2H) f32

    # scores = sum(energy * v, -1); reshape back is layout-free (split of lead dim).
    scores = jnp.sum(energy.reshape(tt, bb, h2) * v_ref[...], axis=2)   # (tt, bb)

    # Numerically stable softmax over the batch axis (dim=1), matching PyTorch.
    m = jnp.max(scores, axis=1, keepdims=True)
    p = jnp.exp(scores - m)
    denom = jnp.sum(p, axis=1, keepdims=True)
    out_ref[...] = p * pl.reciprocal(denom, approx=True)


def attn_forward(hidden, encoder_outputs, W, b, v, *, compute_dtype=None, t_tile=None):
    """hidden, encoder_outputs: (T, B, 2H). W: (2H, 4H). b, v: (2H,).

    Returns softmax(scores, axis=1) of shape (T, B), float32.
    compute_dtype defaults to the activations' dtype (pass bf16 activations to
    get the bf16 MXU path without an extra HBM cast).
    """
    T, B, H2 = hidden.shape
    H4 = 2 * H2
    assert W.shape == (H2, H4) and b.shape == (H2,) and v.shape == (H2,)

    if compute_dtype is None:
        compute_dtype = hidden.dtype
    cd = jnp.dtype(compute_dtype)

    # Tile over T: aim for >= 512 rows (T_tile * B) per streaming block.
    if t_tile is None:
        t_tile = max(1, min(T, pl.cdiv(512, B)))
    n_t = pl.cdiv(T, t_tile)

    # Glue (cheap, parameter-sized): one stacked/transposed weight, 2-D bias / 3-D v.
    WT = W.T.astype(cd)                       # (4H, 2H) == [Wh.T ; We.T]
    b2 = b.reshape(1, H2).astype(jnp.float32)
    v3 = v.reshape(1, 1, H2).astype(jnp.float32)
    h_c = hidden.astype(cd)
    e_c = encoder_outputs.astype(cd)

    # Explicit VMEM budget: 2 streaming inputs x 2 buffers x block, plus resident
    # params and f32 intermediates — tiny here, so 32 MiB is ample and is within
    # the v7x physical budget (64 MiB).
    vmem_limit = 32 * 1024 * 1024

    return pl.pallas_call(
        attn_kernel,
        out_shape=jax.ShapeDtypeStruct((T, B), jnp.float32),
        grid=(n_t,),
        in_specs=[
            pl.BlockSpec((t_tile, B, H2), lambda i: (i, 0, 0)),   # hidden (streamed)
            pl.BlockSpec((t_tile, B, H2), lambda i: (i, 0, 0)),   # encoder (streamed)
            pl.BlockSpec((H4, H2), lambda i: (0, 0)),             # W.T (resident)
            pl.BlockSpec((1, H2), lambda i: (0, 0)),              # bias (resident)
            pl.BlockSpec((1, 1, H2), lambda i: (0, 0, 0)),        # v (resident)
        ],
        out_specs=pl.BlockSpec((t_tile, B), lambda i: (i, 0)),
        compiler_params=pltpu.CompilerParams(
            dimension_semantics=("parallel",),     # shards T across 2 TCs on v7x
            vmem_limit_bytes=vmem_limit,
        ),
    )(h_c, e_c, WT, b2, v3)


def attn_reference(hidden, encoder_outputs, W, b, v):
    """Pure-JAX f32 reference mirroring the PyTorch code line-by-line."""
    x = jnp.concatenate([hidden, encoder_outputs], axis=2)      # (T, B, 4H)
    energy = jnp.tanh(jnp.einsum("tbi,oi->tbo", x, W) + b)      # (T, B, 2H)
    scores = jnp.einsum("tbo,o->tb", energy, v)                 # (T, B)
    return jax.nn.softmax(scores, axis=1)


if __name__ == "__main__":
    hidden_size = 64            # 2H = 128 (lane-friendly), 4H = 256
    H2 = 2 * hidden_size
    T, B = 256, 8               # T large enough to exercise the T-grid (4 tiles of 64)

    key = jax.random.PRNGKey(0)
    k_h, k_e, k_w, k_b, k_v = jax.random.split(key, 5)

    # Inputs: (T, B, 2*hidden_size) as implied by cat(..., dim=2) + Linear(4H -> 2H).
    hidden = jax.random.normal(k_h, (T, B, H2), dtype=jnp.float32)
    encoder_outputs = jax.random.normal(k_e, (T, B, H2), dtype=jnp.float32)

    # Deterministic parameter init (Linear(4H, 2H) + v ~ N(0, 1/sqrt(2H))).
    lin_bound = 1.0 / jnp.sqrt(jnp.float32(4 * hidden_size))
    W = jax.random.uniform(k_w, (H2, 4 * hidden_size), jnp.float32,
                           minval=-lin_bound, maxval=lin_bound)
    b = jax.random.uniform(k_b, (H2,), jnp.float32,
                           minval=-lin_bound, maxval=lin_bound)
    stdv = 1.0 / jnp.sqrt(jnp.float32(H2))
    v = stdv * jax.random.normal(k_v, (H2,), dtype=jnp.float32)

    ref = attn_reference(hidden, encoder_outputs, W, b, v)

    # --- f32 compute path (strict-ish tolerance; approx reciprocal in softmax) ---
    out_f32 = attn_forward(hidden, encoder_outputs, W, b, v,
                           compute_dtype=jnp.float32)
    out_f32 = jax.block_until_ready(out_f32)
    assert out_f32.shape == (T, B)
    assert jnp.allclose(out_f32, ref, atol=5e-3, rtol=5e-3), "f32 path mismatch"

    # --- bf16 compute path (halves HBM traffic; relaxed, bf16-level tolerance) ---
    out_bf16 = attn_forward(hidden.astype(jnp.bfloat16),
                            encoder_outputs.astype(jnp.bfloat16),
                            W, b, v)
    out_bf16 = jax.block_until_ready(out_bf16)
    assert out_bf16.shape == (T, B)
    assert jnp.allclose(out_bf16, ref, atol=2e-2, rtol=2e-2), "bf16 path mismatch"

    print("KERNEL_OK")
</pallas_src>

<mosaic_0001>
module attributes {stable_mosaic.version = 11 : i64} {
  func.func @attn_kernel(%arg0: i32, %arg1: memref<64x8x128xf32, #tpu.memory_space<vmem>>, %arg2: memref<64x8x128xf32, #tpu.memory_space<vmem>>, %arg3: memref<256x128xf32, #tpu.memory_space<vmem>>, %arg4: memref<1x128xf32, #tpu.memory_space<vmem>>, %arg5: memref<1x1x128xf32, #tpu.memory_space<vmem>>, %arg6: memref<64x8xf32, #tpu.memory_space<vmem>>) attributes {dimension_semantics = [#tpu.dimension_semantics<parallel>], iteration_bounds = array<i64: 4>, scalar_prefetch = 0 : i64, scratch_operands = 0 : i64, tpu.core_type = #tpu.core_type<tc>, window_params = [{transform_indices = @transform_0, window_bounds = array<i64: 64, 8, 128>}, {transform_indices = @transform_1, window_bounds = array<i64: 64, 8, 128>}, {pipeline_mode = #tpu.pipeline_mode<synchronous>, transform_indices = @transform_2, window_bounds = array<i64: 256, 128>}, {pipeline_mode = #tpu.pipeline_mode<synchronous>, transform_indices = @transform_3, window_bounds = array<i64: 1, 128>}, {pipeline_mode = #tpu.pipeline_mode<synchronous>, transform_indices = @transform_4, window_bounds = array<i64: 1, 1, 128>}, {transform_indices = @transform_5, window_bounds = array<i64: 64, 8>}]} {
    %c0 = arith.constant 0 : index
    %c0_0 = arith.constant 0 : index
    %c0_1 = arith.constant 0 : index
    %0 = vector.load %arg1[%c0, %c0_0, %c0_1] : memref<64x8x128xf32, #tpu.memory_space<vmem>>, vector<64x8x128xf32>
    %1 = vector.shape_cast %0 : vector<64x8x128xf32> to vector<512x128xf32>
    %c0_2 = arith.constant 0 : index
    %c0_3 = arith.constant 0 : index
    %c0_4 = arith.constant 0 : index
    %2 = vector.load %arg2[%c0_2, %c0_3, %c0_4] : memref<64x8x128xf32, #tpu.memory_space<vmem>>, vector<64x8x128xf32>
    %3 = vector.shape_cast %2 : vector<64x8x128xf32> to vector<512x128xf32>
    %4 = tpu.concatenate %1, %3 in 1 : vector<512x128xf32>, vector<512x128xf32> -> vector<512x256xf32>
    %c0_5 = arith.constant 0 : index
    %c0_6 = arith.constant 0 : index
    %5 = vector.load %arg3[%c0_5, %c0_6] : memref<256x128xf32, #tpu.memory_space<vmem>>, vector<256x128xf32>
    %cst = arith.constant dense<0.000000e+00> : vector<512x128xf32>
    %6 = tpu.matmul %4, %5, %cst {dimension_numbers = #tpu.dot_dimension_numbers<[1], [0], [0], [1], [0, 0, 1, 1], [], []>} : vector<512x256xf32>, vector<256x128xf32>, vector<512x128xf32> -> vector<512x128xf32>
    %c0_7 = arith.constant 0 : index
    %c0_8 = arith.constant 0 : index
    %7 = vector.load %arg4[%c0_7, %c0_8] : memref<1x128xf32, #tpu.memory_space<vmem>>, vector<1x128xf32>
    %8 = vector.broadcast %7 : vector<1x128xf32> to vector<512x128xf32>
    %9 = arith.addf %6, %8 : vector<512x128xf32>
    %10 = math.tanh %9 : vector<512x128xf32>
    %11 = vector.shape_cast %10 : vector<512x128xf32> to vector<64x8x128xf32>
    %c0_9 = arith.constant 0 : index
    %c0_10 = arith.constant 0 : index
    %c0_11 = arith.constant 0 : index
    %12 = vector.load %arg5[%c0_9, %c0_10, %c0_11] : memref<1x1x128xf32, #tpu.memory_space<vmem>>, vector<1x1x128xf32>
    %13 = vector.broadcast %12 : vector<1x1x128xf32> to vector<64x8x128xf32>
    %14 = arith.mulf %11, %13 : vector<64x8x128xf32>
    %cst_12 = arith.constant dense<0.000000e+00> : vector<64x8xf32>
    %15 = vector.multi_reduction <add>, %14, %cst_12 [2] : vector<64x8x128xf32> to vector<64x8xf32>
    %cst_13 = arith.constant dense<0xFF800000> : vector<64xf32>
    %16 = vector.multi_reduction <maximumf>, %15, %cst_13 [1] : vector<64x8xf32> to vector<64xf32>
    %17 = vector.shape_cast %16 : vector<64xf32> to vector<64x1xf32>
    %18 = vector.broadcast %17 : vector<64x1xf32> to vector<64x8xf32>
    %19 = arith.subf %15, %18 : vector<64x8xf32>
    %20 = math.exp %19 : vector<64x8xf32>
    %cst_14 = arith.constant dense<0.000000e+00> : vector<64xf32>
    %21 = vector.multi_reduction <add>, %20, %cst_14 [1] : vector<64x8xf32> to vector<64xf32>
    %22 = vector.shape_cast %21 : vector<64xf32> to vector<64x1xf32>
    %23 = tpu.reciprocal %22 {approx = true} : vector<64x1xf32> -> vector<64x1xf32>
    %24 = vector.broadcast %23 : vector<64x1xf32> to vector<64x8xf32>
    %25 = arith.mulf %20, %24 : vector<64x8xf32>
    %c0_15 = arith.constant 0 : index
    %c0_16 = arith.constant 0 : index
    %26 = vector.load %arg6[%c0_15, %c0_16] : memref<64x8xf32, #tpu.memory_space<vmem>>, vector<64x8xf32>
    tpu.vector_store %arg6[%c0_15, %c0_16], %25 {strides = array<i32>} : memref<64x8xf32, #tpu.memory_space<vmem>>, vector<64x8xf32>,
    return
  }
  func.func @transform_0(%arg0: i32) -> (i32, i32, i32) {
    %c0_i32 = arith.constant 0 : i32
    %c0_i32_0 = arith.constant 0 : i32
    %c0_i32_1 = arith.constant 0 : i32
    return %arg0, %c0_i32, %c0_i32_0 : i32, i32, i32
  }
  func.func @transform_1(%arg0: i32) -> (i32, i32, i32) {
    %c0_i32 = arith.constant 0 : i32
    %c0_i32_0 = arith.constant 0 : i32
    %c0_i32_1 = arith.constant 0 : i32
    return %arg0, %c0_i32, %c0_i32_0 : i32, i32, i32
  }
  func.func @transform_2(%arg0: i32) -> (i32, i32) {
    %c0_i32 = arith.constant 0 : i32
    %c0_i32_0 = arith.constant 0 : i32
    %c0_i32_1 = arith.constant 0 : i32
    return %c0_i32, %c0_i32_0 : i32, i32
  }
  func.func @transform_3(%arg0: i32) -> (i32, i32) {
    %c0_i32 = arith.constant 0 : i32
    %c0_i32_0 = arith.constant 0 : i32
    %c0_i32_1 = arith.constant 0 : i32
    return %c0_i32, %c0_i32_0 : i32, i32
  }
  func.func @transform_4(%arg0: i32) -> (i32, i32, i32) {
    %c0_i32 = arith.constant 0 : i32
    %c0_i32_0 = arith.constant 0 : i32
    %c0_i32_1 = arith.constant 0 : i32
    %c0_i32_2 = arith.constant 0 : i32
    return %c0_i32, %c0_i32_0, %c0_i32_1 : i32, i32, i32
  }
  func.func @transform_5(%arg0: i32) -> (i32, i32) {
    %c0_i32 = arith.constant 0 : i32
    %c0_i32_0 = arith.constant 0 : i32
    return %arg0, %c0_i32 : i32, i32
  }
}

</mosaic_0001>

<bundles_post_ra>
// kernel: tpu_custom_call.1
= control target key start
LH: loop header
LB: loop body
LE: loop exit
PB: predicated region body
PF: predicated region fallthrough
CT: control target
= control target key end

     0   :  { %10 = vsyncpa [#allocation3], 0  ;;  %s5979_s0 = inlined_call_operand.hbm [shape: f32[256,8,128], index: 0, kind: input, shape index: {}]   ;;  %s5980_s1 = inlined_call_operand.hbm [shape: f32[256,8,128], index: 1, kind: input, shape index: {}]   ;;  %s5981_s2 = inlined_call_operand.hbm [shape: f32[256,128], index: 2, kind: input, shape index: {}]   ;;  %s5982_s3 = inlined_call_operand.vmem [shape: f32[1,128], index: 3, kind: input, shape index: {}]   ;;  %s5983_s4 = inlined_call_operand.vmem [shape: f32[1,1,128], index: 4, kind: input, shape index: {}]   ;;  %s5984_s5 = inlined_call_operand.vmem [shape: f32[256,8], index: 5, kind: output, shape index: {}]  }
   0x1   :  { %12 = vsyncpa [#allocation3 + $0x1], 0 }
   0x2   :  { %13 = vsyncpa [#allocation5], 0 }
   0x3   :  { %15 = vsyncpa [#allocation5 + $0x1], 0  ;;  %s4321_s18 = smov 0   ;;  %s4323_s19 = smov 0  }
   0x4   :  { %s4325_s20 = smov 0   ;;  %s4327_s21 = smov 0  }
   0x5 LB: > { %s4340_s22 = sadd.s32 4294967295, %s4282_s21   ;;  %p41_p0 = scmp.ne.s32.totalorder %s4274_s19, %s4270_s18  ;;  %s4282_s21 = sphi %s4327_s21, %s6166_s21   ;;  %s4278_s20 = sphi %s4325_s20, %s6165_s20   ;;  %s4274_s19 = sphi %s4323_s19, %s6164_s19   ;;  %s4270_s18 = sphi %s4321_s18, %s6163_s18  }
   0x6   : > { %p5985_p1 = scmp.eq.s32.totalorder %s4340_s22, 0  ;;  %p3740_p2 = scmp.ge.s32.totalorder %s4282_s21, 1 }
   0x7   : > { %p167_p3 = scmp.lt.s32.totalorder %s4282_s21, 5  ;;  %s4284_s25 = smov [#allocation6]  }
   0x8   : > { %p4348_p4 = por %p5985_p1, %p41_p0  ;;  %s179_s26 = sshll.u32 %s4284_s25, 4  ;;  %s180_s26 = int_to_ptr.vmem [resolvable:$true] %s179_s26 }
   0x9   : > { %p4352_p5 = pnand %p3740_p2, %p167_p3  ;;  %s4365_s28 = sadd.s32 1, %s4282_s21  }
   0xa   : > { %s6044_s23 = scalar_select %p4348_p4, 1, 0 }
   0xb   : > { %p3833_p6 = pneg %p4352_p5  ;;  %s28_s29 = sadd.s32 1, %s4278_s20 }
   0xc   : > { %s25_s30 = ssub.s32 %s4282_s21, %s4365_s28  ;;  %s4169_s6 = scalar_lea.vmem %s180_s26, 4096 }
   0xd   : > { %p4360_p7 = pnand %p3833_p6, %p5985_p1  ;;  %p4170_p9 = scmp.ne.s32.totalorder %s180_s26, %s4169_s6 }
   0xe   : > { %p4177_p12 = scmp.lt.s32.totalorder %s180_s26, %s180_s26  ;;  %p4178_p13 = scmp.lt.s32.totalorder %s4169_s6, %s4169_s6 }
   0xf   : > { %p4160_p8 = pneg %p4360_p7 }
  0x10   : > { %p4179_p0 = por %p4178_p13, %p4177_p12 }
  0x11   : > { %p4172_p10 = pnand %p4170_p9, %p4160_p8 }
  0x13   : > { %p4173_p11 = pneg %p4172_p10 }
  0x15   : > { %p4180_p2 = pnand %p4179_p0, %p4173_p11 }
  0x17   : > { %4183 = shalt.err (!%p4180_p2)
}
  0x18   : > { %s4285_s7 = smov 128   ;;  %s4286_s8 = smov 8  }
  0x19   : > { %3836 = dma.hbm_to_vmem [thread:$0]  (!%p4360_p7), %s5981_s2, 4096, %s180_s26, [#allocation5], %s4285_s7, %s4285_s7, %s4286_s8  }
  0x1a   : > { %p26_p3 = scmp.eq.s32.totalorder %s25_s30, 0  ;;  %p35_p6 = scmp.ne.s32.totalorder %s4278_s20, %s4274_s19 }
  0x1b   : > { %p36_p8 = scmp.eq.s32.totalorder %s4282_s21, 0  ;;  %p3845_p9 = scmp.lt.s32.totalorder %s4282_s21, 4 }
  0x1c   : > { %s4385_s11 = scalar_select %p26_p3, %s4278_s20, %s28_s29  }
  0x1d   : > { %p37_p10 = por %p36_p8, %p35_p6  ;;  %s199_s12 = sand.u32 1, %s4278_s20  }
  0x1e   : > { %s3743_s13 = sshll.u32 %s199_s12, 9  ;;  %s3759_s14 = sshll.u32 %s4282_s21, 13 }
  0x1f   : > { %s4392_s17 = scalar_lea.hbm %s5979_s0, %s3759_s14  ;;  %s203_s18 = scalar_lea.vmem [#allocation2], %s3743_s13 }
  0x20   : > { %s210_s25 = sshll.u32 %s203_s18, 4  ;;  %p4396_p7 = pnand %p3845_p9, %p37_p10  ;;  %s4394_s25 = int_to_ptr.vmem [resolvable:$true] %s210_s25 }
  0x21   : > { %s4403_s30 = scalar_lea.hbm %s5980_s1, %s3759_s14  ;;  %s224_s6 = scalar_lea.vmem [#allocation4], %s3743_s13 }
  0x22   : > { %s4405_s9 = sshll.u32 %s224_s6, 4  ;;  %s4407_s10 = scalar_lea.sflag [#allocation3], %s199_s12  ;;  %s4438_s9 = int_to_ptr.vmem [resolvable:$true] %s4405_s9 }
  0x23   : > { %s4184_s15 = scalar_lea.hbm %s4392_s17, 8192  ;;  %p4186_p12 = pneg %p4396_p7 }
  0x24   : > { %p4185_p11 = scmp.ne.s32.totalorder %s4392_s17, %s4184_s15  ;;  %s4189_s27 = scalar_lea.hbm %s5979_s0, 32768 }
  0x25   : > { %p4190_p2 = scmp.lt.s32.totalorder %s4392_s17, %s5979_s0  ;;  %p4191_p3 = scmp.lt.s32.totalorder %s4189_s27, %s4184_s15 }
  0x26   : > { %p4187_p13 = pnand %p4186_p12, %p4185_p11 }
  0x27   : > { %p4192_p6 = por %p4191_p3, %p4190_p2 }
  0x28   : > { %p4188_p0 = pneg %p4187_p13 }
  0x2a   : > { %p4193_p8 = pnand %p4192_p6, %p4188_p0 }
  0x2c   : > { %4196 = shalt.err (!%p4193_p8)
}
  0x2d   : > { %s4197_s12 = scalar_lea.vmem %s4394_s25, 8192  ;;  %s4287_s13 = smov [#allocation2]  }
  0x2e   : > { %p4198_p9 = scmp.ne.s32.totalorder %s4394_s25, %s4197_s12  ;;  %s4202_s6 = sshll.u32 %s4287_s13, 4  ;;  %s4203_s6 = int_to_ptr.vmem [resolvable:$false] %s4202_s6 }
  0x2f   : > { %s4204_s16 = scalar_lea.vmem %s4203_s6, 16384  ;;  %p4205_p13 = scmp.lt.s32.totalorder %s4394_s25, %s4203_s6 }
  0x30   : > { %p4200_p10 = pnand %p4198_p9, %p4186_p12  ;;  %p4206_p1 = scmp.lt.s32.totalorder %s4204_s16, %s4197_s12 }
  0x32   : > { %p4201_p11 = pneg %p4200_p10  ;;  %p4207_p4 = por %p4206_p1, %p4205_p13 }
  0x34   : > { %p4208_p2 = pnand %p4207_p4, %p4201_p11 }
  0x36   : > { %4211 = shalt.err (!%p4208_p2)
}
  0x37   : > { %3840 = dma.hbm_to_vmem [thread:$0]  (!%p4396_p7), %s4392_s17, 8192, %s4394_s25, %s4407_s10, %s4285_s7, %s4285_s7, %s4286_s8  }
  0x38   : > { %s220_s15 = sand.u32 1, %s4282_s21   ;;  %s4212_s27 = scalar_lea.hbm %s4403_s30, 8192 }
  0x39   : > { %s221_s18 = scalar_lea.sflag [#allocation5], %s220_s15  ;;  %p4213_p1 = scmp.ne.s32.totalorder %s4403_s30, %s4212_s27 }
  0x3a   : > { %s4217_s12 = scalar_lea.hbm %s5980_s1, 32768  ;;  %p4218_p3 = scmp.lt.s32.totalorder %s4403_s30, %s5980_s1 }
  0x3b   : > { %p4215_p4 = pnand %p4213_p1, %p4186_p12  ;;  %p4219_p6 = scmp.lt.s32.totalorder %s4217_s12, %s4212_s27 }
  0x3d   : > { %p4216_p0 = pneg %p4215_p4  ;;  %p4220_p8 = por %p4219_p6, %p4218_p3 }
  0x3f   : > { %p4221_p9 = pnand %p4220_p8, %p4216_p0 }
  0x41   : > { %4224 = shalt.err (!%p4221_p9)
}
  0x42   : > { %s4225_s21 = scalar_lea.vmem %s4438_s9, 8192  ;;  %s4288_s17 = smov [#allocation4]  }
  0x43   : > { %p4226_p10 = scmp.ne.s32.totalorder %s4438_s9, %s4225_s21  ;;  %s4230_s25 = sshll.u32 %s4288_s17, 4  ;;  %s4231_s25 = int_to_ptr.vmem [resolvable:$false] %s4230_s25 }
  0x44   : > { %s4232_s10 = scalar_lea.vmem %s4231_s25, 16384  ;;  %p4233_p2 = scmp.lt.s32.totalorder %s4438_s9, %s4231_s25 }
  0x45   : > { %p4228_p11 = pnand %p4226_p10, %p4186_p12  ;;  %p4234_p1 = scmp.lt.s32.totalorder %s4232_s10, %s4225_s21 }
  0x47   : > { %p4229_p13 = pneg %p4228_p11  ;;  %p4235_p4 = por %p4234_p1, %p4233_p2 }
  0x49   : > { %p4236_p3 = pnand %p4235_p4, %p4229_p13 }
  0x4b   : > { %4239 = shalt.err (!%p4236_p3)
}
  0x4c   : > { %3843 = dma.hbm_to_vmem [thread:$0]  (!%p4396_p7), %s4403_s30, 8192, %s4438_s9, %s221_s18, %s4285_s7, %s4285_s7, %s4286_s8  }
  0x4d   : > { %243 = sbr.rel (%p4352_p5) target bundleno = 1278 (0x4fe), region = 40 }
  0x52   : > { %s245_s16 = sand.u32 1, %s4274_s19   ;;  %p6048_p12 = scmp.ne.s32.totalorder %s6044_s23, 0 }
  0x53   : > { %s3750_s15 = sshll.u32 %s245_s16, 9  ;;  %s246_s27 = scalar_lea.sflag [#allocation3], %s245_s16 }
  0x54   : > { %s4469_s29 = scalar_lea.vmem [#allocation2], %s3750_s15 }
  0x55   : > { %4257 = dma.done.wait (%p6048_p12), %s246_s27, 8192  }
  0x56   : > { %4259 = vsyncadd (%p6048_p12), %s246_s27, 4294959104  ;;  %s254_s26 = sand.u32 1, %s4340_s22   ;;  %s4476_s7 = scalar_lea.vmem [#allocation4], %s3750_s15 }
  0x57   : > { %s255_s14 = scalar_lea.sflag [#allocation5], %s254_s26 }
  0x58   : > { %4261 = dma.done.wait (%p6048_p12), %s255_s14, 8192  }
  0x59   : > { %4263 = vsyncadd (%p6048_p12), %s255_s14, 4294959104  ;;  %p6049_p5 = scmp.eq.s32.totalorder %s4340_s22, 0 }
  0x5b   : > { %4265 = dma.done.wait (%p6049_p5), [#allocation5], 4096   ;;  %p6050_p7 = pmov %p6049_p5 }
  0x5c   : > { %v4289_v0 = vmov 0.0   ;;  %v445_v1 = vld [vmem:[#allocation6 + $0x78] sm:$0xff]  ;;  %v444_v2 = vld [vmem:[#allocation6 + $0x70] sm:$0xff]  ;;  %v443_v3 = vld [vmem:[#allocation6 + $0x68] sm:$0xff]  ;;  %vm1439_vm0 = vcmask 1041409   ;;  %vm1441_vm1 = vcmask 1042434  }
  0x5d   : > { %4267 = vsyncadd (%p6050_p7), [#allocation5], 4294963200  ;;  %469 = vmatprep.subr.mxu0 %v4289_v0  ;;  %3761 = vmatprep.subr.mxu1 %v4289_v0  ;;  %v442_v4 = vld [vmem:[#allocation6 + $0x60] sm:$0xff]  ;;  %v441_v5 = vld [vmem:[#allocation6 + $0x58] sm:$0xff]  ;;  %vm1443_vm2 = vcmask 1043459   ;;  %vm1445_vm3 = vcmask 1044484  }
  0x5e   : > { %470 = vmatpush1.msra.mxu0 %v445_v1  ;;  %3793 = vmatpush1.msra.mxu1 %v445_v1  ;;  %v440_v6 = vld [vmem:[#allocation6 + $0x50] sm:$0xff]  ;;  %v439_v7 = vld [vmem:[#allocation6 + $0x48] sm:$0xff]  ;;  %v438_v8 = vld [vmem:[#allocation6 + $0x40] sm:$0xff]  ;;  %vm1447_vm4 = vcmask 1045509   ;;  %vm1449_vm5 = vcmask 1046534   ;;  %vm1451_vm6 = vcmask 1047559  }
  0x5f   : > { %471 = vmatprep.subr.mxu0 %v4289_v0  ;;  %3762 = vmatprep.subr.mxu1 %v4289_v0  ;;  %v437_v9 = vld [vmem:[#allocation6 + $0x38] sm:$0xff]  ;;  %v436_v10 = vld [vmem:[#allocation6 + $0x30] sm:$0xff]  ;;  %v435_v11 = vld [vmem:[#allocation6 + $0x28] sm:$0xff]  ;;  %vm1510_vm7 = vcmask 64512   ;;  %s3753_s9 = sshll.u32 %s4340_s22, 3 }
  0x60   : > { %472 = vmatpush1.msra.mxu0 %v444_v2  ;;  %3794 = vmatpush1.msra.mxu1 %v444_v2  ;;  %v434_v12 = vld [vmem:[#allocation6 + $0x20] sm:$0xff]  ;;  %v433_v13 = vld [vmem:[#allocation6 + $0x18] sm:$0xff]  ;;  %v432_v14 = vld [vmem:[#allocation6 + $0x10] sm:$0xff]  ;;  %p297_p0 = scmp.lt.s32.totalorder %s3753_s9, 31 }
  0x61   : > { %473 = vmatprep.subr.mxu0 %v4289_v0  ;;  %3763 = vmatprep.subr.mxu1 %v4289_v0  ;;  %v431_v15 = vld [vmem:[#allocation6 + $0x8] sm:$0xff]  ;;  %v430_v16 = vld [vmem:[#allocation6] sm:$0xff]  ;;  %v461_v17 = vld [vmem:[#allocation6 + $0xf8] sm:$0xff] }
  0x62   : > { %474 = vmatpush1.msra.mxu0 %v443_v3  ;;  %3795 = vmatpush1.msra.mxu1 %v443_v3  ;;  %v460_v18 = vld [vmem:[#allocation6 + $0xf0] sm:$0xff]  ;;  %v459_v19 = vld [vmem:[#allocation6 + $0xe8] sm:$0xff]  ;;  %v458_v20 = vld [vmem:[#allocation6 + $0xe0] sm:$0xff]  ;;  %s6168_s9 = smov (!%p297_p0, %s3753_s9), 31 }
  0x63   : > { %475 = vmatprep.subr.mxu0 %v4289_v0  ;;  %3764 = vmatprep.subr.mxu1 %v4289_v0  ;;  %v457_v21 = vld [vmem:[#allocation6 + $0xd8] sm:$0xff]  ;;  %v456_v22 = vld [vmem:[#allocation6 + $0xd0] sm:$0xff]  ;;  %v455_v23 = vld [vmem:[#allocation6 + $0xc8] sm:$0xff]  ;;  %s3754_s22 = sshll.u32 %s6168_s9, 3 }
  0x64   : > { %476 = vmatpush1.msra.mxu0 %v442_v4  ;;  %3796 = vmatpush1.msra.mxu1 %v442_v4  ;;  %v454_v24 = vld [vmem:[#allocation6 + $0xc0] sm:$0xff]  ;;  %v453_v25 = vld [vmem:[#allocation6 + $0xb8] sm:$0xff]  ;;  %v452_v26 = vld [vmem:[#allocation6 + $0xb0] sm:$0xff]  ;;  %s5838_s13 = scalar_lea.vmem %s5984_s5, %s3754_s22 }
  0x65   : > { %477 = vmatprep.subr.mxu0 %v4289_v0  ;;  %3765 = vmatprep.subr.mxu1 %v4289_v0  ;;  %v451_v27 = vld [vmem:[#allocation6 + $0xa8] sm:$0xff]  ;;  %v450_v28 = vld [vmem:[#allocation6 + $0xa0] sm:$0xff]  ;;  %v449_v29 = vld [vmem:[#allocation6 + $0x98] sm:$0xff] }
  0x66   : > { %478 = vmatpush1.msra.mxu0 %v441_v5  ;;  %3797 = vmatpush1.msra.mxu1 %v441_v5  ;;  %v448_v30 = vld [vmem:[#allocation6 + $0x90] sm:$0xff]  ;;  %v447_v31 = vld [vmem:[#allocation6 + $0x88] sm:$0xff]  ;;  %v446_v32 = vld [vmem:[#allocation6 + $0x80] sm:$0xff] }
  0x67   : > { %479 = vmatprep.subr.mxu0 %v4289_v0  ;;  %3766 = vmatprep.subr.mxu1 %v4289_v0  ;;  %v366_v33 = vld [vmem:[%s4476_s7] sm:$0xff]  ;;  %v367_v37 = vld [vmem:[%s4476_s7 + $0x8] sm:$0xff]  ;;  %v368_v41 = vld [vmem:[%s4476_s7 + $0x10] sm:$0xff] }
  0x68   : > { %480 = vmatpush1.msra.mxu0 %v440_v6  ;;  %3798 = vmatpush1.msra.mxu1 %v440_v6  ;;  %v398_v34 = vld [vmem:[%s4476_s7 + $0x100] sm:$0xff]  ;;  %v399_v38 = vld [vmem:[%s4476_s7 + $0x108] sm:$0xff]  ;;  %v400_v42 = vld [vmem:[%s4476_s7 + $0x110] sm:$0xff] }
  0x69   : > { %481 = vmatprep.subr.mxu0 %v4289_v0  ;;  %3767 = vmatprep.subr.mxu1 %v4289_v0  ;;  %v302_v35 = vld [vmem:[%s4469_s29] sm:$0xff]  ;;  %v303_v39 = vld [vmem:[%s4469_s29 + $0x8] sm:$0xff]  ;;  %v304_v43 = vld [vmem:[%s4469_s29 + $0x10] sm:$0xff] }
  0x6a   : > { %482 = vmatpush1.msra.mxu0 %v439_v7  ;;  %3799 = vmatpush1.msra.mxu1 %v439_v7  ;;  %v334_v36 = vld [vmem:[%s4469_s29 + $0x100] sm:$0xff]  ;;  %v335_v40 = vld [vmem:[%s4469_s29 + $0x108] sm:$0xff]  ;;  %v336_v44 = vld [vmem:[%s4469_s29 + $0x110] sm:$0xff] }
  0x6b   : > { %483 = vmatprep.subr.mxu0 %v4289_v0  ;;  %3768 = vmatprep.subr.mxu1 %v4289_v0  ;;  %v369_v45 = vld [vmem:[%s4476_s7 + $0x18] sm:$0xff]  ;;  %v370_v49 = vld [vmem:[%s4476_s7 + $0x20] sm:$0xff]  ;;  %v371_v53 = vld [vmem:[%s4476_s7 + $0x28] sm:$0xff] }
  0x6c   : > { %484 = vmatpush1.msra.mxu0 %v438_v8  ;;  %3800 = vmatpush1.msra.mxu1 %v438_v8  ;;  %v401_v46 = vld [vmem:[%s4476_s7 + $0x118] sm:$0xff]  ;;  %v402_v50 = vld [vmem:[%s4476_s7 + $0x120] sm:$0xff]  ;;  %v403_v54 = vld [vmem:[%s4476_s7 + $0x128] sm:$0xff] }
  0x6d   : > { %485 = vmatprep.subr.mxu0 %v4289_v0  ;;  %3769 = vmatprep.subr.mxu1 %v4289_v0  ;;  %v305_v47 = vld [vmem:[%s4469_s29 + $0x18] sm:$0xff]  ;;  %v306_v51 = vld [vmem:[%s4469_s29 + $0x20] sm:$0xff]  ;;  %v307_v55 = vld [vmem:[%s4469_s29 + $0x28] sm:$0xff] }
  0x6e   : > { %486 = vmatpush1.msra.mxu0 %v437_v9  ;;  %3801 = vmatpush1.msra.mxu1 %v437_v9  ;;  %v337_v48 = vld [vmem:[%s4469_s29 + $0x118] sm:$0xff]  ;;  %v338_v52 = vld [vmem:[%s4469_s29 + $0x120] sm:$0xff]  ;;  %v339_v56 = vld [vmem:[%s4469_s29 + $0x128] sm:$0xff] }
  0x6f   : > { %487 = vmatprep.subr.mxu0 %v4289_v0  ;;  %3770 = vmatprep.subr.mxu1 %v4289_v0  ;;  %v372_v57 = vld [vmem:[%s4476_s7 + $0x30] sm:$0xff]  ;;  %v373_v61 = vld [vmem:[%s4476_s7 + $0x38] sm:$0xff]  ;;  %v374_v1 = vld [vmem:[%s4476_s7 + $0x40] sm:$0xff] }
  0x70   : > { %488 = vmatpush1.msra.mxu0 %v436_v10  ;;  %3802 = vmatpush1.msra.mxu1 %v436_v10  ;;  %v404_v58 = vld [vmem:[%s4476_s7 + $0x130] sm:$0xff]  ;;  %v405_v62 = vld [vmem:[%s4476_s7 + $0x138] sm:$0xff]  ;;  %v406_v2 = vld [vmem:[%s4476_s7 + $0x140] sm:$0xff] }
  0x71   : > { %489 = vmatprep.subr.mxu0 %v4289_v0  ;;  %3771 = vmatprep.subr.mxu1 %v4289_v0  ;;  %v308_v59 = vld [vmem:[%s4469_s29 + $0x30] sm:$0xff]  ;;  %v309_v63 = vld [vmem:[%s4469_s29 + $0x38] sm:$0xff]  ;;  %v310_v3 = vld [vmem:[%s4469_s29 + $0x40] sm:$0xff] }
  0x72   : > { %490 = vmatpush1.msra.mxu0 %v435_v11  ;;  %3803 = vmatpush1.msra.mxu1 %v435_v11  ;;  %v340_v60 = vld [vmem:[%s4469_s29 + $0x130] sm:$0xff]  ;;  %v342_v4 = vld [vmem:[%s4469_s29 + $0x140] sm:$0xff]  ;;  %v375_v5 = vld [vmem:[%s4476_s7 + $0x48] sm:$0xff] }
  0x73   : > { %491 = vmatprep.subr.mxu0 %v4289_v0  ;;  %3772 = vmatprep.subr.mxu1 %v4289_v0  ;;  %v407_v6 = vld [vmem:[%s4476_s7 + $0x148] sm:$0xff]  ;;  %v376_v9 = vld [vmem:[%s4476_s7 + $0x50] sm:$0xff] }
  0x74   : > { %492 = vmatpush1.msra.mxu0 %v434_v12  ;;  %3804 = vmatpush1.msra.mxu1 %v434_v12  ;;  %v311_v7 = vld [vmem:[%s4469_s29 + $0x48] sm:$0xff]  ;;  %v408_v10 = vld [vmem:[%s4476_s7 + $0x150] sm:$0xff] }
  0x75   : > { %493 = vmatprep.subr.mxu0 %v4289_v0  ;;  %3773 = vmatprep.subr.mxu1 %v4289_v0  ;;  %v343_v8 = vld [vmem:[%s4469_s29 + $0x148] sm:$0xff]  ;;  %v312_v11 = vld [vmem:[%s4469_s29 + $0x50] sm:$0xff] }
  0x76   : > { %494 = vmatpush1.msra.mxu0 %v433_v13  ;;  %3805 = vmatpush1.msra.mxu1 %v433_v13  ;;  %v344_v12 = vld [vmem:[%s4469_s29 + $0x150] sm:$0xff]  ;;  %v377_v13 = vld [vmem:[%s4476_s7 + $0x58] sm:$0xff] }
  0x77   : > { %495 = vmatprep.subr.mxu0 %v4289_v0  ;;  %3774 = vmatprep.subr.mxu1 %v4289_v0 }
  0x78   : > { %496 = vmatpush1.msra.mxu0 %v432_v14  ;;  %3806 = vmatpush1.msra.mxu1 %v432_v14  ;;  %v409_v14 = vld [vmem:[%s4476_s7 + $0x158] sm:$0xff] }
  0x79   : > { %497 = vmatprep.subr.mxu0 %v4289_v0  ;;  %3775 = vmatprep.subr.mxu1 %v4289_v0 }
  0x7a   : > { %498 = vmatpush1.msra.mxu0 %v431_v15  ;;  %3807 = vmatpush1.msra.mxu1 %v431_v15  ;;  %v313_v15 = vld [vmem:[%s4469_s29 + $0x58] sm:$0xff] }
  0x7b   : > { %499 = vmatprep.subr.mxu0 %v4289_v0  ;;  %3776 = vmatprep.subr.mxu1 %v4289_v0 }
  0x7c   : > { %500 = vmatpush1.msra.mxu0 %v430_v16  ;;  %3808 = vmatpush1.msra.mxu1 %v430_v16  ;;  %v345_v16 = vld [vmem:[%s4469_s29 + $0x158] sm:$0xff] }
  0x7d   : > { %501 = vmatprep.subr.mxu0 %v4289_v0  ;;  %3777 = vmatprep.subr.mxu1 %v4289_v0 }
  0x7e   : > { %502 = vmatpush2.msra.mxu0 %v461_v17  ;;  %3809 = vmatpush2.msra.mxu1 %v461_v17  ;;  %v378_v17 = vld [vmem:[%s4476_s7 + $0x60] sm:$0xff] }
  0x7f   : > { %503 = vmatprep.subr.mxu0 %v4289_v0  ;;  %3778 = vmatprep.subr.mxu1 %v4289_v0 }
  0x80   : > { %504 = vmatpush2.msra.mxu0 %v460_v18  ;;  %3810 = vmatpush2.msra.mxu1 %v460_v18  ;;  %v410_v18 = vld [vmem:[%s4476_s7 + $0x160] sm:$0xff] }
  0x81   : > { %505 = vmatprep.subr.mxu0 %v4289_v0  ;;  %3779 = vmatprep.subr.mxu1 %v4289_v0 }
  0x82   : > { %506 = vmatpush2.msra.mxu0 %v459_v19  ;;  %3811 = vmatpush2.msra.mxu1 %v459_v19  ;;  %v314_v19 = vld [vmem:[%s4469_s29 + $0x60] sm:$0xff] }
  0x83   : > { %507 = vmatprep.subr.mxu0 %v4289_v0  ;;  %3780 = vmatprep.subr.mxu1 %v4289_v0 }
  0x84   : > { %508 = vmatpush2.msra.mxu0 %v458_v20  ;;  %3812 = vmatpush2.msra.mxu1 %v458_v20  ;;  %v346_v20 = vld [vmem:[%s4469_s29 + $0x160] sm:$0xff] }
  0x85   : > { %509 = vmatprep.subr.mxu0 %v4289_v0  ;;  %3781 = vmatprep.subr.mxu1 %v4289_v0 }
  0x86   : > { %510 = vmatpush2.msra.mxu0 %v457_v21  ;;  %3813 = vmatpush2.msra.mxu1 %v457_v21  ;;  %v379_v21 = vld [vmem:[%s4476_s7 + $0x68] sm:$0xff] }
  0x87   : > { %511 = vmatprep.subr.mxu0 %v4289_v0  ;;  %3782 = vmatprep.subr.mxu1 %v4289_v0 }
  0x88   : > { %512 = vmatpush2.msra.mxu0 %v456_v22  ;;  %3814 = vmatpush2.msra.mxu1 %v456_v22  ;;  %v411_v22 = vld [vmem:[%s4476_s7 + $0x168] sm:$0xff] }
  0x89   : > { %513 = vmatprep.subr.mxu0 %v4289_v0  ;;  %3783 = vmatprep.subr.mxu1 %v4289_v0 }
  0x8a   : > { %514 = vmatpush2.msra.mxu0 %v455_v23  ;;  %3815 = vmatpush2.msra.mxu1 %v455_v23  ;;  %v315_v23 = vld [vmem:[%s4469_s29 + $0x68] sm:$0xff] }
  0x8b   : > { %515 = vmatprep.subr.mxu0 %v4289_v0  ;;  %3784 = vmatprep.subr.mxu1 %v4289_v0 }
  0x8c   : > { %516 = vmatpush2.msra.mxu0 %v454_v24  ;;  %3816 = vmatpush2.msra.mxu1 %v454_v24  ;;  %v347_v24 = vld [vmem:[%s4469_s29 + $0x168] sm:$0xff] }
  0x8d   : > { %517 = vmatprep.subr.mxu0 %v4289_v0  ;;  %3785 = vmatprep.subr.mxu1 %v4289_v0 }
  0x8e   : > { %518 = vmatpush2.msra.mxu0 %v453_v25  ;;  %3817 = vmatpush2.msra.mxu1 %v453_v25  ;;  %v380_v25 = vld [vmem:[%s4476_s7 + $0x70] sm:$0xff] }
  0x8f   : > { %519 = vmatprep.subr.mxu0 %v4289_v0  ;;  %3786 = vmatprep.subr.mxu1 %v4289_v0 }
  0x90   : > { %520 = vmatpush2.msra.mxu0 %v452_v26  ;;  %3818 = vmatpush2.msra.mxu1 %v452_v26  ;;  %v412_v26 = vld [vmem:[%s4476_s7 + $0x170] sm:$0xff] }
  0x91   : > { %521 = vmatprep.subr.mxu0 %v4289_v0  ;;  %3787 = vmatprep.subr.mxu1 %v4289_v0 }
  0x92   : > { %522 = vmatpush2.msra.mxu0 %v451_v27  ;;  %3819 = vmatpush2.msra.mxu1 %v451_v27  ;;  %v316_v27 = vld [vmem:[%s4469_s29 + $0x70] sm:$0xff] }
  0x93   : > { %523 = vmatprep.subr.mxu0 %v4289_v0  ;;  %3788 = vmatprep.subr.mxu1 %v4289_v0 }
  0x94   : > { %524 = vmatpush2.msra.mxu0 %v450_v28  ;;  %3820 = vmatpush2.msra.mxu1 %v450_v28  ;;  %v348_v28 = vld [vmem:[%s4469_s29 + $0x170] sm:$0xff] }
  0x95   : > { %525 = vmatprep.subr.mxu0 %v4289_v0  ;;  %3789 = vmatprep.subr.mxu1 %v4289_v0 }
  0x96   : > { %526 = vmatpush2.msra.mxu0 %v449_v29  ;;  %3821 = vmatpush2.msra.mxu1 %v449_v29  ;;  %v381_v29 = vld [vmem:[%s4476_s7 + $0x78] sm:$0xff] }
  0x97   : > { %527 = vmatprep.subr.mxu0 %v4289_v0  ;;  %3790 = vmatprep.subr.mxu1 %v4289_v0 }
  0x98   : > { %528 = vmatpush2.msra.mxu0 %v448_v30  ;;  %3822 = vmatpush2.msra.mxu1 %v448_v30  ;;  %v413_v30 = vld [vmem:[%s4476_s7 + $0x178] sm:$0xff] }
  0x99   : > { %529 = vmatprep.subr.mxu0 %v4289_v0  ;;  %3791 = vmatprep.subr.mxu1 %v4289_v0 }
  0x9a   : > { %530 = vmatpush2.msra.mxu0 %v447_v31  ;;  %3823 = vmatpush2.msra.mxu1 %v447_v31  ;;  %v317_v31 = vld [vmem:[%s4469_s29 + $0x78] sm:$0xff] }
  0x9b   : > { %531 = vmatprep.subr.mxu0 %v4289_v0  ;;  %3792 = vmatprep.subr.mxu1 %v4289_v0  ;;  %v341_v0 = vld [vmem:[%s4469_s29 + $0x138] sm:$0xff] }
  0x9c   : > { %532 = vmatpush2.msra.mxu0 %v446_v32  ;;  %3824 = vmatpush2.msra.mxu1 %v446_v32  ;;  %v349_v32 = vld [vmem:[%s4469_s29 + $0x178] sm:$0xff] }
  0x9d   : > { %533 = vmatprep.mubr.f32.mxu0 %v366_v33  ;;  %693 = vmatprep.mubr.f32.mxu1 %v398_v34  ;;  %v382_v33 = vld [vmem:[%s4476_s7 + $0x80] sm:$0xff] }
  0x9e   : > { %534 = vmatmul.mubr.f32.vlgmr.msra.gmra.mxu0 %v302_v35  ;;  %694 = vmatmul.mubr.f32.vlgmr.msra.gmra.mxu1 %v334_v36  ;;  %v414_v34 = vld [vmem:[%s4476_s7 + $0x180] sm:$0xff] }
  0x9f   : > { %538 = vmatprep.mubr.f32.mxu0 %v367_v37  ;;  %698 = vmatprep.mubr.f32.mxu1 %v399_v38  ;;  %v318_v35 = vld [vmem:[%s4469_s29 + $0x80] sm:$0xff]  ;;  %v383_v37 = vld [vmem:[%s4476_s7 + $0x88] sm:$0xff] }
  0xa0   : > { %v350_v36 = vld [vmem:[%s4469_s29 + $0x180] sm:$0xff]  ;;  %v415_v38 = vld [vmem:[%s4476_s7 + $0x188] sm:$0xff] }
  0xa2   : > { %539 = vmatmul.mubr.f32.gmra.mxu0 %v303_v39  ;;  %699 = vmatmul.mubr.f32.gmra.mxu1 %v335_v40  ;;  %v319_v39 = vld [vmem:[%s4469_s29 + $0x88] sm:$0xff] }
  0xa3   : > { %543 = vmatprep.mubr.f32.mxu0 %v368_v41  ;;  %703 = vmatprep.mubr.f32.mxu1 %v400_v42  ;;  %v351_v40 = vld [vmem:[%s4469_s29 + $0x188] sm:$0xff]  ;;  %v384_v41 = vld [vmem:[%s4476_s7 + $0x90] sm:$0xff] }
  0xa4   : > { %v416_v42 = vld [vmem:[%s4476_s7 + $0x190] sm:$0xff] }
  0xa6   : > { %544 = vmatmul.mubr.f32.gmra.mxu0 %v304_v43  ;;  %704 = vmatmul.mubr.f32.gmra.mxu1 %v336_v44  ;;  %v320_v43 = vld [vmem:[%s4469_s29 + $0x90] sm:$0xff] }
  0xa7   : > { %548 = vmatprep.mubr.f32.mxu0 %v369_v45  ;;  %708 = vmatprep.mubr.f32.mxu1 %v401_v46  ;;  %v352_v44 = vld [vmem:[%s4469_s29 + $0x190] sm:$0xff]  ;;  %v385_v45 = vld [vmem:[%s4476_s7 + $0x98] sm:$0xff] }
  0xa8   : > { %v417_v46 = vld [vmem:[%s4476_s7 + $0x198] sm:$0xff] }
  0xaa   : > { %549 = vmatmul.mubr.f32.gmra.mxu0 %v305_v47  ;;  %709 = vmatmul.mubr.f32.gmra.mxu1 %v337_v48  ;;  %v321_v47 = vld [vmem:[%s4469_s29 + $0x98] sm:$0xff] }
  0xab   : > { %553 = vmatprep.mubr.f32.mxu0 %v370_v49  ;;  %713 = vmatprep.mubr.f32.mxu1 %v402_v50  ;;  %v353_v48 = vld [vmem:[%s4469_s29 + $0x198] sm:$0xff]  ;;  %v386_v49 = vld [vmem:[%s4476_s7 + $0xa0] sm:$0xff] }
  0xac   : > { %v418_v50 = vld [vmem:[%s4476_s7 + $0x1a0] sm:$0xff] }
  0xae   : > { %554 = vmatmul.mubr.f32.gmra.mxu0 %v306_v51  ;;  %714 = vmatmul.mubr.f32.gmra.mxu1 %v338_v52  ;;  %v322_v51 = vld [vmem:[%s4469_s29 + $0xa0] sm:$0xff] }
  0xaf   : > { %558 = vmatprep.mubr.f32.mxu0 %v371_v53  ;;  %718 = vmatprep.mubr.f32.mxu1 %v403_v54  ;;  %v354_v52 = vld [vmem:[%s4469_s29 + $0x1a0] sm:$0xff]  ;;  %v387_v53 = vld [vmem:[%s4476_s7 + $0xa8] sm:$0xff] }
  0xb0   : > { %v419_v54 = vld [vmem:[%s4476_s7 + $0x1a8] sm:$0xff] }
  0xb2   : > { %559 = vmatmul.mubr.f32.gmra.mxu0 %v307_v55  ;;  %719 = vmatmul.mubr.f32.gmra.mxu1 %v339_v56  ;;  %v323_v55 = vld [vmem:[%s4469_s29 + $0xa8] sm:$0xff] }
  0xb3   : > { %563 = vmatprep.mubr.f32.mxu0 %v372_v57  ;;  %723 = vmatprep.mubr.f32.mxu1 %v404_v58  ;;  %v355_v56 = vld [vmem:[%s4469_s29 + $0x1a8] sm:$0xff]  ;;  %v388_v57 = vld [vmem:[%s4476_s7 + $0xb0] sm:$0xff] }
  0xb4   : > { %v420_v58 = vld [vmem:[%s4476_s7 + $0x1b0] sm:$0xff] }
  0xb6   : > { %564 = vmatmul.mubr.f32.gmra.mxu0 %v308_v59  ;;  %724 = vmatmul.mubr.f32.gmra.mxu1 %v340_v60  ;;  %v324_v59 = vld [vmem:[%s4469_s29 + $0xb0] sm:$0xff] }
  0xb7   : > { %568 = vmatprep.mubr.f32.mxu0 %v373_v61  ;;  %728 = vmatprep.mubr.f32.mxu1 %v405_v62  ;;  %v356_v60 = vld [vmem:[%s4469_s29 + $0x1b0] sm:$0xff]  ;;  %v389_v61 = vld [vmem:[%s4476_s7 + $0xb8] sm:$0xff] }
  0xb8   : > { %v421_v62 = vld [vmem:[%s4476_s7 + $0x1b8] sm:$0xff] }
  0xba   : > { %569 = vmatmul.mubr.f32.gmra.mxu0 %v309_v63  ;;  %729 = vmatmul.mubr.f32.gmra.mxu1 %v341_v0  ;;  %v325_v63 = vld [vmem:[%s4469_s29 + $0xb8] sm:$0xff] }
  0xbb   : > { %573 = vmatprep.mubr.f32.mxu0 %v374_v1  ;;  %733 = vmatprep.mubr.f32.mxu1 %v406_v2  ;;  %v357_v0 = vld [vmem:[%s4469_s29 + $0x1b8] sm:$0xff]  ;;  %v390_v1 = vld [vmem:[%s4476_s7 + $0xc0] sm:$0xff] }
  0xbc   : > { %v422_v2 = vld [vmem:[%s4476_s7 + $0x1c0] sm:$0xff] }
  0xbe   : > { %574 = vmatmul.mubr.f32.gmra.mxu0 %v310_v3  ;;  %734 = vmatmul.mubr.f32.gmra.mxu1 %v342_v4  ;;  %v326_v3 = vld [vmem:[%s4469_s29 + $0xc0] sm:$0xff] }
  0xbf   : > { %578 = vmatprep.mubr.f32.mxu0 %v375_v5  ;;  %738 = vmatprep.mubr.f32.mxu1 %v407_v6  ;;  %v358_v4 = vld [vmem:[%s4469_s29 + $0x1c0] sm:$0xff]  ;;  %v391_v5 = vld [vmem:[%s4476_s7 + $0xc8] sm:$0xff] }
  0xc0   : > { %v423_v6 = vld [vmem:[%s4476_s7 + $0x1c8] sm:$0xff] }
  0xc2   : > { %579 = vmatmul.mubr.f32.gmra.mxu0 %v311_v7  ;;  %739 = vmatmul.mubr.f32.gmra.mxu1 %v343_v8  ;;  %v327_v7 = vld [vmem:[%s4469_s29 + $0xc8] sm:$0xff] }
  0xc3   : > { %583 = vmatprep.mubr.f32.mxu0 %v376_v9  ;;  %743 = vmatprep.mubr.f32.mxu1 %v408_v10  ;;  %v359_v8 = vld [vmem:[%s4469_s29 + $0x1c8] sm:$0xff]  ;;  %v392_v9 = vld [vmem:[%s4476_s7 + $0xd0] sm:$0xff] }
  0xc4   : > { %v424_v10 = vld [vmem:[%s4476_s7 + $0x1d0] sm:$0xff] }
  0xc6   : > { %584 = vmatmul.mubr.f32.gmra.mxu0 %v312_v11  ;;  %744 = vmatmul.mubr.f32.gmra.mxu1 %v344_v12  ;;  %v328_v11 = vld [vmem:[%s4469_s29 + $0xd0] sm:$0xff] }
  0xc7   : > { %588 = vmatprep.mubr.f32.mxu0 %v377_v13  ;;  %748 = vmatprep.mubr.f32.mxu1 %v409_v14  ;;  %v360_v12 = vld [vmem:[%s4469_s29 + $0x1d0] sm:$0xff]  ;;  %v393_v13 = vld [vmem:[%s4476_s7 + $0xd8] sm:$0xff] }
  0xc8   : > { %v425_v14 = vld [vmem:[%s4476_s7 + $0x1d8] sm:$0xff] }
  0xca   : > { %589 = vmatmul.mubr.f32.gmra.mxu0 %v313_v15  ;;  %749 = vmatmul.mubr.f32.gmra.mxu1 %v345_v16  ;;  %v329_v15 = vld [vmem:[%s4469_s29 + $0xd8] sm:$0xff] }
  0xcb   : > { %593 = vmatprep.mubr.f32.mxu0 %v378_v17  ;;  %753 = vmatprep.mubr.f32.mxu1 %v410_v18  ;;  %v361_v16 = vld [vmem:[%s4469_s29 + $0x1d8] sm:$0xff]  ;;  %v394_v17 = vld [vmem:[%s4476_s7 + $0xe0] sm:$0xff] }
  0xcc   : > { %v426_v18 = vld [vmem:[%s4476_s7 + $0x1e0] sm:$0xff] }
  0xce   : > { %594 = vmatmul.mubr.f32.gmra.mxu0 %v314_v19  ;;  %754 = vmatmul.mubr.f32.gmra.mxu1 %v346_v20  ;;  %v330_v19 = vld [vmem:[%s4469_s29 + $0xe0] sm:$0xff] }
  0xcf   : > { %598 = vmatprep.mubr.f32.mxu0 %v379_v21  ;;  %758 = vmatprep.mubr.f32.mxu1 %v411_v22  ;;  %v362_v20 = vld [vmem:[%s4469_s29 + $0x1e0] sm:$0xff]  ;;  %v395_v21 = vld [vmem:[%s4476_s7 + $0xe8] sm:$0xff] }
  0xd0   : > { %v427_v22 = vld [vmem:[%s4476_s7 + $0x1e8] sm:$0xff] }
  0xd2   : > { %599 = vmatmul.mubr.f32.gmra.mxu0 %v315_v23  ;;  %759 = vmatmul.mubr.f32.gmra.mxu1 %v347_v24  ;;  %v331_v23 = vld [vmem:[%s4469_s29 + $0xe8] sm:$0xff] }
  0xd3   : > { %603 = vmatprep.mubr.f32.mxu0 %v380_v25  ;;  %763 = vmatprep.mubr.f32.mxu1 %v412_v26  ;;  %v363_v24 = vld [vmem:[%s4469_s29 + $0x1e8] sm:$0xff]  ;;  %v396_v25 = vld [vmem:[%s4476_s7 + $0xf0] sm:$0xff] }
  0xd4   : > { %v428_v26 = vld [vmem:[%s4476_s7 + $0x1f0] sm:$0xff] }
  0xd6   : > { %604 = vmatmul.mubr.f32.gmra.mxu0 %v316_v27  ;;  %764 = vmatmul.mubr.f32.gmra.mxu1 %v348_v28  ;;  %v332_v27 = vld [vmem:[%s4469_s29 + $0xf0] sm:$0xff] }
  0xd7   : > { %608 = vmatprep.mubr.f32.mxu0 %v381_v29  ;;  %768 = vmatprep.mubr.f32.mxu1 %v413_v30  ;;  %v364_v28 = vld [vmem:[%s4469_s29 + $0x1f0] sm:$0xff]  ;;  %v397_v29 = vld [vmem:[%s4476_s7 + $0xf8] sm:$0xff] }
  0xd8   : > { %v429_v30 = vld [vmem:[%s4476_s7 + $0x1f8] sm:$0xff] }
  0xda   : > { %609 = vmatmul.mubr.f32.gmra.mxu0 %v317_v31  ;;  %769 = vmatmul.mubr.f32.gmra.mxu1 %v349_v32  ;;  %v333_v31 = vld [vmem:[%s4469_s29 + $0xf8] sm:$0xff] }
  0xdb   : > { %613 = vmatprep.mubr.f32.mxu0 %v382_v33  ;;  %773 = vmatprep.mubr.f32.mxu1 %v414_v34  ;;  %v365_v32 = vld [vmem:[%s4469_s29 + $0x1f8] sm:$0xff]  ;;  %v4681_v33 = vld [vmem:[%s5982_s3] ss:$0 sm:$0xff] }
  0xde   : > { %614 = vmatmul.mubr.f32.gmra.mxu0 %v318_v35  ;;  %774 = vmatmul.mubr.f32.gmra.mxu1 %v350_v36 }
  0xdf   : > { %618 = vmatprep.mubr.f32.mxu0 %v383_v37  ;;  %778 = vmatprep.mubr.f32.mxu1 %v415_v38 }
  0xe2   : > { %619 = vmatmul.mubr.f32.gmra.mxu0 %v319_v39  ;;  %779 = vmatmul.mubr.f32.gmra.mxu1 %v351_v40 }
  0xe3   : > { %623 = vmatprep.mubr.f32.mxu0 %v384_v41  ;;  %783 = vmatprep.mubr.f32.mxu1 %v416_v42 }
  0xe6   : > { %624 = vmatmul.mubr.f32.gmra.mxu0 %v320_v43  ;;  %784 = vmatmul.mubr.f32.gmra.mxu1 %v352_v44 }
  0xe7   : > { %628 = vmatprep.mubr.f32.mxu0 %v385_v45  ;;  %788 = vmatprep.mubr.f32.mxu1 %v417_v46 }
  0xea   : > { %629 = vmatmul.mubr.f32.gmra.mxu0 %v321_v47  ;;  %789 = vmatmul.mubr.f32.gmra.mxu1 %v353_v48 }
  0xeb   : > { %633 = vmatprep.mubr.f32.mxu0 %v386_v49  ;;  %793 = vmatprep.mubr.f32.mxu1 %v418_v50 }
  0xee   : > { %634 = vmatmul.mubr.f32.gmra.mxu0 %v322_v51  ;;  %794 = vmatmul.mubr.f32.gmra.mxu1 %v354_v52 }
  0xef   : > { %638 = vmatprep.mubr.f32.mxu0 %v387_v53  ;;  %798 = vmatprep.mubr.f32.mxu1 %v419_v54 }
  0xf2   : > { %639 = vmatmul.mubr.f32.gmra.mxu0 %v323_v55  ;;  %799 = vmatmul.mubr.f32.gmra.mxu1 %v355_v56 }
  0xf3   : > { %643 = vmatprep.mubr.f32.mxu0 %v388_v57  ;;  %803 = vmatprep.mubr.f32.mxu1 %v420_v58  ;;  %v4694_v58 = vld [vmem:[%s5983_s4] ss:$0 sm:$0xff] }
  0xf6   : > { %644 = vmatmul.mubr.f32.gmra.mxu0 %v324_v59  ;;  %804 = vmatmul.mubr.f32.gmra.mxu1 %v356_v60 }
  0xf7   : > { %648 = vmatprep.mubr.f32.mxu0 %v389_v61  ;;  %808 = vmatprep.mubr.f32.mxu1 %v421_v62 }
  0xfa   : > { %649 = vmatmul.mubr.f32.gmra.mxu0 %v325_v63  ;;  %809 = vmatmul.mubr.f32.gmra.mxu1 %v357_v0 }
  0xfb   : > { %653 = vmatprep.mubr.f32.mxu0 %v390_v1  ;;  %813 = vmatprep.mubr.f32.mxu1 %v422_v2 }
  0xfe   : > { %654 = vmatmul.mubr.f32.gmra.mxu0 %v326_v3  ;;  %814 = vmatmul.mubr.f32.gmra.mxu1 %v358_v4 }
  0xff   : > { %658 = vmatprep.mubr.f32.mxu0 %v391_v5  ;;  %818 = vmatprep.mubr.f32.mxu1 %v423_v6 }
 0x102   : > { %659 = vmatmul.mubr.f32.gmra.mxu0 %v327_v7  ;;  %819 = vmatmul.mubr.f32.gmra.mxu1 %v359_v8 }
 0x103   : > { %663 = vmatprep.mubr.f32.mxu0 %v392_v9  ;;  %823 = vmatprep.mubr.f32.mxu1 %v424_v10 }
 0x106   : > { %664 = vmatmul.mubr.f32.gmra.mxu0 %v328_v11  ;;  %824 = vmatmul.mubr.f32.gmra.mxu1 %v360_v12 }
 0x107   : > { %668 = vmatprep.mubr.f32.mxu0 %v393_v13  ;;  %828 = vmatprep.mubr.f32.mxu1 %v425_v14 }
 0x10a   : > { %669 = vmatmul.mubr.f32.gmra.mxu0 %v329_v15  ;;  %829 = vmatmul.mubr.f32.gmra.mxu1 %v361_v16 }
 0x10b   : > { %673 = vmatprep.mubr.f32.mxu0 %v394_v17  ;;  %833 = vmatprep.mubr.f32.mxu1 %v426_v18 }
 0x10e   : > { %674 = vmatmul.mubr.f32.gmra.mxu0 %v330_v19  ;;  %834 = vmatmul.mubr.f32.gmra.mxu1 %v362_v20 }
 0x10f   : > { %678 = vmatprep.mubr.f32.mxu0 %v395_v21  ;;  %838 = vmatprep.mubr.f32.mxu1 %v427_v22 }
 0x112   : > { %679 = vmatmul.mubr.f32.gmra.mxu0 %v331_v23  ;;  %839 = vmatmul.mubr.f32.gmra.mxu1 %v363_v24 }
 0x113   : > { %683 = vmatprep.mubr.f32.mxu0 %v396_v25  ;;  %843 = vmatprep.mubr.f32.mxu1 %v428_v26 }
 0x116   : > { %684 = vmatmul.mubr.f32.gmra.mxu0 %v332_v27  ;;  %844 = vmatmul.mubr.f32.gmra.mxu1 %v364_v28 }
 0x117   : > { %688 = vmatprep.mubr.f32.mxu0 %v397_v29  ;;  %848 = vmatprep.mubr.f32.mxu1 %v429_v30 }
 0x11a   : > { %689 = vmatmul.mubr.f32.gmra.mxu0 %v333_v31  ;;  %849 = vmatmul.mubr.f32.gmra.mxu1 %v365_v32 }
 0x15e   : > { %v535_v34 = vpop.f32.mrf.mxu0  ;;  %v695_v35 = vpop.f32.mrf.mxu1 }
 0x15f   : > { %v536_v36 = vadd.f32 %v4681_v33, %v535_v34  ;;  %v696_v37 = vadd.f32 %v4681_v33, %v695_v35 }
 0x160   : > { %v537_v38 = vpop.f32.mrf.mxu0  ;;  %v697_v39 = vpop.f32.mrf.mxu1 }
 0x161   : > { %3886 = vtanh.f32 %v536_v36 }
 0x162   : > { %v540_v40 = vpop.f32.mrf.mxu0  ;;  %v700_v41 = vpop.f32.mrf.mxu1  ;;  %3888 = vtanh.f32 %v696_v37 }
 0x163   : > { %v541_v42 = vadd.f32 %v4681_v33, %v540_v40  ;;  %v701_v43 = vadd.f32 %v4681_v33, %v700_v41 }
 0x164   : > { %v542_v44 = vpop.f32.mrf.mxu0  ;;  %v702_v45 = vpop.f32.mrf.mxu1 }
 0x165   : > { %3890 = vtanh.f32 %v701_v43 }
 0x166   : > { %v545_v46 = vpop.f32.mrf.mxu0  ;;  %v705_v47 = vpop.f32.mrf.mxu1  ;;  %3892 = vtanh.f32 %v541_v42 }
 0x167   : > { %v546_v48 = vadd.f32 %v4681_v33, %v545_v46  ;;  %v706_v49 = vadd.f32 %v4681_v33, %v705_v47 }
 0x168   : > { %v547_v50 = vpop.f32.mrf.mxu0  ;;  %v707_v51 = vpop.f32.mrf.mxu1 }
 0x169   : > { %3894 = vtanh.f32 %v546_v48 }
 0x16a   : > { %3896 = vtanh.f32 %v706_v49  ;;  %v550_v52 = vpop.f32.mrf.mxu0  ;;  %v710_v53 = vpop.f32.mrf.mxu1 }
 0x16b   : > { %v551_v54 = vadd.f32 %v4681_v33, %v550_v52  ;;  %v711_v55 = vadd.f32 %v4681_v33, %v710_v53 }
 0x16c   : > { %v552_v56 = vpop.f32.mrf.mxu0  ;;  %v712_v57 = vpop.f32.mrf.mxu1 }
 0x16d   : > { %3898 = vtanh.f32 %v551_v54 }
 0x16e   : > { %v3887_v59 = vpop.eup %3886  ;;  %3900 = vtanh.f32 %v711_v55  ;;  %v555_v60 = vpop.f32.mrf.mxu0 }
 0x16f   : > { %v715_v61 = vpop.f32.mrf.mxu1  ;;  %v556_v62 = vadd.f32 %v4681_v33, %v555_v60  ;;  %v925_v0 = vmul.f32 %v3887_v59, %v4694_v58  ;;  %v3889_v1 = vpop.eup %3888 }
 0x170   : > { %v716_v63 = vadd.f32 %v4681_v33, %v715_v61  ;;  %v557_v2 = vpop.f32.mrf.mxu0  ;;  %v957_v9 = vmul.f32 %v3889_v1, %v4694_v58 }
 0x171   : > { %v717_v3 = vpop.f32.mrf.mxu1  ;;  %3902 = vtanh.f32 %v556_v62  ;;  %989 = vadd.xlane.f32.xlu0 %v925_v0 }
 0x172   : > { %3904 = vtanh.f32 %v716_v63  ;;  %v560_v4 = vpop.f32.mrf.mxu0  ;;  %v3891_v6 = vpop.eup %3890 }
 0x173   : > { %v720_v5 = vpop.f32.mrf.mxu1  ;;  %v561_v7 = vadd.f32 %v4681_v33, %v560_v4  ;;  %v3893_v10 = vpop.eup %3892  ;;  %v958_v12 = vmul.f32 %v3891_v6, %v4694_v58 }
 0x174   : > { %v721_v8 = vadd.f32 %v4681_v33, %v720_v5  ;;  %v562_v11 = vpop.f32.mrf.mxu0  ;;  %v926_v20 = vmul.f32 %v3893_v10, %v4694_v58 }
 0x175   : > { %v722_v13 = vpop.f32.mrf.mxu1  ;;  %3906 = vtanh.f32 %v561_v7  ;;  %1053 = vadd.xlane.f32.xlu0 %v957_v9  ;;  %1055 = vadd.xlane.f32.xlu1 %v958_v12 }
 0x176   : > { %v3895_v14 = vpop.eup %3894  ;;  %3908 = vtanh.f32 %v721_v8  ;;  %v565_v15 = vpop.f32.mrf.mxu0 }
 0x177   : > { %v725_v16 = vpop.f32.mrf.mxu1  ;;  %v3897_v17 = vpop.eup %3896  ;;  %v566_v18 = vadd.f32 %v4681_v33, %v565_v15  ;;  %v927_v19 = vmul.f32 %v3895_v14, %v4694_v58 }
 0x178   : > { %v726_v21 = vadd.f32 %v4681_v33, %v725_v16  ;;  %v567_v22 = vpop.f32.mrf.mxu0  ;;  %v959_v24 = vmul.f32 %v3897_v17, %v4694_v58 }
 0x179   : > { %v727_v23 = vpop.f32.mrf.mxu1  ;;  %3910 = vtanh.f32 %v566_v18  ;;  %991 = vadd.xlane.f32.xlu0 %v926_v20  ;;  %993 = vadd.xlane.f32.xlu1 %v927_v19 }
 0x17a   : > { %v3899_v25 = vpop.eup %3898  ;;  %v570_v26 = vpop.f32.mrf.mxu0  ;;  %3912 = vtanh.f32 %v726_v21 }
 0x17b   : > { %v730_v27 = vpop.f32.mrf.mxu1  ;;  %v3901_v28 = vpop.eup %3900  ;;  %v571_v29 = vadd.f32 %v4681_v33, %v570_v26  ;;  %v928_v30 = vmul.f32 %v3899_v25, %v4694_v58 }
 0x17c   : > { %v731_v31 = vadd.f32 %v4681_v33, %v730_v27  ;;  %v572_v32 = vpop.f32.mrf.mxu0  ;;  %v960_v37 = vmul.f32 %v3901_v28, %v4694_v58 }
 0x17d   : > { %v732_v34 = vpop.f32.mrf.mxu1  ;;  %3914 = vtanh.f32 %v571_v29  ;;  %1057 = vadd.xlane.f32.xlu0 %v959_v24  ;;  %995 = vadd.xlane.f32.xlu1 %v928_v30 }
 0x17e   : > { %v3903_v35 = vpop.eup %3902  ;;  %v575_v36 = vpop.f32.mrf.mxu0  ;;  %3916 = vtanh.f32 %v731_v31 }
 0x17f   : > { %v735_v38 = vpop.f32.mrf.mxu1  ;;  %v3905_v39 = vpop.eup %3904  ;;  %v576_v40 = vadd.f32 %v4681_v33, %v575_v36  ;;  %v929_v41 = vmul.f32 %v3903_v35, %v4694_v58 }
 0x180   : > { %v736_v42 = vadd.f32 %v4681_v33, %v735_v38  ;;  %v577_v43 = vpop.f32.mrf.mxu0  ;;  %v961_v45 = vmul.f32 %v3905_v39, %v4694_v58 }
 0x181   : > { %v737_v44 = vpop.f32.mrf.mxu1  ;;  %3918 = vtanh.f32 %v576_v40  ;;  %997 = vadd.xlane.f32.xlu0 %v929_v41  ;;  %1059 = vadd.xlane.f32.xlu1 %v960_v37 }
 0x182   : > { %v3907_v46 = vpop.eup %3906  ;;  %v580_v47 = vpop.f32.mrf.mxu0  ;;  %3920 = vtanh.f32 %v736_v42 }
 0x183   : > { %v740_v48 = vpop.f32.mrf.mxu1  ;;  %v3909_v49 = vpop.eup %3908  ;;  %v581_v50 = vadd.f32 %v4681_v33, %v580_v47  ;;  %v930_v51 = vmul.f32 %v3907_v46, %v4694_v58 }
 0x184   : > { %v741_v52 = vadd.f32 %v4681_v33, %v740_v48  ;;  %v582_v53 = vpop.f32.mrf.mxu0  ;;  %v962_v57 = vmul.f32 %v3909_v49, %v4694_v58 }
 0x185   : > { %v742_v54 = vpop.f32.mrf.mxu1  ;;  %3922 = vtanh.f32 %v581_v50  ;;  %1061 = vadd.xlane.f32.xlu0 %v961_v45  ;;  %999 = vadd.xlane.f32.xlu1 %v930_v51 }
 0x186   : > { %v3911_v55 = vpop.eup %3910  ;;  %v585_v56 = vpop.f32.mrf.mxu0  ;;  %3924 = vtanh.f32 %v741_v52 }
 0x187   : > { %v745_v59 = vpop.f32.mrf.mxu1  ;;  %v3913_v60 = vpop.eup %3912  ;;  %v586_v61 = vadd.f32 %v4681_v33, %v585_v56  ;;  %v931_v62 = vmul.f32 %v3911_v55, %v4694_v58 }
 0x188   : > { %v746_v63 = vadd.f32 %v4681_v33, %v745_v59  ;;  %v587_v0 = vpop.f32.mrf.mxu0  ;;  %v963_v2 = vmul.f32 %v3913_v60, %v4694_v58 }
 0x189   : > { %v747_v1 = vpop.f32.mrf.mxu1  ;;  %3926 = vtanh.f32 %v586_v61  ;;  %1001 = vadd.xlane.f32.xlu0 %v931_v62  ;;  %1063 = vadd.xlane.f32.xlu1 %v962_v57 }
 0x18a   : > { %v3915_v3 = vpop.eup %3914  ;;  %v590_v4 = vpop.f32.mrf.mxu0  ;;  %3928 = vtanh.f32 %v746_v63 }
 0x18b   : > { %v750_v5 = vpop.f32.mrf.mxu1  ;;  %v3917_v6 = vpop.eup %3916  ;;  %v591_v7 = vadd.f32 %v4681_v33, %v590_v4  ;;  %v932_v8 = vmul.f32 %v3915_v3, %v4694_v58 }
 0x18c   : > { %v751_v9 = vadd.f32 %v4681_v33, %v750_v5  ;;  %v592_v10 = vpop.f32.mrf.mxu0  ;;  %v964_v14 = vmul.f32 %v3917_v6, %v4694_v58 }
 0x18d   : > { %v752_v11 = vpop.f32.mrf.mxu1  ;;  %3930 = vtanh.f32 %v591_v7  ;;  %1065 = vadd.xlane.f32.xlu0 %v963_v2  ;;  %1003 = vadd.xlane.f32.xlu1 %v932_v8 }
 0x18e   : > { %v3919_v12 = vpop.eup %3918  ;;  %v595_v13 = vpop.f32.mrf.mxu0  ;;  %3932 = vtanh.f32 %v751_v9 }
 0x18f   : > { %v755_v15 = vpop.f32.mrf.mxu1  ;;  %v3921_v16 = vpop.eup %3920  ;;  %v596_v17 = vadd.f32 %v4681_v33, %v595_v13  ;;  %v933_v18 = vmul.f32 %v3919_v12, %v4694_v58 }
 0x190   : > { %v756_v19 = vadd.f32 %v4681_v33, %v755_v15  ;;  %v597_v20 = vpop.f32.mrf.mxu0  ;;  %v965_v22 = vmul.f32 %v3921_v16, %v4694_v58 }
 0x191   : > { %v757_v21 = vpop.f32.mrf.mxu1  ;;  %3934 = vtanh.f32 %v596_v17  ;;  %1005 = vadd.xlane.f32.xlu0 %v933_v18  ;;  %1067 = vadd.xlane.f32.xlu1 %v964_v14 }
 0x192   : > { %v3923_v23 = vpop.eup %3922  ;;  %v600_v24 = vpop.f32.mrf.mxu0  ;;  %3936 = vtanh.f32 %v756_v19 }
 0x193   : > { %v760_v25 = vpop.f32.mrf.mxu1  ;;  %v3925_v26 = vpop.eup %3924  ;;  %v601_v27 = vadd.f32 %v4681_v33, %v600_v24  ;;  %v934_v28 = vmul.f32 %v3923_v23, %v4694_v58 }
 0x194   : > { %v761_v29 = vadd.f32 %v4681_v33, %v760_v25  ;;  %v602_v30 = vpop.f32.mrf.mxu0  ;;  %v966_v35 = vmul.f32 %v3925_v26, %v4694_v58 }
 0x195   : > { %v762_v31 = vpop.f32.mrf.mxu1  ;;  %3938 = vtanh.f32 %v601_v27  ;;  %1069 = vadd.xlane.f32.xlu0 %v965_v22  ;;  %1007 = vadd.xlane.f32.xlu1 %v934_v28 }
 0x196   : > { %v3927_v32 = vpop.eup %3926  ;;  %v605_v34 = vpop.f32.mrf.mxu0  ;;  %3940 = vtanh.f32 %v761_v29 }
 0x197   : > { %v765_v36 = vpop.f32.mrf.mxu1  ;;  %v3929_v37 = vpop.eup %3928  ;;  %v606_v38 = vadd.f32 %v4681_v33, %v605_v34  ;;  %v935_v39 = vmul.f32 %v3927_v32, %v4694_v58 }
 0x198   : > { %v766_v40 = vadd.f32 %v4681_v33, %v765_v36  ;;  %v607_v41 = vpop.f32.mrf.mxu0  ;;  %v967_v43 = vmul.f32 %v3929_v37, %v4694_v58 }
 0x199   : > { %v767_v42 = vpop.f32.mrf.mxu1  ;;  %3942 = vtanh.f32 %v606_v38  ;;  %1009 = vadd.xlane.f32.xlu0 %v935_v39  ;;  %1071 = vadd.xlane.f32.xlu1 %v966_v35 }
 0x19a   : > { %v3931_v44 = vpop.eup %3930  ;;  %v610_v45 = vpop.f32.mrf.mxu0  ;;  %3944 = vtanh.f32 %v766_v40 }
 0x19b   : > { %v770_v46 = vpop.f32.mrf.mxu1  ;;  %v3933_v47 = vpop.eup %3932  ;;  %v611_v48 = vadd.f32 %v4681_v33, %v610_v45  ;;  %v936_v49 = vmul.f32 %v3931_v44, %v4694_v58 }
 0x19c   : > { %v771_v50 = vadd.f32 %v4681_v33, %v770_v46  ;;  %v612_v51 = vpop.f32.mrf.mxu0  ;;  %v968_v55 = vmul.f32 %v3933_v47, %v4694_v58 }
 0x19d   : > { %v772_v52 = vpop.f32.mrf.mxu1  ;;  %3946 = vtanh.f32 %v611_v48  ;;  %1073 = vadd.xlane.f32.xlu0 %v967_v43  ;;  %1011 = vadd.xlane.f32.xlu1 %v936_v49 }
 0x19e   : > { %v3935_v53 = vpop.eup %3934  ;;  %v615_v54 = vpop.f32.mrf.mxu0  ;;  %3948 = vtanh.f32 %v771_v50 }
 0x19f   : > { %v775_v56 = vpop.f32.mrf.mxu1  ;;  %v3937_v57 = vpop.eup %3936  ;;  %v616_v59 = vadd.f32 %v4681_v33, %v615_v54  ;;  %v937_v60 = vmul.f32 %v3935_v53, %v4694_v58 }
 0x1a0   : > { %v776_v61 = vadd.f32 %v4681_v33, %v775_v56  ;;  %v617_v62 = vpop.f32.mrf.mxu0  ;;  %v969_v0 = vmul.f32 %v3937_v57, %v4694_v58 }
 0x1a1   : > { %v777_v63 = vpop.f32.mrf.mxu1  ;;  %3950 = vtanh.f32 %v616_v59  ;;  %1013 = vadd.xlane.f32.xlu0 %v937_v60  ;;  %1075 = vadd.xlane.f32.xlu1 %v968_v55 }
 0x1a2   : > { %v3939_v1 = vpop.eup %3938  ;;  %v620_v2 = vpop.f32.mrf.mxu0  ;;  %3952 = vtanh.f32 %v776_v61 }
 0x1a3   : > { %v780_v3 = vpop.f32.mrf.mxu1  ;;  %v3941_v4 = vpop.eup %3940  ;;  %v621_v5 = vadd.f32 %v4681_v33, %v620_v2  ;;  %v938_v6 = vmul.f32 %v3939_v1, %v4694_v58 }
 0x1a4   : > { %v781_v7 = vadd.f32 %v4681_v33, %v780_v3  ;;  %v622_v8 = vpop.f32.mrf.mxu0  ;;  %v970_v12 = vmul.f32 %v3941_v4, %v4694_v58 }
 0x1a5   : > { %v782_v9 = vpop.f32.mrf.mxu1  ;;  %3954 = vtanh.f32 %v621_v5  ;;  %1077 = vadd.xlane.f32.xlu0 %v969_v0  ;;  %1015 = vadd.xlane.f32.xlu1 %v938_v6 }
 0x1a6   : > { %v3943_v10 = vpop.eup %3942  ;;  %v625_v11 = vpop.f32.mrf.mxu0  ;;  %3956 = vtanh.f32 %v781_v7 }
 0x1a7   : > { %v785_v13 = vpop.f32.mrf.mxu1  ;;  %v3945_v14 = vpop.eup %3944  ;;  %v626_v15 = vadd.f32 %v4681_v33, %v625_v11  ;;  %v939_v16 = vmul.f32 %v3943_v10, %v4694_v58 }
 0x1a8   : > { %v786_v17 = vadd.f32 %v4681_v33, %v785_v13  ;;  %v627_v18 = vpop.f32.mrf.mxu0  ;;  %v971_v20 = vmul.f32 %v3945_v14, %v4694_v58 }
 0x1a9   : > { %v787_v19 = vpop.f32.mrf.mxu1  ;;  %3958 = vtanh.f32 %v626_v15  ;;  %1017 = vadd.xlane.f32.xlu0 %v939_v16  ;;  %1079 = vadd.xlane.f32.xlu1 %v970_v12 }
 0x1aa   : > { %v3947_v21 = vpop.eup %3946  ;;  %v630_v22 = vpop.f32.mrf.mxu0  ;;  %3960 = vtanh.f32 %v786_v17 }
 0x1ab   : > { %v790_v23 = vpop.f32.mrf.mxu1  ;;  %v3949_v24 = vpop.eup %3948  ;;  %v631_v25 = vadd.f32 %v4681_v33, %v630_v22  ;;  %v940_v26 = vmul.f32 %v3947_v21, %v4694_v58 }
 0x1ac   : > { %v791_v27 = vadd.f32 %v4681_v33, %v790_v23  ;;  %v632_v28 = vpop.f32.mrf.mxu0  ;;  %v972_v32 = vmul.f32 %v3949_v24, %v4694_v58 }
 0x1ad   : > { %v792_v29 = vpop.f32.mrf.mxu1  ;;  %3962 = vtanh.f32 %v631_v25  ;;  %1081 = vadd.xlane.f32.xlu0 %v971_v20  ;;  %1019 = vadd.xlane.f32.xlu1 %v940_v26 }
 0x1ae   : > { %v3951_v30 = vpop.eup %3950  ;;  %v635_v31 = vpop.f32.mrf.mxu0  ;;  %3964 = vtanh.f32 %v791_v27 }
 0x1af   : > { %v795_v34 = vpop.f32.mrf.mxu1  ;;  %v3953_v35 = vpop.eup %3952  ;;  %v636_v36 = vadd.f32 %v4681_v33, %v635_v31  ;;  %v941_v37 = vmul.f32 %v3951_v30, %v4694_v58 }
 0x1b0   : > { %v796_v38 = vadd.f32 %v4681_v33, %v795_v34  ;;  %v637_v39 = vpop.f32.mrf.mxu0  ;;  %v973_v41 = vmul.f32 %v3953_v35, %v4694_v58 }
 0x1b1   : > { %v797_v40 = vpop.f32.mrf.mxu1  ;;  %3966 = vtanh.f32 %v636_v36  ;;  %1021 = vadd.xlane.f32.xlu0 %v941_v37  ;;  %1083 = vadd.xlane.f32.xlu1 %v972_v32 }
 0x1b2   : > { %v3955_v42 = vpop.eup %3954  ;;  %v640_v43 = vpop.f32.mrf.mxu0  ;;  %3968 = vtanh.f32 %v796_v38 }
 0x1b3   : > { %v800_v44 = vpop.f32.mrf.mxu1  ;;  %v3957_v45 = vpop.eup %3956  ;;  %v641_v46 = vadd.f32 %v4681_v33, %v640_v43  ;;  %v942_v47 = vmul.f32 %v3955_v42, %v4694_v58 }
 0x1b4   : > { %v801_v48 = vadd.f32 %v4681_v33, %v800_v44  ;;  %v642_v49 = vpop.f32.mrf.mxu0  ;;  %v974_v53 = vmul.f32 %v3957_v45, %v4694_v58 }
 0x1b5   : > { %v802_v50 = vpop.f32.mrf.mxu1  ;;  %3970 = vtanh.f32 %v641_v46  ;;  %1085 = vadd.xlane.f32.xlu0 %v973_v41  ;;  %1023 = vadd.xlane.f32.xlu1 %v942_v47 }
 0x1b6   : > { %v3959_v51 = vpop.eup %3958  ;;  %v645_v52 = vpop.f32.mrf.mxu0  ;;  %3972 = vtanh.f32 %v801_v48 }
 0x1b7   : > { %v805_v54 = vpop.f32.mrf.mxu1  ;;  %v3961_v55 = vpop.eup %3960  ;;  %v646_v56 = vadd.f32 %v4681_v33, %v645_v52  ;;  %v943_v57 = vmul.f32 %v3959_v51, %v4694_v58 }
 0x1b8   : > { %v806_v59 = vadd.f32 %v4681_v33, %v805_v54  ;;  %v647_v60 = vpop.f32.mrf.mxu0  ;;  %v975_v62 = vmul.f32 %v3961_v55, %v4694_v58 }
 0x1b9   : > { %v807_v61 = vpop.f32.mrf.mxu1  ;;  %3974 = vtanh.f32 %v646_v56  ;;  %1025 = vadd.xlane.f32.xlu0 %v943_v57  ;;  %1087 = vadd.xlane.f32.xlu1 %v974_v53 }
 0x1ba   : > { %v3963_v63 = vpop.eup %3962  ;;  %v650_v0 = vpop.f32.mrf.mxu0  ;;  %3976 = vtanh.f32 %v806_v59 }
 0x1bb   : > { %v810_v1 = vpop.f32.mrf.mxu1  ;;  %v3965_v2 = vpop.eup %3964  ;;  %v651_v3 = vadd.f32 %v4681_v33, %v650_v0  ;;  %v944_v4 = vmul.f32 %v3963_v63, %v4694_v58 }
 0x1bc   : > { %v811_v5 = vadd.f32 %v4681_v33, %v810_v1  ;;  %v652_v6 = vpop.f32.mrf.mxu0  ;;  %v976_v10 = vmul.f32 %v3965_v2, %v4694_v58 }
 0x1bd   : > { %v812_v7 = vpop.f32.mrf.mxu1  ;;  %3978 = vtanh.f32 %v651_v3  ;;  %1089 = vadd.xlane.f32.xlu0 %v975_v62  ;;  %1027 = vadd.xlane.f32.xlu1 %v944_v4 }
 0x1be   : > { %v3967_v8 = vpop.eup %3966  ;;  %v655_v9 = vpop.f32.mrf.mxu0  ;;  %3980 = vtanh.f32 %v811_v5 }
 0x1bf   : > { %v815_v11 = vpop.f32.mrf.mxu1  ;;  %v3969_v12 = vpop.eup %3968  ;;  %v656_v13 = vadd.f32 %v4681_v33, %v655_v9  ;;  %v945_v14 = vmul.f32 %v3967_v8, %v4694_v58 }
 0x1c0   : > { %v816_v15 = vadd.f32 %v4681_v33, %v815_v11  ;;  %v657_v16 = vpop.f32.mrf.mxu0  ;;  %v977_v18 = vmul.f32 %v3969_v12, %v4694_v58 }
 0x1c1   : > { %v817_v17 = vpop.f32.mrf.mxu1  ;;  %3982 = vtanh.f32 %v656_v13  ;;  %1029 = vadd.xlane.f32.xlu0 %v945_v14  ;;  %1091 = vadd.xlane.f32.xlu1 %v976_v10 }
 0x1c2   : > { %v3971_v19 = vpop.eup %3970  ;;  %v660_v20 = vpop.f32.mrf.mxu0  ;;  %3984 = vtanh.f32 %v816_v15 }
 0x1c3   : > { %v820_v21 = vpop.f32.mrf.mxu1  ;;  %v3973_v22 = vpop.eup %3972  ;;  %v661_v23 = vadd.f32 %v4681_v33, %v660_v20  ;;  %v946_v24 = vmul.f32 %v3971_v19, %v4694_v58 }
 0x1c4   : > { %v821_v25 = vadd.f32 %v4681_v33, %v820_v21  ;;  %v662_v26 = vpop.f32.mrf.mxu0  ;;  %v978_v30 = vmul.f32 %v3973_v22, %v4694_v58 }
 0x1c5   : > { %v822_v27 = vpop.f32.mrf.mxu1  ;;  %3986 = vtanh.f32 %v661_v23  ;;  %1093 = vadd.xlane.f32.xlu0 %v977_v18  ;;  %1031 = vadd.xlane.f32.xlu1 %v946_v24 }
 0x1c6   : > { %v3975_v28 = vpop.eup %3974  ;;  %v665_v29 = vpop.f32.mrf.mxu0  ;;  %3988 = vtanh.f32 %v821_v25 }
 0x1c7   : > { %v825_v31 = vpop.f32.mrf.mxu1  ;;  %v3977_v32 = vpop.eup %3976  ;;  %v666_v34 = vadd.f32 %v4681_v33, %v665_v29  ;;  %v947_v35 = vmul.f32 %v3975_v28, %v4694_v58 }
 0x1c8   : > { %v826_v36 = vadd.f32 %v4681_v33, %v825_v31  ;;  %v667_v37 = vpop.f32.mrf.mxu0  ;;  %v979_v39 = vmul.f32 %v3977_v32, %v4694_v58 }
 0x1c9   : > { %v827_v38 = vpop.f32.mrf.mxu1  ;;  %3990 = vtanh.f32 %v666_v34  ;;  %1033 = vadd.xlane.f32.xlu0 %v947_v35  ;;  %1095 = vadd.xlane.f32.xlu1 %v978_v30 }
 0x1ca   : > { %v3979_v40 = vpop.eup %3978  ;;  %v670_v41 = vpop.f32.mrf.mxu0  ;;  %3992 = vtanh.f32 %v826_v36 }
 0x1cb   : > { %v830_v42 = vpop.f32.mrf.mxu1  ;;  %v3981_v43 = vpop.eup %3980  ;;  %v671_v44 = vadd.f32 %v4681_v33, %v670_v41  ;;  %v948_v45 = vmul.f32 %v3979_v40, %v4694_v58 }
 0x1cc   : > { %v831_v46 = vadd.f32 %v4681_v33, %v830_v42  ;;  %v672_v47 = vpop.f32.mrf.mxu0  ;;  %v980_v51 = vmul.f32 %v3981_v43, %v4694_v58 }
 0x1cd   : > { %v832_v48 = vpop.f32.mrf.mxu1  ;;  %3994 = vtanh.f32 %v671_v44  ;;  %1097 = vadd.xlane.f32.xlu0 %v979_v39  ;;  %1035 = vadd.xlane.f32.xlu1 %v948_v45 }
 0x1ce   : > { %v3983_v49 = vpop.eup %3982  ;;  %v675_v50 = vpop.f32.mrf.mxu0  ;;  %3996 = vtanh.f32 %v831_v46  ;;  %v1181_v48 = vlaneseq }
 0x1cf   : > { %v835_v52 = vpop.f32.mrf.mxu1  ;;  %v3985_v53 = vpop.eup %3984  ;;  %v676_v54 = vadd.f32 %v4681_v33, %v675_v50  ;;  %v949_v55 = vmul.f32 %v3983_v49, %v4694_v58 }
 0x1d0   : > { %v836_v56 = vadd.f32 %v4681_v33, %v835_v52  ;;  %v677_v57 = vpop.f32.mrf.mxu0  ;;  %v981_v60 = vmul.f32 %v3985_v53, %v4694_v58  ;;  %v4830_v52 = vshrl.u32 %v1181_v48, 7 }
 0x1d1   : > { %v837_v59 = vpop.f32.mrf.mxu1  ;;  %3998 = vtanh.f32 %v676_v54  ;;  %1037 = vadd.xlane.f32.xlu0 %v949_v55  ;;  %1099 = vadd.xlane.f32.xlu1 %v980_v51  ;;  %v1182_v51 = vand.u32 127, %v1181_v48 }
 0x1d2   : > { %v3987_v61 = vpop.eup %3986  ;;  %v680_v62 = vpop.f32.mrf.mxu0  ;;  %4000 = vtanh.f32 %v836_v56 }
 0x1d3   : > { %v840_v63 = vpop.f32.mrf.mxu1  ;;  %v3989_v0 = vpop.eup %3988  ;;  %v681_v1 = vadd.f32 %v4681_v33, %v680_v62  ;;  %v950_v2 = vmul.f32 %v3987_v61, %v4694_v58  ;;  %v4837_v54 = vsub.s32 %v1182_v51, %v4830_v52 }
 0x1d4   : > { %v841_v3 = vadd.f32 %v4681_v33, %v840_v63  ;;  %v682_v4 = vpop.f32.mrf.mxu0  ;;  %v982_v8 = vmul.f32 %v3989_v0, %v4694_v58 }
 0x1d5   : > { %v842_v5 = vpop.f32.mrf.mxu1  ;;  %4002 = vtanh.f32 %v681_v1  ;;  %1101 = vadd.xlane.f32.xlu0 %v981_v60  ;;  %1039 = vadd.xlane.f32.xlu1 %v950_v2  ;;  %6051 = vst [vmem:[#allocation10_spill] sm:$0xff] %v4837_v54 }
 0x1d6   : > { %v3991_v6 = vpop.eup %3990  ;;  %v685_v7 = vpop.f32.mrf.mxu0  ;;  %4004 = vtanh.f32 %v841_v3 }
 0x1d7   : > { %v845_v9 = vpop.f32.mrf.mxu1  ;;  %v3993_v10 = vpop.eup %3992  ;;  %v686_v11 = vadd.f32 %v4681_v33, %v685_v7  ;;  %v951_v12 = vmul.f32 %v3991_v6, %v4694_v58 }
 0x1d8   : > { %v846_v13 = vadd.f32 %v4681_v33, %v845_v9  ;;  %v687_v14 = vpop.f32.mrf.mxu0  ;;  %v983_v16 = vmul.f32 %v3993_v10, %v4694_v58 }
 0x1d9   : > { %v847_v15 = vpop.f32.mrf.mxu1  ;;  %4006 = vtanh.f32 %v686_v11  ;;  %1041 = vadd.xlane.f32.xlu0 %v951_v12  ;;  %1103 = vadd.xlane.f32.xlu1 %v982_v8 }
 0x1da   : > { %v3995_v17 = vpop.eup %3994  ;;  %v690_v18 = vpop.f32.mrf.mxu0  ;;  %4008 = vtanh.f32 %v846_v13 }
 0x1db   : > { %v850_v19 = vpop.f32.mrf.mxu1  ;;  %v3997_v20 = vpop.eup %3996  ;;  %v691_v21 = vadd.f32 %v4681_v33, %v690_v18  ;;  %v952_v22 = vmul.f32 %v3995_v17, %v4694_v58 }
 0x1dc   : > { %v851_v23 = vadd.f32 %v4681_v33, %v850_v19  ;;  %v692_v24 = vpop.f32.mrf.mxu0  ;;  %v984_v27 = vmul.f32 %v3997_v20, %v4694_v58 }
 0x1dd   : > { %v852_v25 = vpop.f32.mrf.mxu1  ;;  %4010 = vtanh.f32 %v691_v21  ;;  %1105 = vadd.xlane.f32.xlu0 %v983_v16  ;;  %1043 = vadd.xlane.f32.xlu1 %v952_v22 }
 0x1de   : > { %v3999_v26 = vpop.eup %3998  ;;  %4012 = vtanh.f32 %v851_v23 }
 0x1df   : > { %v4001_v28 = vpop.eup %4000  ;;  %v953_v29 = vmul.f32 %v3999_v26, %v4694_v58 }
 0x1e0   : > { %v985_v30 = vmul.f32 %v4001_v28, %v4694_v58 }
 0x1e1   : > { %1045 = vadd.xlane.f32.xlu0 %v953_v29  ;;  %1107 = vadd.xlane.f32.xlu1 %v984_v27 }
 0x1e2   : > { %v4003_v31 = vpop.eup %4002 }
 0x1e3   : > { %v4005_v32 = vpop.eup %4004  ;;  %v954_v33 = vmul.f32 %v4003_v31, %v4694_v58 }
 0x1e4   : > { %v986_v35 = vmul.f32 %v4005_v32, %v4694_v58 }
 0x1e5   : > { %1109 = vadd.xlane.f32.xlu0 %v985_v30  ;;  %1047 = vadd.xlane.f32.xlu1 %v954_v33 }
 0x1e6   : > { %v4007_v34 = vpop.eup %4006 }
 0x1e7   : > { %v4009_v36 = vpop.eup %4008  ;;  %v955_v37 = vmul.f32 %v4007_v34, %v4694_v58 }
 0x1e8   : > { %v987_v38 = vmul.f32 %v4009_v36, %v4694_v58 }
 0x1e9   : > { %1049 = vadd.xlane.f32.xlu0 %v955_v37  ;;  %1111 = vadd.xlane.f32.xlu1 %v986_v35 }
 0x1ea   : > { %v4011_v39 = vpop.eup %4010 }
 0x1eb   : > { %v4013_v40 = vpop.eup %4012  ;;  %v956_v41 = vmul.f32 %v4011_v39, %v4694_v58 }
 0x1ec   : > { %v988_v42 = vmul.f32 %v4013_v40, %v4694_v58 }
 0x1ed   : > { %1113 = vadd.xlane.f32.xlu0 %v987_v38  ;;  %1051 = vadd.xlane.f32.xlu1 %v956_v41 }
 0x1f1   : > { %1115 = vadd.xlane.f32.xlu1 %v988_v42 }
 0x1fa   : > { %v4816_v43 = vpop.xlane.xlu0 %989 }
 0x1fb   : > { %v1186_v59 = vrot.slane %v4816_v43, %v4837_v54 }
 0x1fe   : > { %v4818_v44 = vpop.xlane.xlu0 %1053  ;;  %v4820_v45 = vpop.xlane.xlu1 %1055 }
 0x1ff   : > { %v1318_v2 = vrot.slane %v4820_v45, %v4837_v54  ;;  %v1314_v3 = vrot.slane %v4818_v44, %v4837_v54 }
 0x201   : > { %v1474_v14 = vsel %vm1439_vm0, %v1318_v2, %v1314_v3 }
 0x202   : > { %v4822_v46 = vpop.xlane.xlu0 %991  ;;  %v4824_v47 = vpop.xlane.xlu1 %993 }
 0x203   : > { %v1190_v55 = vrot.slane %v4822_v46, %v4837_v54  ;;  %v1194_v60 = vrot.slane %v4824_v47, %v4837_v54 }
 0x205   : > { %v1440_v61 = vsel %vm1439_vm0, %v1190_v55, %v1186_v59 }
 0x206   : > { %v4826_v49 = vpop.xlane.xlu0 %1057  ;;  %v4828_v50 = vpop.xlane.xlu1 %995  ;;  %v1442_v5 = vsel %vm1441_vm1, %v1194_v60, %v1440_v61 }
 0x207   : > { %v1198_v62 = vrot.slane %v4828_v50, %v4837_v54  ;;  %v1322_v6 = vrot.slane %v4826_v49, %v4837_v54 }
 0x209   : > { %v1444_v8 = vsel %vm1443_vm2, %v1198_v62, %v1442_v5  ;;  %v1475_v18 = vsel %vm1441_vm1, %v1322_v6, %v1474_v14 }
 0x20a   : > { %v4832_v58 = vpop.xlane.xlu0 %997  ;;  %v4834_v53 = vpop.xlane.xlu1 %1059 }
 0x20b   : > { %v1202_v0 = vrot.slane %v4832_v58, %v4837_v54  ;;  %v1326_v9 = vrot.slane %v4834_v53, %v4837_v54 }
 0x20d   : > { %v1446_v11 = vsel %vm1445_vm3, %v1202_v0, %v1444_v8  ;;  %v1476_v21 = vsel %vm1443_vm2, %v1326_v9, %v1475_v18 }
 0x20e   : > { %v4841_v56 = vpop.xlane.xlu0 %1061  ;;  %v4843_v57 = vpop.xlane.xlu1 %999 }
 0x20f   : > { %v1206_v4 = vrot.slane %v4843_v57, %v4837_v54  ;;  %v1330_v12 = vrot.slane %v4841_v56, %v4837_v54 }
 0x211   : > { %v1448_v17 = vsel %vm1447_vm4, %v1206_v4, %v1446_v11  ;;  %v1477_v24 = vsel %vm1445_vm3, %v1330_v12, %v1476_v21 }
 0x212   : > { %v4852_v63 = vpop.xlane.xlu0 %1001  ;;  %v4856_v1 = vpop.xlane.xlu1 %1063 }
 0x213   : > { %v1210_v7 = vrot.slane %v4852_v63, %v4837_v54  ;;  %v1334_v15 = vrot.slane %v4856_v1, %v4837_v54 }
 0x215   : > { %v1450_v20 = vsel %vm1449_vm5, %v1210_v7, %v1448_v17  ;;  %v1478_v28 = vsel %vm1447_vm4, %v1334_v15, %v1477_v24 }
 0x216   : > { %v4872_v10 = vpop.xlane.xlu0 %1065  ;;  %v4877_v13 = vpop.xlane.xlu1 %1003 }
 0x217   : > { %v1214_v16 = vrot.slane %v4877_v13, %v4837_v54  ;;  %v1338_v19 = vrot.slane %v4872_v10, %v4837_v54 }
 0x219   : > { %v1452_v23 = vsel %vm1451_vm6, %v1214_v16, %v1450_v20  ;;  %v1479_v29 = vsel %vm1449_vm5, %v1338_v19, %v1478_v28 }
 0x21a   : > { %v4890_v22 = vpop.xlane.xlu0 %1005  ;;  %v4894_v25 = vpop.xlane.xlu1 %1067  ;;  %v1511_v26 = vsel %vm1510_vm7, %v1452_v23, -inf }
 0x21b   : > { %v1342_v27 = vrot.slane %v4894_v25, %v4837_v54  ;;  %1512 = vmax.xlane.f32.xlu0 %v1511_v26  ;;  %v1218_v38 = vrot.slane %v4890_v22, %v4837_v54 }
 0x21d   : > { %v1480_v31 = vsel %vm1451_vm6, %v1342_v27, %v1479_v29 }
 0x21e   : > { %v4901_v30 = vpop.xlane.xlu0 %1069  ;;  %v4904_v32 = vpop.xlane.xlu1 %1007  ;;  %v1523_v33 = vsel %vm1510_vm7, %v1480_v31, -inf }
 0x21f   : > { %1524 = vmax.xlane.f32.xlu0 %v1523_v33  ;;  %v1222_v39 = vrot.slane %v4904_v32, %v4837_v54  ;;  %v1346_v51 = vrot.slane %v4901_v30, %v4837_v54 }
 0x221   : > { %v1453_v48 = vsel %vm1439_vm0, %v1222_v39, %v1218_v38  ;;  %v4290_v38 = vmov 0  }
 0x222   : > { %v4907_v34 = vpop.xlane.xlu0 %1009  ;;  %v4909_v35 = vpop.xlane.xlu1 %1071  ;;  %3884 = vset.pattern.permute.xlu0 %v4290_v38  ;;  %3885 = vset.pattern.permute.xlu1 %v4290_v38 }
 0x223   : > { %v1226_v42 = vrot.slane %v4907_v34, %v4837_v54  ;;  %v1350_v55 = vrot.slane %v4909_v35, %v4837_v54 }
 0x225   : > { %v1454_v62 = vsel %vm1441_vm1, %v1226_v42, %v1453_v48  ;;  %v1481_v2 = vsel %vm1439_vm0, %v1350_v55, %v1346_v51 }
 0x226   : > { %v4911_v36 = vpop.xlane.xlu0 %1073  ;;  %v4913_v37 = vpop.xlane.xlu1 %1011 }
 0x227   : > { %v1230_v61 = vrot.slane %v4913_v37, %v4837_v54  ;;  %v1354_v0 = vrot.slane %v4911_v36, %v4837_v54 }
 0x229   : > { %v1455_v6 = vsel %vm1443_vm2, %v1230_v61, %v1454_v62  ;;  %v1482_v9 = vsel %vm1441_vm1, %v1354_v0, %v1481_v2 }
 0x22a   : > { %v4919_v40 = vpop.xlane.xlu0 %1013  ;;  %v4921_v41 = vpop.xlane.xlu1 %1075 }
 0x22b   : > { %v1234_v4 = vrot.slane %v4919_v40, %v4837_v54  ;;  %v1358_v7 = vrot.slane %v4921_v41, %v4837_v54 }
 0x22d   : > { %v1456_v14 = vsel %vm1445_vm3, %v1234_v4, %v1455_v6  ;;  %v1483_v17 = vsel %vm1443_vm2, %v1358_v7, %v1482_v9 }
 0x22e   : > { %v4930_v59 = vpop.xlane.xlu0 %1077  ;;  %v4932_v60 = vpop.xlane.xlu1 %1015 }
 0x22f   : > { %v1238_v8 = vrot.slane %v4932_v60, %v4837_v54  ;;  %v1362_v15 = vrot.slane %v4930_v59, %v4837_v54 }
 0x231   : > { %v1457_v20 = vsel %vm1447_vm4, %v1238_v8, %v1456_v14  ;;  %v1484_v27 = vsel %vm1445_vm3, %v1362_v15, %v1483_v17 }
 0x232   : > { %v4940_v3 = vpop.xlane.xlu0 %1017  ;;  %v4944_v5 = vpop.xlane.xlu1 %1079 }
 0x233   : > { %v1242_v11 = vrot.slane %v4940_v3, %v4837_v54  ;;  %v1366_v18 = vrot.slane %v4944_v5, %v4837_v54 }
 0x235   : > { %v1458_v23 = vsel %vm1449_vm5, %v1242_v11, %v1457_v20  ;;  %v1485_v33 = vsel %vm1447_vm4, %v1366_v18, %v1484_v27 }
 0x236   : > { %v4954_v12 = vpop.xlane.xlu0 %1081  ;;  %v4959_v16 = vpop.xlane.xlu1 %1019 }
 0x237   : > { %v1246_v19 = vrot.slane %v4959_v16, %v4837_v54  ;;  %v1370_v21 = vrot.slane %v4954_v12, %v4837_v54 }
 0x239   : > { %v1459_v26 = vsel %vm1451_vm6, %v1246_v19, %v1458_v23  ;;  %v1486_v39 = vsel %vm1449_vm5, %v1370_v21, %v1485_v33 }
 0x23a   : > { %v4970_v24 = vpop.xlane.xlu0 %1021  ;;  %v4974_v28 = vpop.xlane.xlu1 %1083  ;;  %v1514_v29 = vsel %vm1510_vm7, %v1459_v26, -inf }
 0x23b   : > { %v1374_v31 = vrot.slane %v4974_v28, %v4837_v54  ;;  %1515 = vmax.xlane.f32.xlu1 %v1514_v29  ;;  %v1250_v4 = vrot.slane %v4970_v24, %v4837_v54 }
 0x23d   : > { %v1487_v48 = vsel %vm1451_vm6, %v1374_v31, %v1486_v39 }
 0x23e   : > { %v4981_v42 = vpop.xlane.xlu0 %1085  ;;  %v4984_v51 = vpop.xlane.xlu1 %1023  ;;  %v1526_v55 = vsel %vm1510_vm7, %v1487_v48, -inf }
 0x23f   : > { %6052 = vst [vmem:[#allocation11_spill] sm:$0xff] %v4981_v42  ;;  %1527 = vmax.xlane.f32.xlu1 %v1526_v55  ;;  %v1254_v6 = vrot.slane %v4984_v51, %v4837_v54  ;;  %v1378_v14 = vrot.slane %v4981_v42, %v4837_v54 }
 0x241   : > { %v1460_v11 = vsel %vm1439_vm0, %v1254_v6, %v1250_v4 }
 0x242   : > { %v4987_v61 = vpop.xlane.xlu0 %1025  ;;  %v4989_v62 = vpop.xlane.xlu1 %1087 }
 0x243   : > { %v1258_v9 = vrot.slane %v4987_v61, %v4837_v54  ;;  %v1382_v15 = vrot.slane %v4989_v62, %v4837_v54 }
 0x245   : > { %v1461_v20 = vsel %vm1441_vm1, %v1258_v9, %v1460_v11  ;;  %v1488_v23 = vsel %vm1439_vm0, %v1382_v15, %v1378_v14 }
 0x246   : > { %v4991_v0 = vpop.xlane.xlu0 %1089  ;;  %v4993_v2 = vpop.xlane.xlu1 %1027 }
 0x247   : > { %6053 = vst [vmem:[#allocation12_spill] sm:$0xff] %v4991_v0  ;;  %v1262_v19 = vrot.slane %v4993_v2, %v4837_v54  ;;  %v1386_v21 = vrot.slane %v4991_v0, %v4837_v54 }
 0x249   : > { %v1462_v31 = vsel %vm1443_vm2, %v1262_v19, %v1461_v20  ;;  %v1489_v39 = vsel %vm1441_vm1, %v1386_v21, %v1488_v23 }
 0x24a   : > { %v4999_v7 = vpop.xlane.xlu0 %1029  ;;  %v5001_v8 = vpop.xlane.xlu1 %1091 }
 0x24b   : > { %v1266_v27 = vrot.slane %v4999_v7, %v4837_v54  ;;  %v1390_v33 = vrot.slane %v5001_v8, %v4837_v54 }
 0x24d   : > { %v1463_v4 = vsel %vm1445_vm3, %v1266_v27, %v1462_v31  ;;  %v1490_v11 = vsel %vm1443_vm2, %v1390_v33, %v1489_v39 }
 0x24e   : > { %v5010_v17 = vpop.xlane.xlu0 %1093  ;;  %v5012_v18 = vpop.xlane.xlu1 %1031 }
 0x24f   : > { %6054 = vst [vmem:[#allocation13_spill] sm:$0xff] %v5010_v17  ;;  %v1270_v38 = vrot.slane %v5012_v18, %v4837_v54  ;;  %v1394_v6 = vrot.slane %v5010_v17, %v4837_v54 }
 0x251   : > { %v1464_v19 = vsel %vm1447_vm4, %v1270_v38, %v1463_v4  ;;  %v1491_v31 = vsel %vm1445_vm3, %v1394_v6, %v1490_v11 }
 0x252   : > { %v5020_v26 = vpop.xlane.xlu0 %1033  ;;  %v5024_v29 = vpop.xlane.xlu1 %1095 }
 0x253   : > { %v1274_v48 = vrot.slane %v5020_v26, %v4837_v54  ;;  %v1398_v14 = vrot.slane %v5024_v29, %v4837_v54 }
 0x255   : > { %v1465_v21 = vsel %vm1449_vm5, %v1274_v48, %v1464_v19  ;;  %v1492_v38 = vsel %vm1447_vm4, %v1398_v14, %v1491_v31 }
 0x256   : > { %v5034_v55 = vpop.xlane.xlu0 %1097  ;;  %v5039_v9 = vpop.xlane.xlu1 %1035 }
 0x257   : > { %6055 = vst [vmem:[#allocation14_spill] sm:$0xff] %v5034_v55  ;;  %v1278_v15 = vrot.slane %v5039_v9, %v4837_v54  ;;  %v1402_v20 = vrot.slane %v5034_v55, %v4837_v54 }
 0x259   : > { %v1466_v27 = vsel %vm1451_vm6, %v1278_v15, %v1465_v21  ;;  %v1493_v4 = vsel %vm1449_vm5, %v1402_v20, %v1492_v38 }
 0x25a   : > { %v5050_v23 = vpop.xlane.xlu0 %1037  ;;  %v5054_v33 = vpop.xlane.xlu1 %1099  ;;  %v1517_v39 = vsel %vm1510_vm7, %v1466_v27, -inf }
 0x25b   : > { %6056 = vst [vmem:[#allocation15_spill] sm:$0xff] %v5050_v23  ;;  %6057 = vst [vmem:[#allocation16_spill] sm:$0xff] %v5054_v33  ;;  %v1406_v17 = vrot.slane %v5054_v33, %v4837_v54  ;;  %1518 = vmax.xlane.f32.xlu0 %v1517_v39  ;;  %v1282_v14 = vrot.slane %v5050_v23, %v4837_v54 }
 0x25d   : > { %v1494_v48 = vsel %vm1451_vm6, %v1406_v17, %v1493_v4 }
 0x25e   : > { %v5061_v55 = vpop.xlane.xlu0 %1101  ;;  %v5064_v19 = vpop.xlane.xlu1 %1039  ;;  %v1529_v6 = vsel %vm1510_vm7, %v1494_v48, -inf }
 0x25f   : > { %6058 = vst [vmem:[#allocation17_spill] sm:$0xff] %v5061_v55  ;;  %6059 = vst [vmem:[#allocation18_spill] sm:$0xff] %v5064_v19  ;;  %1530 = vmax.xlane.f32.xlu0 %v1529_v6  ;;  %v1286_v20 = vrot.slane %v5064_v19, %v4837_v54  ;;  %v1410_v4 = vrot.slane %v5061_v55, %v4837_v54 }
 0x261   : > { %v1467_v38 = vsel %vm1439_vm0, %v1286_v20, %v1282_v14 }
 0x262   : > { %v5067_v11 = vpop.xlane.xlu0 %1041  ;;  %v5069_v15 = vpop.xlane.xlu1 %1103 }
 0x263   : > { %6060 = vst [vmem:[#allocation19_spill] sm:$0xff] %v5067_v11  ;;  %6061 = vst [vmem:[#allocation20_spill] sm:$0xff] %v5069_v15  ;;  %v1290_v39 = vrot.slane %v5067_v11, %v4837_v54  ;;  %v1414_v48 = vrot.slane %v5069_v15, %v4837_v54 }
 0x265   : > { %v1468_v0 = vsel %vm1441_vm1, %v1290_v39, %v1467_v38  ;;  %v1495_v14 = vsel %vm1439_vm0, %v1414_v48, %v1410_v4 }
 0x266   : > { %v5071_v21 = vpop.xlane.xlu0 %1105  ;;  %v5073_v27 = vpop.xlane.xlu1 %1043 }
 0x267   : > { %6062 = vst [vmem:[#allocation21_spill] sm:$0xff] %v5071_v21  ;;  %6063 = vst [vmem:[#allocation22_spill] sm:$0xff] %v5073_v27  ;;  %v1294_v19 = vrot.slane %v5073_v27, %v4837_v54  ;;  %v1418_v11 = vrot.slane %v5071_v21, %v4837_v54 }
 0x269   : > { %v1469_v42 = vsel %vm1443_vm2, %v1294_v19, %v1468_v0  ;;  %v1496_v38 = vsel %vm1441_vm1, %v1418_v11, %v1495_v14 }
 0x26a   : > { %v5079_v17 = vpop.xlane.xlu0 %1045  ;;  %v5081_v31 = vpop.xlane.xlu1 %1107 }
 0x26b   : > { %6064 = vst [vmem:[#allocation23_spill] sm:$0xff] %v5079_v17  ;;  %6065 = vst [vmem:[#allocation24_spill] sm:$0xff] %v5081_v31  ;;  %v1298_v55 = vrot.slane %v5079_v17, %v4837_v54  ;;  %v1422_v33 = vrot.slane %v5081_v31, %v4837_v54 }
 0x26d   : > { %v1470_v21 = vsel %vm1445_vm3, %v1298_v55, %v1469_v42  ;;  %v1497_v0 = vsel %vm1443_vm2, %v1422_v33, %v1496_v38 }
 0x26e   : > { %v5090_v6 = vpop.xlane.xlu0 %1109  ;;  %v5092_v23 = vpop.xlane.xlu1 %1047 }
 0x26f   : > { %6066 = vst [vmem:[#allocation25_spill] sm:$0xff] %v5090_v6  ;;  %v1302_v39 = vrot.slane %v5092_v23, %v4837_v54  ;;  %v1426_v17 = vrot.slane %v5090_v6, %v4837_v54 }
 0x271   : > { %v1471_v14 = vsel %vm1447_vm4, %v1302_v39, %v1470_v21  ;;  %v1498_v6 = vsel %vm1445_vm3, %v1426_v17, %v1497_v0  ;;  %v5145_v17 = vsub.s32 1, %v4830_v52  ;;  %v5148_v0 = vsub.s32 2, %v4830_v52 }
 0x272   : > { %v5100_v20 = vpop.xlane.xlu0 %1049  ;;  %v5104_v15 = vpop.xlane.xlu1 %1111 }
 0x273   : > { %6067 = vst [vmem:[#allocation26_spill] sm:$0xff] %v5100_v20  ;;  %6068 = vst [vmem:[#allocation27_spill] sm:$0xff] %v5104_v15  ;;  %v1306_v4 = vrot.slane %v5100_v20, %v4837_v54  ;;  %v1430_v19 = vrot.slane %v5104_v15, %v4837_v54 }
 0x275   : > { %v1472_v42 = vsel %vm1449_vm5, %v1306_v4, %v1471_v14  ;;  %v1499_v15 = vsel %vm1447_vm4, %v1430_v19, %v1498_v6  ;;  %v5151_v14 = vsub.s32 3, %v4830_v52 }
 0x276   : > { %v5114_v48 = vpop.xlane.xlu0 %1113  ;;  %v5119_v27 = vpop.xlane.xlu1 %1051 }
 0x277   : > { %6069 = vst [vmem:[#allocation28_spill] sm:$0xff] %v5114_v48  ;;  %6070 = vst [vmem:[#allocation29_spill] sm:$0xff] %v5119_v27  ;;  %v1310_v11 = vrot.slane %v5119_v27, %v4837_v54  ;;  %v1434_v20 = vrot.slane %v5114_v48, %v4837_v54 }
 0x279   : > { %v1473_v55 = vsel %vm1451_vm6, %v1310_v11, %v1472_v42  ;;  %v1500_v21 = vsel %vm1449_vm5, %v1434_v20, %v1499_v15  ;;  %v5142_v11 = vsub.s32 0, %v4830_v52 }
 0x27a   : > { %v5132_v31 = vpop.xlane.xlu1 %1115  ;;  %v1520_v33 = vsel %vm1510_vm7, %v1473_v55, -inf }
 0x27b   : > { %6071 = vst [vmem:[#allocation30_spill] sm:$0xff] %v5132_v31  ;;  %v1438_v38 = vrot.slane %v5132_v31, %v4837_v54  ;;  %1521 = vmax.xlane.f32.xlu1 %v1520_v33 }
 0x27d   : > { %v1501_v39 = vsel %vm1451_vm6, %v1438_v38, %v1500_v21 }
 0x27e   : > { %v1532_v4 = vsel %vm1510_vm7, %v1501_v39, -inf  ;;  %v5163_v39 = vsub.s32 4, %v4830_v52 }
 0x27f   : > { %1533 = vmax.xlane.f32.xlu1 %v1532_v4 }
 0x2a4   : > { %v1513_v6 = vpop.xlane.xlu0 %1512 }
 0x2a5   : > { %v1546_v15 = vrot.slane %v1513_v6, %v5142_v11  ;;  %v1550_v20 = vrot.slane %v1513_v6, %v5145_v17  ;;  %v1554_v19 = vrot.slane %v1513_v6, %v5148_v0  ;;  %v1558_v42 = vrot.slane %v1513_v6, %v5151_v14 }
 0x2a7   : > { %v1863_v55 = vsub.f32 %v4816_v43, %v1546_v15  ;;  %v1864_v33 = vsub.f32 %v4822_v46, %v1550_v20  ;;  %v1865_v38 = vsub.f32 %v4824_v47, %v1554_v19  ;;  %v1866_v31 = vsub.f32 %v4828_v50, %v1558_v42 }
 0x2a8   : > { %v5160_v21 = vpop.xlane.xlu0 %1524  ;;  %v5171_v46 = vsub.s32 5, %v4830_v52  ;;  %v1562_v47 = vrot.slane %v1513_v6, %v5163_v39 }
 0x2a9   : > { %v1927_v4 = vmul.f32 1.442695, %v1863_v55  ;;  %v1929_v54 = vmul.f32 1.442695, %v1864_v33  ;;  %v1678_v48 = vrot.slane %v5160_v21, %v5145_v17  ;;  %v1931_v27 = vmul.f32 1.442695, %v1865_v38 }
 0x2aa   : > { %v1686_v43 = vrot.slane %v5160_v21, %v5151_v14  ;;  %v1933_v20 = vmul.f32 1.442695, %v1866_v31  ;;  %v1694_v19 = vrot.slane %v5160_v21, %v5171_v46  ;;  %v1566_v55 = vrot.slane %v1513_v6, %v5171_v46 }
 0x2ab   : > { %4014 = vpow2.f32 %v1927_v4  ;;  %v1896_v15 = vsub.f32 %v4820_v45, %v1678_v48  ;;  %v1867_v33 = vsub.f32 %v4832_v58, %v1562_v47  ;;  %v5184_v38 = vsub.s32 7, %v4830_v52 }
 0x2ac   : > { %4016 = vpow2.f32 %v1929_v54  ;;  %v1898_v50 = vsub.f32 %v4834_v53, %v1686_v43  ;;  %v5179_v54 = vsub.s32 6, %v4830_v52  ;;  %v1868_v48 = vsub.f32 %v4843_v57, %v1566_v55 }
 0x2ad   : > { %4018 = vpow2.f32 %v1931_v27  ;;  %v1993_v42 = vmul.f32 1.442695, %v1896_v15  ;;  %v1702_v45 = vrot.slane %v5160_v21, %v5184_v38  ;;  %v1900_v27 = vsub.f32 %v4856_v1, %v1694_v19 }
 0x2ae   : > { %4020 = vpow2.f32 %v1933_v20  ;;  %v1997_v31 = vmul.f32 1.442695, %v1898_v50  ;;  %v1570_v53 = vrot.slane %v1513_v6, %v5179_v54  ;;  %v1935_v4 = vmul.f32 1.442695, %v1867_v33 }
 0x2af   : > { %4022 = vpow2.f32 %v1993_v42  ;;  %v1902_v58 = vsub.f32 %v4894_v25, %v1702_v45  ;;  %v2001_v52 = vmul.f32 1.442695, %v1900_v27  ;;  %v1574_v15 = vrot.slane %v1513_v6, %v5184_v38 }
 0x2b0   : > { %4024 = vpow2.f32 %v1997_v31  ;;  %v1869_v20 = vsub.f32 %v4852_v63, %v1570_v53  ;;  %v1937_v1 = vmul.f32 1.442695, %v1868_v48  ;;  %v1674_v42 = vrot.slane %v5160_v21, %v5142_v11 }
 0x2b1   : > { %4026 = vpow2.f32 %v1935_v4  ;;  %v2005_v57 = vmul.f32 1.442695, %v1902_v58  ;;  %v1870_v25 = vsub.f32 %v4877_v13, %v1574_v15  ;;  %v1682_v6 = vrot.slane %v5160_v21, %v5148_v0 }
 0x2b2   : > { %4028 = vpow2.f32 %v2001_v52  ;;  %v1939_v50 = vmul.f32 1.442695, %v1869_v20  ;;  %v1895_v45 = vsub.f32 %v4818_v44, %v1674_v42  ;;  %v1690_v13 = vrot.slane %v5160_v21, %v5163_v39 }
 0x2b3   : > { %4030 = vpow2.f32 %v1937_v1  ;;  %v1941_v33 = vmul.f32 1.442695, %v1870_v25  ;;  %v1897_v27 = vsub.f32 %v4826_v49, %v1682_v6  ;;  %v1698_v49 = vrot.slane %v5160_v21, %v5179_v54 }
 0x2b4   : > { %4032 = vpow2.f32 %v2005_v57  ;;  %v1991_v48 = vmul.f32 1.442695, %v1895_v45  ;;  %v1899_v57 = vsub.f32 %v4841_v56, %v1690_v13 }
 0x2b5   : > { %4034 = vpow2.f32 %v1939_v50  ;;  %v1995_v25 = vmul.f32 1.442695, %v1897_v27  ;;  %v1901_v56 = vsub.f32 %v4872_v10, %v1698_v49 }
 0x2b6   : > { %4036 = vpow2.f32 %v1941_v33  ;;  %v1999_v33 = vmul.f32 1.442695, %v1899_v57 }
 0x2b7   : > { %4038 = vpow2.f32 %v1991_v48 }
 0x2b8   : > { %v5191_v43 = vpop.eup %4014 }
 0x2b9   : > { %v5194_v47 = vpop.eup %4016  ;;  %2120 = vperm.xlu0 %3884, %v5191_v43  }
 0x2ba   : > { %2123 = vperm.xlu1 %3885, %v5194_v47   ;;  %v5200_v19 = vpop.eup %4018 }
 0x2bb   : > { %v5206_v63 = vpop.eup %4020 }
 0x2bc   : > { %v5210_v55 = vpop.eup %4022 }
 0x2bd   : > { %2219 = vperm.xlu0 %3884, %v5210_v55   ;;  %v5220_v53 = vpop.eup %4024 }
 0x2be   : > { %2126 = vperm.xlu1 %3885, %v5200_v19   ;;  %v5226_v58 = vpop.eup %4026 }
 0x2bf   : > { %v5236_v1 = vpop.eup %4028 }
 0x2c0   : > { %v5239_v42 = vpop.eup %4030 }
 0x2c1   : > { %2225 = vperm.xlu0 %3884, %v5220_v53   ;;  %v5246_v6 = vpop.eup %4032 }
 0x2c2   : > { %2129 = vperm.xlu1 %3885, %v5206_v63   ;;  %v5253_v27 = vpop.eup %4034 }
 0x2c3   : > { %v5263_v49 = vpop.eup %4036 }
 0x2c4   : > { %v5218_v31 = vpop.xlane.xlu1 %1515 }
 0x2c5   : > { %v1582_v4 = vrot.slane %v5218_v31, %v5145_v17  ;;  %v1590_v44 = vrot.slane %v5218_v31, %v5151_v14  ;;  %v1598_v15 = vrot.slane %v5218_v31, %v5171_v46  ;;  %2231 = vperm.xlu0 %3884, %v5236_v1   ;;  %v1578_v45 = vrot.slane %v5218_v31, %v5142_v11 }
 0x2c6   : > { %2132 = vperm.xlu1 %3885, %v5226_v58   ;;  %v1594_v57 = vrot.slane %v5218_v31, %v5163_v39 }
 0x2c7   : > { %v1872_v52 = vsub.f32 %v4904_v32, %v1582_v4  ;;  %v1874_v20 = vsub.f32 %v4913_v37, %v1590_v44  ;;  %v1606_v32 = vrot.slane %v5218_v31, %v5184_v38  ;;  %v1876_v21 = vsub.f32 %v4932_v60, %v1598_v15 }
 0x2c8   : > { %v5251_v13 = vpop.xlane.xlu1 %1527  ;;  %v2003_v4 = vmul.f32 1.442695, %v1901_v56  ;;  %v1586_v44 = vrot.slane %v5218_v31, %v5148_v0 }
 0x2c9   : > { %v1945_v50 = vmul.f32 1.442695, %v1872_v52  ;;  %v1949_v37 = vmul.f32 1.442695, %v1874_v20  ;;  %2237 = vperm.xlu0 %3884, %v5246_v6   ;;  %v1878_v60 = vsub.f32 %v4959_v16, %v1606_v32  ;;  %v1953_v48 = vmul.f32 1.442695, %v1876_v21  ;;  %v5272_v32 = vpop.eup %4038 }
 0x2ca   : > { %2135 = vperm.xlu1 %3885, %v5239_v42   ;;  %v1710_v10 = vrot.slane %v5251_v13, %v5145_v17  ;;  %v1871_v52 = vsub.f32 %v4890_v22, %v1578_v45  ;;  %v1718_v16 = vrot.slane %v5251_v13, %v5151_v14  ;;  %v1726_v22 = vrot.slane %v5251_v13, %v5171_v46 }
 0x2cb   : > { %4040 = vpow2.f32 %v1945_v50  ;;  %v1957_v15 = vmul.f32 1.442695, %v1878_v60  ;;  %v1734_v60 = vrot.slane %v5251_v13, %v5184_v38 }
 0x2cc   : > { %4042 = vpow2.f32 %v1995_v25  ;;  %v1904_v20 = vsub.f32 %v4909_v35, %v1710_v10  ;;  %v1873_v25 = vsub.f32 %v4907_v34, %v1586_v44  ;;  %v1943_v50 = vmul.f32 1.442695, %v1871_v52 }
 0x2cd   : > { %4044 = vpow2.f32 %v1949_v37  ;;  %v1906_v21 = vsub.f32 %v4921_v41, %v1718_v16  ;;  %v1602_v35 = vrot.slane %v5218_v31, %v5179_v54  ;;  %v1908_v41 = vsub.f32 %v4944_v5, %v1726_v22 }
 0x2ce   : > { %2138 = vperm.xlu1 %3885, %v5253_v27   ;;  %4046 = vpow2.f32 %v1999_v33  ;;  %v2009_v37 = vmul.f32 1.442695, %v1904_v20  ;;  %v1875_v33 = vsub.f32 %v4919_v40, %v1594_v57  ;;  %v1947_v34 = vmul.f32 1.442695, %v1873_v25 }
 0x2cf   : > { %4048 = vpow2.f32 %v1953_v48  ;;  %v2013_v48 = vmul.f32 1.442695, %v1906_v21  ;;  %v1877_v31 = vsub.f32 %v4940_v3, %v1602_v35  ;;  %v1714_v5 = vrot.slane %v5251_v13, %v5148_v0 }
 0x2d0   : > { %4050 = vpow2.f32 %v2003_v4  ;;  %v1951_v40 = vmul.f32 1.442695, %v1875_v33  ;;  %v1706_v4 = vrot.slane %v5251_v13, %v5142_v11  ;;  %v1910_v52 = vsub.f32 %v4974_v28, %v1734_v60 }
 0x2d1   : > { %4052 = vpow2.f32 %v1957_v15  ;;  %v2017_v15 = vmul.f32 1.442695, %v1908_v41  ;;  %v1955_v3 = vmul.f32 1.442695, %v1877_v31  ;;  %v1722_v25 = vrot.slane %v5251_v13, %v5163_v39 }
 0x2d2   : > { %2141 = vperm.xlu1 %3885, %v5263_v49   ;;  %4054 = vpow2.f32 %v1943_v50  ;;  %v1903_v20 = vsub.f32 %v4901_v30, %v1706_v4  ;;  %v1905_v50 = vsub.f32 %v4911_v36, %v1714_v5  ;;  %v2021_v28 = vmul.f32 1.442695, %v1910_v52 }
 0x2d3   : > { %4056 = vpow2.f32 %v2009_v37  ;;  %v1907_v31 = vsub.f32 %v4930_v59, %v1722_v25 }
 0x2d4   : > { %4058 = vpow2.f32 %v1947_v34  ;;  %v2007_v37 = vmul.f32 1.442695, %v1903_v20  ;;  %v1730_v34 = vrot.slane %v5251_v13, %v5179_v54 }
 0x2d5   : > { %4060 = vpow2.f32 %v2013_v48 }
 0x2d6   : > { %2216 = vperm.xlu1 %3885, %v5272_v32   ;;  %4062 = vpow2.f32 %v1951_v40  ;;  %v2011_v40 = vmul.f32 1.442695, %v1905_v50  ;;  %v1909_v59 = vsub.f32 %v4954_v12, %v1730_v34 }
 0x2d7   : > { %4064 = vpow2.f32 %v2017_v15  ;;  %v2015_v15 = vmul.f32 1.442695, %v1907_v31 }
 0x2d8   : > { %v5278_v56 = vpop.eup %4040  ;;  %4066 = vpow2.f32 %v1955_v3 }
 0x2d9   : > { %v5283_v45 = vpop.eup %4042  ;;  %2147 = vperm.xlu0 %3884, %v5278_v56   ;;  %4068 = vpow2.f32 %v2021_v28 }
 0x2da   : > { %2222 = vperm.xlu1 %3885, %v5283_v45   ;;  %v5290_v10 = vpop.eup %4044  ;;  %4070 = vpow2.f32 %v2007_v37  ;;  %v2019_v37 = vmul.f32 1.442695, %v1909_v59 }
 0x2db   : > { %v5295_v44 = vpop.eup %4046 }
 0x2dc   : > { %v5302_v16 = vpop.eup %4048 }
 0x2dd   : > { %2153 = vperm.xlu0 %3884, %v5290_v10   ;;  %v5305_v57 = vpop.eup %4050 }
 0x2de   : > { %2228 = vperm.xlu1 %3885, %v5295_v44   ;;  %v5314_v21 = vpop.eup %4052 }
 0x2df   : > { %v5320_v33 = vpop.eup %4054 }
 0x2e0   : > { %v5330_v48 = vpop.eup %4056 }
 0x2e1   : > { %2159 = vperm.xlu0 %3884, %v5302_v16   ;;  %v5333_v5 = vpop.eup %4058 }
 0x2e2   : > { %2234 = vperm.xlu1 %3885, %v5305_v57   ;;  %v5340_v52 = vpop.eup %4060 }
 0x2e3   : > { %v5347_v25 = vpop.eup %4062 }
 0x2e4   : > { %v5312_v22 = vpop.xlane.xlu0 %1518  ;;  %v5354_v28 = vpop.eup %4064 }
 0x2e5   : > { %v1614_v30 = vrot.slane %v5312_v22, %v5145_v17  ;;  %v1622_v35 = vrot.slane %v5312_v22, %v5151_v14  ;;  %2165 = vperm.xlu0 %3884, %v5314_v21   ;;  %v1630_v60 = vrot.slane %v5312_v22, %v5171_v46  ;;  %v1610_v3 = vrot.slane %v5312_v22, %v5142_v11 }
 0x2e6   : > { %2144 = vperm.xlu1 %3885, %v5320_v33   ;;  %v1626_v31 = vrot.slane %v5312_v22, %v5163_v39  ;;  %v1634_v59 = vrot.slane %v5312_v22, %v5179_v54 }
 0x2e7   : > { %v1880_v36 = vsub.f32 %v4984_v51, %v1614_v30  ;;  %v1882_v41 = vsub.f32 %v4993_v2, %v1622_v35  ;;  %v1638_v51 = vrot.slane %v5312_v22, %v5184_v38  ;;  %v1884_v13 = vsub.f32 %v5012_v18, %v1630_v60 }
 0x2e8   : > { %v5345_v20 = vpop.xlane.xlu0 %1530  ;;  %v1618_v30 = vrot.slane %v5312_v22, %v5148_v0  ;;  %v1879_v35 = vsub.f32 %v4970_v24, %v1610_v3  ;;  %v1885_v22 = vsub.f32 %v5020_v26, %v1634_v59 }
 0x2e9   : > { %v1961_v4 = vmul.f32 1.442695, %v1880_v36  ;;  %2243 = vperm.xlu0 %3884, %v5330_v48   ;;  %v1965_v2 = vmul.f32 1.442695, %v1882_v41  ;;  %v1886_v18 = vsub.f32 %v5039_v9, %v1638_v51  ;;  %v1969_v50 = vmul.f32 1.442695, %v1884_v13  ;;  %v5359_v36 = vpop.eup %4066 }
 0x2ea   : > { %2150 = vperm.xlu1 %3885, %v5333_v5   ;;  %v1742_v12 = vrot.slane %v5345_v20, %v5145_v17  ;;  %v1750_v34 = vrot.slane %v5345_v20, %v5151_v14  ;;  %v5366_v41 = vpop.eup %4068  ;;  %v1881_v24 = vsub.f32 %v4987_v61, %v1618_v30  ;;  %v1758_v51 = vrot.slane %v5345_v20, %v5171_v46 }
 0x2eb   : > { %4072 = vpow2.f32 %v1961_v4  ;;  %v1973_v9 = vmul.f32 1.442695, %v1886_v18  ;;  %6072 = vst [vmem:[#allocation31_spill] sm:$0xff] %v5366_v41  ;;  %v5371_v4 = vpop.eup %4070  ;;  %v1883_v61 = vsub.f32 %v4999_v7, %v1626_v31  ;;  %v1766_v18 = vrot.slane %v5345_v20, %v5184_v38  ;;  %v6078_v31 = vld [vmem:[#allocation11_spill] sm:$0xff] }
 0x2ec   : > { %4074 = vpow2.f32 %v2011_v40  ;;  %v1912_v60 = vsub.f32 %v4989_v62, %v1742_v12  ;;  %v1959_v40 = vmul.f32 1.442695, %v1879_v35  ;;  %v1914_v62 = vsub.f32 %v5001_v8, %v1750_v34  ;;  %v6076_v35 = vld [vmem:[#allocation16_spill] sm:$0xff] }
 0x2ed   : > { %2249 = vperm.xlu0 %3884, %v5340_v52   ;;  %4076 = vpow2.f32 %v1965_v2  ;;  %v1916_v8 = vsub.f32 %v5024_v29, %v1758_v51  ;;  %v1967_v7 = vmul.f32 1.442695, %v1883_v61  ;;  %v1746_v29 = vrot.slane %v5345_v20, %v5148_v0 }
 0x2ee   : > { %2156 = vperm.xlu1 %3885, %v5347_v25   ;;  %4078 = vpow2.f32 %v2015_v15  ;;  %v2025_v13 = vmul.f32 1.442695, %v1912_v60  ;;  %v1963_v15 = vmul.f32 1.442695, %v1881_v24  ;;  %v1971_v26 = vmul.f32 1.442695, %v1885_v22 }
 0x2ef   : > { %4080 = vpow2.f32 %v1969_v50  ;;  %v2029_v50 = vmul.f32 1.442695, %v1914_v62  ;;  %v2033_v34 = vmul.f32 1.442695, %v1916_v8  ;;  %v1754_v51 = vrot.slane %v5345_v20, %v5163_v39  ;;  %v6080_v62 = vld [vmem:[#allocation12_spill] sm:$0xff] }
 0x2f0   : > { %4082 = vpow2.f32 %v2019_v37  ;;  %v1738_v37 = vrot.slane %v5345_v20, %v5142_v11 }
 0x2f1   : > { %2255 = vperm.xlu0 %3884, %v5354_v28   ;;  %4084 = vpow2.f32 %v1973_v9  ;;  %v1918_v9 = vsub.f32 %v6076_v35, %v1766_v18 }
 0x2f2   : > { %2162 = vperm.xlu1 %3885, %v5359_v36   ;;  %4086 = vpow2.f32 %v1959_v40  ;;  %v1911_v24 = vsub.f32 %v6078_v31, %v1738_v37  ;;  %v6086_v31 = vld [vmem:[#allocation13_spill] sm:$0xff] }
 0x2f3   : > { %4088 = vpow2.f32 %v2025_v13  ;;  %v1913_v13 = vsub.f32 %v6080_v62, %v1746_v29  ;;  %v2037_v59 = vmul.f32 1.442695, %v1918_v9  ;;  %v1762_v29 = vrot.slane %v5345_v20, %v5179_v54  ;;  %v6084_v9 = vld [vmem:[#allocation22_spill] sm:$0xff] }
 0x2f4   : > { %4090 = vpow2.f32 %v1963_v15  ;;  %v2023_v18 = vmul.f32 1.442695, %v1911_v24  ;;  %v1915_v24 = vsub.f32 %v6086_v31, %v1754_v51 }
 0x2f5   : > { %2261 = vperm.xlu0 %3884, %v5366_v41   ;;  %4092 = vpow2.f32 %v2029_v50  ;;  %v2027_v62 = vmul.f32 1.442695, %v1913_v13 }
 0x2f6   : > { %2240 = vperm.xlu1 %3885, %v5371_v4   ;;  %4094 = vpow2.f32 %v1967_v7  ;;  %v6083_v7 = vld [vmem:[#allocation18_spill] sm:$0xff]  ;;  %v2031_v13 = vmul.f32 1.442695, %v1915_v24 }
 0x2f7   : > { %4096 = vpow2.f32 %v2033_v34 }
 0x2f8   : > { %v5378_v2 = vpop.eup %4072  ;;  %4098 = vpow2.f32 %v1971_v26 }
 0x2f9   : > { %6073 = vst [vmem:[#allocation32_spill] sm:$0xff] %v5378_v2  ;;  %v5383_v3 = vpop.eup %4074  ;;  %2171 = vperm.xlu0 %3884, %v5378_v2   ;;  %4100 = vpow2.f32 %v2037_v59 }
 0x2fa   : > { %2246 = vperm.xlu1 %3885, %v5383_v3   ;;  %v5390_v12 = vpop.eup %4076  ;;  %4102 = vpow2.f32 %v2023_v18 }
 0x2fb   : > { %6074 = vst [vmem:[#allocation33_spill] sm:$0xff] %v5390_v12  ;;  %v5395_v30 = vpop.eup %4078 }
 0x2fc   : > { %6075 = vst [vmem:[#allocation34_spill] sm:$0xff] %v5395_v30  ;;  %v5402_v60 = vpop.eup %4080 }
 0x2fd   : > { %2177 = vperm.xlu0 %3884, %v5390_v12   ;;  %6077 = vst [vmem:[#allocation16_spill] sm:$0xff] %v5402_v60  ;;  %v5405_v40 = vpop.eup %4082 }
 0x2fe   : > { %2252 = vperm.xlu1 %3885, %v5395_v30   ;;  %6079 = vst [vmem:[#allocation11_spill] sm:$0xff] %v5405_v40  ;;  %v5414_v15 = vpop.eup %4084 }
 0x2ff   : > { %6081 = vst [vmem:[#allocation12_spill] sm:$0xff] %v5414_v15  ;;  %v5420_v22 = vpop.eup %4086 }
 0x300   : > { %6082 = vst [vmem:[#allocation35_spill] sm:$0xff] %v5420_v22  ;;  %v5430_v26 = vpop.eup %4088 }
 0x301   : > { %2183 = vperm.xlu0 %3884, %v5402_v60   ;;  %6085 = vst [vmem:[#allocation18_spill] sm:$0xff] %v5430_v26  ;;  %v5433_v60 = vpop.eup %4090 }
 0x302   : > { %2258 = vperm.xlu1 %3885, %v5405_v40   ;;  %6087 = vst [vmem:[#allocation22_spill] sm:$0xff] %v5433_v60 }
 0x304   : > { %v5412_v61 = vpop.xlane.xlu1 %1521 }
 0x305   : > { %v1646_v8 = vrot.slane %v5412_v61, %v5145_v17  ;;  %v1654_v50 = vrot.slane %v5412_v61, %v5151_v14  ;;  %2189 = vperm.xlu0 %3884, %v5414_v15   ;;  %v1662_v35 = vrot.slane %v5412_v61, %v5171_v46  ;;  %v1670_v20 = vrot.slane %v5412_v61, %v5184_v38 }
 0x306   : > { %2168 = vperm.xlu1 %3885, %v5420_v22   ;;  %v1642_v18 = vrot.slane %v5412_v61, %v5142_v11  ;;  %v1650_v24 = vrot.slane %v5412_v61, %v5148_v0 }
 0x307   : > { %v1888_v37 = vsub.f32 %v6083_v7, %v1646_v8  ;;  %v1890_v34 = vsub.f32 %v6084_v9, %v1654_v50  ;;  %v1892_v59 = vsub.f32 %v5092_v23, %v1662_v35  ;;  %v5440_v50 = vpop.eup %4092  ;;  %v6089_v7 = vld [vmem:[#allocation14_spill] sm:$0xff]  ;;  %v6091_v23 = vld [vmem:[#allocation29_spill] sm:$0xff] }
 0x308   : > { %6088 = vst [vmem:[#allocation13_spill] sm:$0xff] %v5440_v50  ;;  %v1917_v51 = vsub.f32 %v6089_v7, %v1762_v29  ;;  %v5447_v9 = vpop.eup %4094 }
 0x309   : > { %v1977_v15 = vmul.f32 1.442695, %v1888_v37  ;;  %2267 = vperm.xlu0 %3884, %v5430_v26   ;;  %v1981_v8 = vmul.f32 1.442695, %v1890_v34  ;;  %v5445_v37 = vpop.xlane.xlu1 %1533  ;;  %6090 = vst [vmem:[#allocation14_spill] sm:$0xff] %v5447_v9  ;;  %v5454_v34 = vpop.eup %4096 }
 0x30a   : > { %2174 = vperm.xlu1 %3885, %v5433_v60   ;;  %v1985_v35 = vmul.f32 1.442695, %v1892_v59  ;;  %v1774_v29 = vrot.slane %v5445_v37, %v5145_v17  ;;  %6092 = vst [vmem:[#allocation29_spill] sm:$0xff] %v5454_v34  ;;  %v2035_v31 = vmul.f32 1.442695, %v1917_v51  ;;  %v5459_v26 = vpop.eup %4098  ;;  %v1782_v59 = vrot.slane %v5445_v37, %v5151_v14 }
 0x30b   : > { %4104 = vpow2.f32 %v1977_v15  ;;  %v1894_v15 = vsub.f32 %v6091_v23, %v1670_v20  ;;  %v1658_v51 = vrot.slane %v5412_v61, %v5163_v39 }
 0x30c   : > { %4106 = vpow2.f32 %v2027_v62  ;;  %v6093_v62 = vld [vmem:[#allocation15_spill] sm:$0xff] }
 0x30d   : > { %2273 = vperm.xlu0 %3884, %v5440_v50   ;;  %4108 = vpow2.f32 %v1981_v8  ;;  %v1887_v7 = vsub.f32 %v6093_v62, %v1642_v18  ;;  %6094 = vst [vmem:[#allocation15_spill] sm:$0xff] %v5459_v26  ;;  %v1989_v20 = vmul.f32 1.442695, %v1894_v15  ;;  %v6095_v8 = vld [vmem:[#allocation20_spill] sm:$0xff]  ;;  %v6097_v18 = vld [vmem:[#allocation19_spill] sm:$0xff]  ;;  %v1790_v15 = vrot.slane %v5445_v37, %v5171_v46 }
 0x30e   : > { %2180 = vperm.xlu1 %3885, %v5447_v9   ;;  %4110 = vpow2.f32 %v2031_v13  ;;  %v1920_v23 = vsub.f32 %v6095_v8, %v1774_v29  ;;  %v5466_v13 = vpop.eup %4100  ;;  %v1889_v62 = vsub.f32 %v6097_v18, %v1650_v24  ;;  %v6101_v24 = vld [vmem:[#allocation23_spill] sm:$0xff] }
 0x30f   : > { %4112 = vpow2.f32 %v1985_v35  ;;  %6096 = vst [vmem:[#allocation20_spill] sm:$0xff] %v5466_v13  ;;  %v1975_v50 = vmul.f32 1.442695, %v1887_v7  ;;  %v5471_v9 = vpop.eup %4102  ;;  %v6099_v35 = vld [vmem:[#allocation24_spill] sm:$0xff]  ;;  %v1891_v7 = vsub.f32 %v6101_v24, %v1658_v51  ;;  %v1770_v51 = vrot.slane %v5445_v37, %v5142_v11  ;;  %v6107_v24 = vld [vmem:[#allocation30_spill] sm:$0xff] }
 0x310   : > { %4114 = vpow2.f32 %v2035_v31  ;;  %6098 = vst [vmem:[#allocation19_spill] sm:$0xff] %v5471_v9  ;;  %v1922_v29 = vsub.f32 %v6099_v35, %v1782_v59  ;;  %v2041_v8 = vmul.f32 1.442695, %v1920_v23  ;;  %v1979_v18 = vmul.f32 1.442695, %v1889_v62  ;;  %v6103_v59 = vld [vmem:[#allocation27_spill] sm:$0xff] }
 0x311   : > { %2279 = vperm.xlu0 %3884, %v5454_v34   ;;  %4116 = vpow2.f32 %v1989_v20  ;;  %v1666_v34 = vrot.slane %v5412_v61, %v5179_v54  ;;  %v1798_v20 = vrot.slane %v5445_v37, %v5184_v38  ;;  %v1924_v23 = vsub.f32 %v6103_v59, %v1790_v15  ;;  %v6105_v61 = vld [vmem:[#allocation26_spill] sm:$0xff] }
 0x312   : > { %2186 = vperm.xlu1 %3885, %v5459_v26   ;;  %4118 = vpow2.f32 %v1975_v50  ;;  %v2045_v35 = vmul.f32 1.442695, %v1922_v29  ;;  %v1983_v50 = vmul.f32 1.442695, %v1891_v7  ;;  %v6109_v7 = vld [vmem:[#allocation17_spill] sm:$0xff] }
 0x313   : > { %4120 = vpow2.f32 %v2041_v8  ;;  %v2049_v15 = vmul.f32 1.442695, %v1924_v23  ;;  %v1786_v23 = vrot.slane %v5445_v37, %v5163_v39 }
 0x314   : > { %4122 = vpow2.f32 %v1979_v18  ;;  %v1919_v18 = vsub.f32 %v6109_v7, %v1770_v51 }
 0x315   : > { %2285 = vperm.xlu0 %3884, %v5466_v13   ;;  %4124 = vpow2.f32 %v2045_v35 }
 0x316   : > { %2264 = vperm.xlu1 %3885, %v5471_v9   ;;  %v1893_v9 = vsub.f32 %v6105_v61, %v1666_v34  ;;  %4126 = vpow2.f32 %v1983_v50  ;;  %v1778_v34 = vrot.slane %v5445_v37, %v5148_v0  ;;  %v2039_v50 = vmul.f32 1.442695, %v1919_v18  ;;  %v6118_v18 = vld [vmem:[#allocation28_spill] sm:$0xff] }
 0x317   : > { %4128 = vpow2.f32 %v2049_v15  ;;  %v6115_v15 = vld [vmem:[#allocation25_spill] sm:$0xff] }
 0x318   : > { %v5478_v31 = vpop.eup %4104  ;;  %v1987_v8 = vmul.f32 1.442695, %v1893_v9  ;;  %v6112_v9 = vld [vmem:[#allocation21_spill] sm:$0xff] }
 0x319   : > { %6100 = vst [vmem:[#allocation24_spill] sm:$0xff] %v5478_v31  ;;  %v5483_v26 = vpop.eup %4106  ;;  %2195 = vperm.xlu0 %3884, %v5478_v31   ;;  %v1926_v31 = vsub.f32 %v6107_v24, %v1798_v20  ;;  %v1921_v35 = vsub.f32 %v6112_v9, %v1778_v34 }
 0x31a   : > { %6102 = vst [vmem:[#allocation23_spill] sm:$0xff] %v5483_v26  ;;  %2270 = vperm.xlu1 %3885, %v5483_v26   ;;  %v5490_v13 = vpop.eup %4108  ;;  %4130 = vpow2.f32 %v1987_v8  ;;  %v1923_v8 = vsub.f32 %v6115_v15, %v1786_v23 }
 0x31b   : > { %6104 = vst [vmem:[#allocation27_spill] sm:$0xff] %v5490_v13  ;;  %v5495_v62 = vpop.eup %4110  ;;  %v2053_v61 = vmul.f32 1.442695, %v1926_v31  ;;  %v1794_v31 = vrot.slane %v5445_v37, %v5179_v54  ;;  %v2043_v7 = vmul.f32 1.442695, %v1921_v35 }
 0x31c   : > { %6106 = vst [vmem:[#allocation26_spill] sm:$0xff] %v5495_v62  ;;  %v5500_v29 = vpop.eup %4112 }
 0x31d   : > { %2201 = vperm.xlu0 %3884, %v5490_v13   ;;  %6108 = vst [vmem:[#allocation30_spill] sm:$0xff] %v5500_v29  ;;  %v5505_v59 = vpop.eup %4114  ;;  %4132 = vpow2.f32 %v2053_v61  ;;  %v1925_v9 = vsub.f32 %v6118_v18, %v1794_v31  ;;  %v2047_v61 = vmul.f32 1.442695, %v1923_v8 }
 0x31e   : > { %2276 = vperm.xlu1 %3885, %v5495_v62   ;;  %6110 = vst [vmem:[#allocation17_spill] sm:$0xff] %v5505_v59  ;;  %v5509_v20 = vpop.eup %4116  ;;  %4134 = vpow2.f32 %v2039_v50  ;;  %v6127_v62 = vld [vmem:[#allocation10_spill] sm:$0xff] }
 0x31f   : > { %6111 = vst [vmem:[#allocation36_spill] sm:$0xff] %v5509_v20  ;;  %v5514_v24 = vpop.eup %4118  ;;  %4136 = vpow2.f32 %v2043_v7  ;;  %v2051_v23 = vmul.f32 1.442695, %v1925_v9 }
 0x320   : > { %6113 = vst [vmem:[#allocation21_spill] sm:$0xff] %v5514_v24  ;;  %v5518_v51 = vpop.eup %4120  ;;  %4138 = vpow2.f32 %v2047_v61 }
 0x321   : > { %2207 = vperm.xlu0 %3884, %v5500_v29   ;;  %6114 = vst [vmem:[#allocation37_spill] sm:$0xff] %v5518_v51  ;;  %v5523_v29 = vpop.eup %4122  ;;  %4140 = vpow2.f32 %v2051_v23 }
 0x322   : > { %2282 = vperm.xlu1 %3885, %v5505_v59   ;;  %6116 = vst [vmem:[#allocation25_spill] sm:$0xff] %v5523_v29  ;;  %v5527_v34 = vpop.eup %4124 }
 0x323   : > { %6117 = vst [vmem:[#allocation38_spill] sm:$0xff] %v5527_v34 }
 0x325   : > { %2213 = vperm.xlu0 %3884, %v5509_v20  }
 0x326   : > { %2192 = vperm.xlu1 %3885, %v5514_v24   ;;  %v5530_v24 = vpop.eup %4126 }
 0x327   : > { %6119 = vst [vmem:[#allocation28_spill] sm:$0xff] %v5530_v24  ;;  %v5534_v37 = vpop.eup %4128 }
 0x328   : > { %6120 = vst [vmem:[#allocation39_spill] sm:$0xff] %v5534_v37  ;;  %v5536_v35 = vpop.eup %4130 }
 0x329   : > { %2291 = vperm.xlu0 %3884, %v5518_v51   ;;  %6121 = vst [vmem:[#allocation40_spill] sm:$0xff] %v5536_v35 }
 0x32a   : > { %2198 = vperm.xlu1 %3885, %v5523_v29   ;;  %v5540_v50 = vpop.eup %4132 }
 0x32b   : > { %6122 = vst [vmem:[#allocation41_spill] sm:$0xff] %v5540_v50  ;;  %v5542_v15 = vpop.eup %4134 }
 0x32c   : > { %6123 = vst [vmem:[#allocation42_spill] sm:$0xff] %v5542_v15  ;;  %v5546_v18 = vpop.eup %4136 }
 0x32d   : > { %2297 = vperm.xlu0 %3884, %v5527_v34   ;;  %6124 = vst [vmem:[#allocation43_spill] sm:$0xff] %v5546_v18  ;;  %v5549_v61 = vpop.eup %4138 }
 0x32e   : > { %2204 = vperm.xlu1 %3885, %v5530_v24   ;;  %6125 = vst [vmem:[#allocation44_spill] sm:$0xff] %v5549_v61  ;;  %v5552_v23 = vpop.eup %4140 }
 0x32f   : > { %6126 = vst [vmem:[#allocation45_spill] sm:$0xff] %v5552_v23 }
 0x331   : > { %2303 = vperm.xlu0 %3884, %v5534_v37  }
 0x332   : > { %2210 = vperm.xlu1 %3885, %v5536_v35  }
 0x334   : > { %v2121_v8 = vpop.permute.xlu0 %2120 }
 0x335   : > { %v2124_v31 = vpop.permute.xlu1 %2123  ;;  %2309 = vperm.xlu0 %3884, %v5540_v50  }
 0x336   : > { %2288 = vperm.xlu1 %3885, %v5542_v15   ;;  %v2318_v12 = vrot.slane %v2124_v31, %v6127_v62 }
 0x338   : > { %v2220_v37 = vpop.permute.xlu0 %2219 }
 0x339   : > { %v2127_v7 = vpop.permute.xlu1 %2126  ;;  %v2446_v26 = vrot.slane %v2220_v37, %v6127_v62 }
 0x33a   : > { %2294 = vperm.xlu1 %3885, %v5546_v18   ;;  %v2322_v40 = vrot.slane %v2127_v7, %v6127_v62 }
 0x33c   : > { %v2226_v50 = vpop.permute.xlu0 %2225 }
 0x33d   : > { %v2130_v9 = vpop.permute.xlu1 %2129  ;;  %v2454_v41 = vrot.slane %v2226_v50, %v6127_v62 }
 0x33e   : > { %2300 = vperm.xlu1 %3885, %v5549_v61   ;;  %v2326_v30 = vrot.slane %v2130_v9, %v6127_v62 }
 0x340   : > { %v2232_v24 = vpop.permute.xlu0 %2231 }
 0x341   : > { %v2133_v35 = vpop.permute.xlu1 %2132  ;;  %v2462_v50 = vrot.slane %v2232_v24, %v6127_v62 }
 0x342   : > { %2306 = vperm.xlu1 %3885, %v5552_v23   ;;  %v2314_v23 = vrot.slane %v2121_v8, %v6127_v62 }
 0x344   : > { %v2238_v51 = vpop.permute.xlu0 %2237  ;;  %v2567_v31 = vsel %vm1439_vm0, %v2318_v12, %v2314_v23 }
 0x345   : > { %v2136_v34 = vpop.permute.xlu1 %2135  ;;  %v2568_v7 = vsel %vm1441_vm1, %v2322_v40, %v2567_v31 }
 0x346   : > { %v2334_v8 = vrot.slane %v2136_v34, %v6127_v62 }
 0x349   : > { %v2139_v15 = vpop.permute.xlu1 %2138 }
 0x34d   : > { %v2142_v29 = vpop.permute.xlu1 %2141 }
 0x351   : > { %v2217_v20 = vpop.permute.xlu1 %2216 }
 0x352   : > { %v2442_v18 = vrot.slane %v2217_v20, %v6127_v62 }
 0x354   : > { %v2148_v13 = vpop.permute.xlu0 %2147  ;;  %v2595_v60 = vsel %vm1439_vm0, %v2446_v26, %v2442_v18 }
 0x355   : > { %v2223_v59 = vpop.permute.xlu1 %2222  ;;  %v2350_v31 = vrot.slane %v2148_v13, %v6127_v62 }
 0x356   : > { %v2450_v61 = vrot.slane %v2223_v59, %v6127_v62  ;;  %v2330_v59 = vrot.slane %v2133_v35, %v6127_v62  ;;  %v2342_v35 = vrot.slane %v2142_v29, %v6127_v62 }
 0x358   : > { %v2596_v22 = vsel %vm1441_vm1, %v2450_v61, %v2595_v60  ;;  %v2154_v2 = vpop.permute.xlu0 %2153  ;;  %v2338_v61 = vrot.slane %v2139_v15, %v6127_v62 }
 0x359   : > { %v2229_v20 = vpop.permute.xlu1 %2228  ;;  %v2597_v26 = vsel %vm1443_vm2, %v2454_v41, %v2596_v22  ;;  %v2470_v22 = vrot.slane %v2238_v51, %v6127_v62 }
 0x35a   : > { %v2458_v37 = vrot.slane %v2229_v20, %v6127_v62  ;;  %v2569_v20 = vsel %vm1443_vm2, %v2326_v30, %v2568_v7 }
 0x35b   : > { %v2570_v12 = vsel %vm1445_vm3, %v2330_v59, %v2569_v20  ;;  %v2358_v20 = vrot.slane %v2154_v2, %v6127_v62 }
 0x35c   : > { %v2598_v60 = vsel %vm1445_vm3, %v2458_v37, %v2597_v26  ;;  %v2160_v18 = vpop.permute.xlu0 %2159  ;;  %v2571_v23 = vsel %vm1447_vm4, %v2334_v8, %v2570_v12 }
 0x35d   : > { %v2235_v9 = vpop.permute.xlu1 %2234  ;;  %v2599_v34 = vsel %vm1447_vm4, %v2462_v50, %v2598_v60  ;;  %v2572_v30 = vsel %vm1449_vm5, %v2338_v61, %v2571_v23 }
 0x35e   : > { %v2466_v41 = vrot.slane %v2235_v9, %v6127_v62  ;;  %v2573_v26 = vsel %vm1451_vm6, %v2342_v35, %v2572_v30 }
 0x35f   : > { %v2631_v8 = vsel %vm1510_vm7, %v2573_v26, 0.0 }
 0x360   : > { %v2166_v40 = vpop.permute.xlu0 %2165  ;;  %v2600_v24 = vsel %vm1449_vm5, %v2466_v41, %v2599_v34  ;;  %v2366_v34 = vrot.slane %v2160_v18, %v6127_v62 }
 0x361   : > { %v2145_v37 = vpop.permute.xlu1 %2144  ;;  %v2601_v15 = vsel %vm1451_vm6, %v2470_v22, %v2600_v24 }
 0x362   : > { %v2643_v29 = vsel %vm1510_vm7, %v2601_v15, 0.0  ;;  %v2346_v59 = vrot.slane %v2145_v37, %v6127_v62  ;;  %v2374_v37 = vrot.slane %v2166_v40, %v6127_v62 }
 0x363   : > { %2644 = vadd.xlane.f32.xlu0 %v2643_v29 }
 0x364   : > { %v2244_v51 = vpop.permute.xlu0 %2243  ;;  %v2574_v50 = vsel %vm1439_vm0, %v2350_v31, %v2346_v59 }
 0x365   : > { %v2151_v60 = vpop.permute.xlu1 %2150  ;;  %v2478_v18 = vrot.slane %v2244_v51, %v6127_v62 }
 0x366   : > { %v2354_v7 = vrot.slane %v2151_v60, %v6127_v62  ;;  %2632 = vadd.xlane.f32.xlu1 %v2631_v8 }
 0x368   : > { %v2575_v61 = vsel %vm1441_vm1, %v2354_v7, %v2574_v50  ;;  %v2250_v9 = vpop.permute.xlu0 %2249 }
 0x369   : > { %v2157_v35 = vpop.permute.xlu1 %2156  ;;  %v2576_v12 = vsel %vm1443_vm2, %v2358_v20, %v2575_v61  ;;  %v2486_v20 = vrot.slane %v2250_v9, %v6127_v62 }
 0x36a   : > { %v2362_v41 = vrot.slane %v2157_v35, %v6127_v62 }
 0x36c   : > { %v2577_v13 = vsel %vm1445_vm3, %v2362_v41, %v2576_v12  ;;  %v2256_v22 = vpop.permute.xlu0 %2255 }
 0x36d   : > { %v2163_v23 = vpop.permute.xlu1 %2162  ;;  %v2578_v15 = vsel %vm1447_vm4, %v2366_v34, %v2577_v13  ;;  %v2494_v51 = vrot.slane %v2256_v22, %v6127_v62 }
 0x36e   : > { %v2370_v24 = vrot.slane %v2163_v23, %v6127_v62 }
 0x370   : > { %v2262_v30 = vpop.permute.xlu0 %2261  ;;  %v2579_v2 = vsel %vm1449_vm5, %v2370_v24, %v2578_v15 }
 0x371   : > { %v2241_v29 = vpop.permute.xlu1 %2240  ;;  %v2580_v26 = vsel %vm1451_vm6, %v2374_v37, %v2579_v2  ;;  %v2502_v37 = vrot.slane %v2262_v30, %v6127_v62 }
 0x372   : > { %v2634_v59 = vsel %vm1510_vm7, %v2580_v26, 0.0  ;;  %v2474_v31 = vrot.slane %v2241_v29, %v6127_v62 }
 0x373   : > { %2635 = vadd.xlane.f32.xlu0 %v2634_v59 }
 0x374   : > { %v2172_v60 = vpop.permute.xlu0 %2171  ;;  %v2602_v40 = vsel %vm1439_vm0, %v2478_v18, %v2474_v31 }
 0x375   : > { %v2247_v8 = vpop.permute.xlu1 %2246  ;;  %v2382_v22 = vrot.slane %v2172_v60, %v6127_v62 }
 0x376   : > { %v2482_v7 = vrot.slane %v2247_v8, %v6127_v62 }
 0x378   : > { %v2603_v50 = vsel %vm1441_vm1, %v2482_v7, %v2602_v40  ;;  %v2178_v61 = vpop.permute.xlu0 %2177 }
 0x379   : > { %v2253_v35 = vpop.permute.xlu1 %2252  ;;  %v2604_v12 = vsel %vm1443_vm2, %v2486_v20, %v2603_v50  ;;  %v2390_v20 = vrot.slane %v2178_v61, %v6127_v62 }
 0x37a   : > { %v2490_v41 = vrot.slane %v2253_v35, %v6127_v62 }
 0x37c   : > { %v2605_v13 = vsel %vm1445_vm3, %v2490_v41, %v2604_v12  ;;  %v2184_v34 = vpop.permute.xlu0 %2183 }
 0x37d   : > { %v2259_v23 = vpop.permute.xlu1 %2258  ;;  %v2606_v15 = vsel %vm1447_vm4, %v2494_v51, %v2605_v13  ;;  %v2398_v60 = vrot.slane %v2184_v34, %v6127_v62 }
 0x37e   : > { %v2498_v24 = vrot.slane %v2259_v23, %v6127_v62 }
 0x380   : > { %v2190_v2 = vpop.permute.xlu0 %2189  ;;  %v2607_v9 = vsel %vm1449_vm5, %v2498_v24, %v2606_v15 }
 0x381   : > { %v2169_v29 = vpop.permute.xlu1 %2168  ;;  %v2608_v26 = vsel %vm1451_vm6, %v2502_v37, %v2607_v9  ;;  %v2406_v37 = vrot.slane %v2190_v2, %v6127_v62 }
 0x382   : > { %v2646_v59 = vsel %vm1510_vm7, %v2608_v26, 0.0  ;;  %v2378_v31 = vrot.slane %v2169_v29, %v6127_v62 }
 0x383   : > { %2647 = vadd.xlane.f32.xlu1 %v2646_v59 }
 0x384   : > { %v2268_v18 = vpop.permute.xlu0 %2267  ;;  %v2581_v30 = vsel %vm1439_vm0, %v2382_v22, %v2378_v31 }
 0x385   : > { %v2175_v8 = vpop.permute.xlu1 %2174  ;;  %v2510_v34 = vrot.slane %v2268_v18, %v6127_v62 }
 0x386   : > { %v2386_v7 = vrot.slane %v2175_v8, %v6127_v62 }
 0x388   : > { %v2582_v40 = vsel %vm1441_vm1, %v2386_v7, %v2581_v30  ;;  %v2274_v50 = vpop.permute.xlu0 %2273 }
 0x389   : > { %v2181_v35 = vpop.permute.xlu1 %2180  ;;  %v2583_v12 = vsel %vm1443_vm2, %v2390_v20, %v2582_v40  ;;  %v2518_v20 = vrot.slane %v2274_v50, %v6127_v62 }
 0x38a   : > { %v2394_v41 = vrot.slane %v2181_v35, %v6127_v62 }
 0x38c   : > { %v2584_v13 = vsel %vm1445_vm3, %v2394_v41, %v2583_v12  ;;  %v2280_v51 = vpop.permute.xlu0 %2279 }
 0x38d   : > { %v2187_v23 = vpop.permute.xlu1 %2186  ;;  %v2585_v15 = vsel %vm1447_vm4, %v2398_v60, %v2584_v13  ;;  %v2526_v60 = vrot.slane %v2280_v51, %v6127_v62 }
 0x38e   : > { %v2402_v24 = vrot.slane %v2187_v23, %v6127_v62 }
 0x390   : > { %v2286_v9 = vpop.permute.xlu0 %2285  ;;  %v2586_v61 = vsel %vm1449_vm5, %v2402_v24, %v2585_v15 }
 0x391   : > { %v2265_v29 = vpop.permute.xlu1 %2264  ;;  %v2587_v26 = vsel %vm1451_vm6, %v2406_v37, %v2586_v61  ;;  %v2534_v37 = vrot.slane %v2286_v9, %v6127_v62 }
 0x392   : > { %v2637_v59 = vsel %vm1510_vm7, %v2587_v26, 0.0  ;;  %v2506_v31 = vrot.slane %v2265_v29, %v6127_v62 }
 0x393   : > { %2638 = vadd.xlane.f32.xlu0 %v2637_v59 }
 0x394   : > { %v2196_v22 = vpop.permute.xlu0 %2195  ;;  %v2609_v2 = vsel %vm1439_vm0, %v2510_v34, %v2506_v31 }
 0x395   : > { %v2271_v8 = vpop.permute.xlu1 %2270  ;;  %v2414_v51 = vrot.slane %v2196_v22, %v6127_v62 }
 0x396   : > { %v2514_v7 = vrot.slane %v2271_v8, %v6127_v62 }
 0x398   : > { %v2610_v30 = vsel %vm1441_vm1, %v2514_v7, %v2609_v2  ;;  %v2202_v40 = vpop.permute.xlu0 %2201 }
 0x399   : > { %v2277_v35 = vpop.permute.xlu1 %2276  ;;  %v2611_v12 = vsel %vm1443_vm2, %v2518_v20, %v2610_v30  ;;  %v2422_v2 = vrot.slane %v2202_v40, %v6127_v62 }
 0x39a   : > { %v2522_v41 = vrot.slane %v2277_v35, %v6127_v62 }
 0x39c   : > { %v2612_v13 = vsel %vm1445_vm3, %v2522_v41, %v2611_v12  ;;  %v2208_v24 = vpop.permute.xlu0 %2207 }
 0x39d   : > { %v2283_v18 = vpop.permute.xlu1 %2282  ;;  %v2613_v15 = vsel %vm1447_vm4, %v2526_v60, %v2612_v13  ;;  %v2430_v13 = vrot.slane %v2208_v24, %v6127_v62 }
 0x39e   : > { %v2530_v23 = vrot.slane %v2283_v18, %v6127_v62 }
 0x3a0   : > { %v2614_v61 = vsel %vm1449_vm5, %v2530_v23, %v2613_v15  ;;  %v2214_v31 = vpop.permute.xlu0 %2213 }
 0x3a1   : > { %v2193_v50 = vpop.permute.xlu1 %2192  ;;  %v2615_v29 = vsel %vm1451_vm6, %v2534_v37, %v2614_v61  ;;  %v2438_v18 = vrot.slane %v2214_v31, %v6127_v62 }
 0x3a2   : > { %v2649_v26 = vsel %vm1510_vm7, %v2615_v29, 0.0  ;;  %v2410_v59 = vrot.slane %v2193_v50, %v6127_v62 }
 0x3a3   : > { %2650 = vadd.xlane.f32.xlu0 %v2649_v26 }
 0x3a4   : > { %v2588_v9 = vsel %vm1439_vm0, %v2414_v51, %v2410_v59  ;;  %v2292_v20 = vpop.permute.xlu0 %2291 }
 0x3a5   : > { %v2199_v34 = vpop.permute.xlu1 %2198  ;;  %v2542_v24 = vrot.slane %v2292_v20, %v6127_v62 }
 0x3a6   : > { %v2418_v8 = vrot.slane %v2199_v34, %v6127_v62 }
 0x3a8   : > { %v2589_v7 = vsel %vm1441_vm1, %v2418_v8, %v2588_v9  ;;  %v2298_v37 = vpop.permute.xlu0 %2297 }
 0x3a9   : > { %v2205_v30 = vpop.permute.xlu1 %2204  ;;  %v2590_v41 = vsel %vm1443_vm2, %v2422_v2, %v2589_v7  ;;  %v2550_v8 = vrot.slane %v2298_v37, %v6127_v62 }
 0x3aa   : > { %v2426_v35 = vrot.slane %v2205_v30, %v6127_v62 }
 0x3ac   : > { %v2591_v12 = vsel %vm1445_vm3, %v2426_v35, %v2590_v41  ;;  %v2304_v59 = vpop.permute.xlu0 %2303 }
 0x3ad   : > { %v2211_v22 = vpop.permute.xlu1 %2210  ;;  %v2592_v23 = vsel %vm1447_vm4, %v2430_v13, %v2591_v12  ;;  %v2558_v20 = vrot.slane %v2304_v59, %v6127_v62 }
 0x3ae   : > { %v2434_v60 = vrot.slane %v2211_v22, %v6127_v62 }
 0x3b0   : > { %v2593_v40 = vsel %vm1449_vm5, %v2434_v60, %v2592_v23  ;;  %v2310_v30 = vpop.permute.xlu0 %2309 }
 0x3b1   : > { %v2289_v15 = vpop.permute.xlu1 %2288  ;;  %v2594_v61 = vsel %vm1451_vm6, %v2438_v18, %v2593_v40  ;;  %v2566_v13 = vrot.slane %v2310_v30, %v6127_v62 }
 0x3b2   : > { %v2640_v50 = vsel %vm1510_vm7, %v2594_v61, 0.0  ;;  %v2538_v29 = vrot.slane %v2289_v15, %v6127_v62 }
 0x3b3   : > { %2641 = vadd.xlane.f32.xlu1 %v2640_v50 }
 0x3b4   : > { %v2616_v31 = vsel %vm1439_vm0, %v2542_v24, %v2538_v29 }
 0x3b5   : > { %v2295_v26 = vpop.permute.xlu1 %2294 }
 0x3b6   : > { %v2546_v51 = vrot.slane %v2295_v26, %v6127_v62 }
 0x3b8   : > { %v2617_v34 = vsel %vm1441_vm1, %v2546_v51, %v2616_v31 }
 0x3b9   : > { %v2301_v9 = vpop.permute.xlu1 %2300  ;;  %v2618_v2 = vsel %vm1443_vm2, %v2550_v8, %v2617_v34 }
 0x3ba   : > { %v2554_v7 = vrot.slane %v2301_v9, %v6127_v62 }
 0x3bc   : > { %v2619_v35 = vsel %vm1445_vm3, %v2554_v7, %v2618_v2 }
 0x3bd   : > { %v2307_v41 = vpop.permute.xlu1 %2306  ;;  %v2620_v22 = vsel %vm1447_vm4, %v2558_v20, %v2619_v35 }
 0x3be   : > { %v2562_v12 = vrot.slane %v2307_v41, %v6127_v62 }
 0x3c0   : > { %v2621_v60 = vsel %vm1449_vm5, %v2562_v12, %v2620_v22 }
 0x3c1   : > { %v2622_v18 = vsel %vm1451_vm6, %v2566_v13, %v2621_v60 }
 0x3c2   : > { %v2652_v23 = vsel %vm1510_vm7, %v2622_v18, 0.0 }
 0x3c3   : > { %2653 = vadd.xlane.f32.xlu1 %v2652_v23 }
 0x3ec   : > { %v2645_v40 = vpop.xlane.xlu0 %2644 }
 0x3ef   : > { %v2633_v37 = vpop.xlane.xlu1 %2632 }
 0x3f0   : > { %4142 = vrcp.f32 %v2633_v37 }
 0x3f1   : > { %4144 = vrcp.f32 %v2645_v40 }
 0x3fc   : > { %v2636_v30 = vpop.xlane.xlu0 %2635 }
 0x3fd   : > { %v4143_v15 = vpop.eup %4142  ;;  %4146 = vrcp.f32 %v2636_v30 }
 0x3fe   : > { %v2674_v61 = vrot.slane %v4143_v15, %v5142_v11  ;;  %v2678_v50 = vrot.slane %v4143_v15, %v5145_v17  ;;  %v2686_v26 = vrot.slane %v4143_v15, %v5151_v14  ;;  %v2682_v59 = vrot.slane %v4143_v15, %v5148_v0  ;;  %v4145_v9 = vpop.eup %4144 }
 0x3ff   : > { %v2694_v34 = vrot.slane %v4143_v15, %v5171_v46  ;;  %v2690_v8 = vrot.slane %v4143_v15, %v5163_v39  ;;  %v2702_v7 = vrot.slane %v4143_v15, %v5184_v38  ;;  %v2698_v2 = vrot.slane %v4143_v15, %v5179_v54 }
 0x400   : > { %v2991_v29 = vmul.f32 %v5191_v43, %v2674_v61  ;;  %v2992_v24 = vmul.f32 %v5194_v47, %v2678_v50  ;;  %v2994_v51 = vmul.f32 %v5206_v63, %v2686_v26  ;;  %v2993_v31 = vmul.f32 %v5200_v19, %v2682_v59 }
 0x401   : > { %v2996_v43 = vmul.f32 %v5239_v42, %v2694_v34  ;;  %v2995_v47 = vmul.f32 %v5226_v58, %v2690_v8  ;;  %v2806_v19 = vrot.slane %v4145_v9, %v5145_v17  ;;  %v2998_v63 = vmul.f32 %v5263_v49, %v2702_v7 }
 0x402   : > { %3120 = vperm.xlu0 %3884, %v2991_v29   ;;  %3123 = vperm.xlu1 %3885, %v2992_v24   ;;  %v2997_v35 = vmul.f32 %v5253_v27, %v2698_v2  ;;  %v2802_v20 = vrot.slane %v4145_v9, %v5142_v11  ;;  %v2814_v41 = vrot.slane %v4145_v9, %v5151_v14  ;;  %v6128_v2 = vld [vmem:[#allocation34_spill] sm:$0xff] }
 0x403   : > { %v3024_v58 = vmul.f32 %v5210_v55, %v2806_v19  ;;  %v2810_v12 = vrot.slane %v4145_v9, %v5148_v0  ;;  %v2822_v27 = vrot.slane %v4145_v9, %v5171_v46  ;;  %v2818_v22 = vrot.slane %v4145_v9, %v5163_v39 }
 0x404   : > { %v3023_v42 = vmul.f32 %v5272_v32, %v2802_v20  ;;  %v3026_v13 = vmul.f32 %v5220_v53, %v2814_v41  ;;  %v2830_v55 = vrot.slane %v4145_v9, %v5184_v38  ;;  %v2826_v18 = vrot.slane %v4145_v9, %v5179_v54  ;;  %v6130_v20 = vld [vmem:[#allocation11_spill] sm:$0xff] }
 0x405   : > { %v3025_v49 = vmul.f32 %v5283_v45, %v2810_v12  ;;  %v3028_v32 = vmul.f32 %v5236_v1, %v2822_v27  ;;  %v3027_v60 = vmul.f32 %v5295_v44, %v2818_v22 }
 0x406   : > { %3129 = vperm.xlu0 %3884, %v2994_v51   ;;  %3126 = vperm.xlu1 %3885, %v2993_v31   ;;  %v3030_v53 = vmul.f32 %v5246_v6, %v2830_v55  ;;  %v3029_v45 = vmul.f32 %v5305_v57, %v2826_v18 }
 0x40a   : > { %3135 = vperm.xlu0 %3884, %v2996_v43   ;;  %3132 = vperm.xlu1 %3885, %v2995_v47   ;;  %v4147_v23 = vpop.eup %4146 }
 0x40b   : > { %v2710_v40 = vrot.slane %v4147_v23, %v5145_v17  ;;  %v2706_v15 = vrot.slane %v4147_v23, %v5142_v11  ;;  %v2718_v61 = vrot.slane %v4147_v23, %v5151_v14  ;;  %v2714_v50 = vrot.slane %v4147_v23, %v5148_v0 }
 0x40c   : > { %v2648_v37 = vpop.xlane.xlu1 %2647  ;;  %v2726_v29 = vrot.slane %v4147_v23, %v5171_v46  ;;  %v2722_v24 = vrot.slane %v4147_v23, %v5163_v39  ;;  %v2730_v59 = vrot.slane %v4147_v23, %v5179_v54 }
 0x40d   : > { %4148 = vrcp.f32 %v2648_v37  ;;  %v3000_v1 = vmul.f32 %v5278_v56, %v2710_v40  ;;  %v2999_v44 = vmul.f32 %v5320_v33, %v2706_v15  ;;  %v3002_v6 = vmul.f32 %v5290_v10, %v2718_v61  ;;  %v6136_v15 = vld [vmem:[#allocation14_spill] sm:$0xff] }
 0x40e   : > { %3141 = vperm.xlu0 %3884, %v2998_v63   ;;  %3138 = vperm.xlu1 %3885, %v2997_v35   ;;  %v3001_v57 = vmul.f32 %v5333_v5, %v2714_v50  ;;  %v2734_v56 = vrot.slane %v4147_v23, %v5184_v38  ;;  %v3004_v33 = vmul.f32 %v5302_v16, %v2726_v29  ;;  %v6134_v23 = vld [vmem:[#allocation22_spill] sm:$0xff]  ;;  %v6138_v29 = vld [vmem:[#allocation15_spill] sm:$0xff] }
 0x40f   : > { %v3003_v26 = vmul.f32 %v5347_v25, %v2722_v24  ;;  %v3005_v5 = vmul.f32 %v5359_v36, %v2730_v59 }
 0x410   : > { %v3006_v10 = vmul.f32 %v5314_v21, %v2734_v56 }
 0x412   : > { %3219 = vperm.xlu0 %3884, %v3024_v58   ;;  %3216 = vperm.xlu1 %3885, %v3023_v42  }
 0x416   : > { %3225 = vperm.xlu0 %3884, %v3026_v13   ;;  %3222 = vperm.xlu1 %3885, %v3025_v49   ;;  %v6132_v13 = vld [vmem:[#allocation35_spill] sm:$0xff] }
 0x41a   : > { %3231 = vperm.xlu0 %3884, %v3028_v32   ;;  %3228 = vperm.xlu1 %3885, %v3027_v60   ;;  %v4149_v51 = vpop.eup %4148  ;;  %v6133_v60 = vld [vmem:[#allocation33_spill] sm:$0xff] }
 0x41b   : > { %v2838_v34 = vrot.slane %v4149_v51, %v5145_v17  ;;  %v2834_v8 = vrot.slane %v4149_v51, %v5142_v11  ;;  %v2846_v9 = vrot.slane %v4149_v51, %v5151_v14  ;;  %v2842_v43 = vrot.slane %v4149_v51, %v5148_v0 }
 0x41c   : > { %v2639_v31 = vpop.xlane.xlu0 %2638  ;;  %v2854_v47 = vrot.slane %v4149_v51, %v5171_v46  ;;  %v2850_v7 = vrot.slane %v4149_v51, %v5163_v39  ;;  %v2858_v19 = vrot.slane %v4149_v51, %v5179_v54 }
 0x41d   : > { %4150 = vrcp.f32 %v2639_v31  ;;  %v3032_v16 = vmul.f32 %v5330_v48, %v2838_v34  ;;  %v3031_v25 = vmul.f32 %v5371_v4, %v2834_v8  ;;  %v3034_v21 = vmul.f32 %v5340_v52, %v2846_v9  ;;  %v6129_v52 = vld [vmem:[#allocation31_spill] sm:$0xff] }
 0x41e   : > { %3237 = vperm.xlu0 %3884, %v3030_v53   ;;  %3234 = vperm.xlu1 %3885, %v3029_v45   ;;  %v3033_v36 = vmul.f32 %v5383_v3, %v2842_v43  ;;  %v2862_v48 = vrot.slane %v4149_v51, %v5184_v38  ;;  %v3036_v4 = vmul.f32 %v5354_v28, %v2854_v47  ;;  %v6131_v28 = vld [vmem:[#allocation32_spill] sm:$0xff]  ;;  %v6140_v51 = vld [vmem:[#allocation19_spill] sm:$0xff] }
 0x41f   : > { %v3035_v30 = vmul.f32 %v6128_v2, %v2850_v7  ;;  %v3037_v58 = vmul.f32 %v6130_v20, %v2858_v19  ;;  %v6135_v45 = vld [vmem:[#allocation16_spill] sm:$0xff]  ;;  %v6142_v43 = vld [vmem:[#allocation23_spill] sm:$0xff] }
 0x420   : > { %v3038_v3 = vmul.f32 %v6129_v52, %v2862_v48  ;;  %v6143_v47 = vld [vmem:[#allocation24_spill] sm:$0xff]  ;;  %v6144_v48 = vld [vmem:[#allocation13_spill] sm:$0xff]  ;;  %v6145_v19 = vld [vmem:[#allocation27_spill] sm:$0xff] }
 0x422   : > { %3147 = vperm.xlu0 %3884, %v3000_v1   ;;  %3144 = vperm.xlu1 %3885, %v2999_v44  }
 0x426   : > { %3153 = vperm.xlu0 %3884, %v3002_v6   ;;  %3150 = vperm.xlu1 %3885, %v3001_v57   ;;  %v6137_v6 = vld [vmem:[#allocation12_spill] sm:$0xff] }
 0x42a   : > { %3159 = vperm.xlu0 %3884, %v3004_v33   ;;  %3156 = vperm.xlu1 %3885, %v3003_v26   ;;  %v4151_v63 = vpop.eup %4150  ;;  %v6139_v26 = vld [vmem:[#allocation18_spill] sm:$0xff] }
 0x42b   : > { %v2742_v42 = vrot.slane %v4151_v63, %v5145_v17  ;;  %v2738_v41 = vrot.slane %v4151_v63, %v5142_v11  ;;  %v2750_v27 = vrot.slane %v4151_v63, %v5151_v14  ;;  %v2746_v22 = vrot.slane %v4151_v63, %v5148_v0 }
 0x42c   : > { %v2651_v35 = vpop.xlane.xlu0 %2650  ;;  %v2758_v32 = vrot.slane %v4151_v63, %v5171_v46  ;;  %v2754_v53 = vrot.slane %v4151_v63, %v5163_v39  ;;  %v2766_v44 = vrot.slane %v4151_v63, %v5184_v38  ;;  %v2762_v61 = vrot.slane %v4151_v63, %v5179_v54 }
 0x42d   : > { %4152 = vrcp.f32 %v2651_v35  ;;  %v3008_v12 = vmul.f32 %v6131_v28, %v2742_v42  ;;  %v3007_v49 = vmul.f32 %v6132_v13, %v2738_v41  ;;  %v3010_v18 = vmul.f32 %v6133_v60, %v2750_v27  ;;  %v6146_v35 = vld [vmem:[#allocation26_spill] sm:$0xff]  ;;  %v6148_v41 = vld [vmem:[#allocation29_spill] sm:$0xff]  ;;  %v6149_v27 = vld [vmem:[#allocation36_spill] sm:$0xff] }
 0x42e   : > { %3165 = vperm.xlu0 %3884, %v3006_v10   ;;  %3162 = vperm.xlu1 %3885, %v3005_v5   ;;  %v3009_v37 = vmul.f32 %v6134_v23, %v2746_v22  ;;  %v3012_v40 = vmul.f32 %v6135_v45, %v2758_v32  ;;  %v3011_v1 = vmul.f32 %v6136_v15, %v2754_v53  ;;  %v6151_v23 = vld [vmem:[#allocation37_spill] sm:$0xff] }
 0x42f   : > { %v3014_v57 = vmul.f32 %v6137_v6, %v2766_v44  ;;  %v3013_v24 = vmul.f32 %v6138_v29, %v2762_v61  ;;  %v6152_v53 = vld [vmem:[#allocation25_spill] sm:$0xff]  ;;  %v6154_v61 = vld [vmem:[#allocation28_spill] sm:$0xff]  ;;  %v6155_v29 = vld [vmem:[#allocation38_spill] sm:$0xff] }
 0x432   : > { %3243 = vperm.xlu0 %3884, %v3032_v16   ;;  %3240 = vperm.xlu1 %3885, %v3031_v25   ;;  %v6141_v25 = vld [vmem:[#allocation17_spill] sm:$0xff] }
 0x436   : > { %3249 = vperm.xlu0 %3884, %v3034_v21   ;;  %3246 = vperm.xlu1 %3885, %v3033_v36  }
 0x43a   : > { %3255 = vperm.xlu0 %3884, %v3036_v4   ;;  %3252 = vperm.xlu1 %3885, %v3035_v30   ;;  %v5761_v50 = vpop.eup %4152 }
 0x43b   : > { %v2870_v56 = vrot.slane %v5761_v50, %v5145_v17  ;;  %v2866_v33 = vrot.slane %v5761_v50, %v5142_v11  ;;  %v2890_v10 = vrot.slane %v5761_v50, %v5179_v54  ;;  %v2874_v5 = vrot.slane %v5761_v50, %v5148_v0 }
 0x43c   : > { %v2642_v55 = vpop.xlane.xlu1 %2641  ;;  %v2878_v16 = vrot.slane %v5761_v50, %v5151_v14  ;;  %v2882_v30 = vrot.slane %v5761_v50, %v5163_v39  ;;  %v2886_v20 = vrot.slane %v5761_v50, %v5171_v46 }
 0x43d   : > { %4154 = vrcp.f32 %v2642_v55  ;;  %v3040_v59 = vmul.f32 %v6139_v26, %v2870_v56  ;;  %v3039_v31 = vmul.f32 %v6140_v51, %v2866_v33  ;;  %v3045_v9 = vmul.f32 %v6141_v25, %v2890_v10  ;;  %v6150_v55 = vld [vmem:[#allocation21_spill] sm:$0xff]  ;;  %v6156_v56 = vld [vmem:[#allocation40_spill] sm:$0xff] }
 0x43e   : > { %3261 = vperm.xlu0 %3884, %v3038_v3   ;;  %3258 = vperm.xlu1 %3885, %v3037_v58   ;;  %v3041_v21 = vmul.f32 %v6142_v43, %v2874_v5  ;;  %v3042_v4 = vmul.f32 %v6144_v48, %v2878_v16  ;;  %v3043_v52 = vmul.f32 %v6146_v35, %v2882_v30  ;;  %v6147_v58 = vld [vmem:[#allocation30_spill] sm:$0xff]  ;;  %v6160_v16 = vld [vmem:[#allocation45_spill] sm:$0xff] }
 0x43f   : > { %v3044_v28 = vmul.f32 %v6148_v41, %v2886_v20 }
 0x442   : > { %3171 = vperm.xlu0 %3884, %v3008_v12   ;;  %3168 = vperm.xlu1 %3885, %v3007_v49  }
 0x446   : > { %3177 = vperm.xlu0 %3884, %v3010_v18   ;;  %3174 = vperm.xlu1 %3885, %v3009_v37  }
 0x44a   : > { %3183 = vperm.xlu0 %3884, %v3012_v40   ;;  %3180 = vperm.xlu1 %3885, %v3011_v1   ;;  %v4155_v34 = vpop.eup %4154  ;;  %v6153_v1 = vld [vmem:[#allocation43_spill] sm:$0xff] }
 0x44b   : > { %v2774_v36 = vrot.slane %v4155_v34, %v5145_v17  ;;  %v2782_v2 = vrot.slane %v4155_v34, %v5151_v14  ;;  %v2790_v3 = vrot.slane %v4155_v34, %v5171_v46  ;;  %v2798_v12 = vrot.slane %v4155_v34, %v5184_v38 }
 0x44c   : > { %v2654_v8 = vpop.xlane.xlu1 %2653  ;;  %v2770_v13 = vrot.slane %v4155_v34, %v5142_v11  ;;  %v2778_v18 = vrot.slane %v4155_v34, %v5148_v0  ;;  %v2786_v15 = vrot.slane %v4155_v34, %v5163_v39 }
 0x44d   : > { %4156 = vrcp.f32 %v2654_v8  ;;  %v3016_v7 = vmul.f32 %v6143_v47, %v2774_v36  ;;  %v3018_v63 = vmul.f32 %v6145_v19, %v2782_v2  ;;  %v3020_v42 = vmul.f32 %v6147_v58, %v2790_v3 }
 0x44e   : > { %3189 = vperm.xlu0 %3884, %v3014_v57   ;;  %3186 = vperm.xlu1 %3885, %v3013_v24   ;;  %v3022_v22 = vmul.f32 %v6149_v27, %v2798_v12  ;;  %v3015_v32 = vmul.f32 %v6150_v55, %v2770_v13  ;;  %v3017_v45 = vmul.f32 %v6152_v53, %v2778_v18 }
 0x44f   : > { %v3019_v6 = vmul.f32 %v6154_v61, %v2786_v15  ;;  %v2794_v57 = vrot.slane %v4155_v34, %v5179_v54  ;;  %v6159_v34 = vld [vmem:[#allocation39_spill] sm:$0xff] }
 0x451   : > { %v3021_v33 = vmul.f32 %v6156_v56, %v2794_v57 }
 0x452   : > { %3267 = vperm.xlu0 %3884, %v3040_v59   ;;  %3264 = vperm.xlu1 %3885, %v3039_v31   ;;  %v6157_v59 = vld [vmem:[#allocation44_spill] sm:$0xff]  ;;  %v6158_v31 = vld [vmem:[#allocation42_spill] sm:$0xff] }
 0x456   : > { %3282 = vperm.xlu0 %3884, %v3045_v9   ;;  %3270 = vperm.xlu1 %3885, %v3041_v21   ;;  %v6161_v9 = vld [vmem:[#allocation41_spill] sm:$0xff]  ;;  %v6162_v21 = vld [vmem:[#allocation20_spill] sm:$0xff] }
 0x45a   : > { %3195 = vperm.xlu0 %3884, %v3016_v7   ;;  %3273 = vperm.xlu1 %3885, %v3042_v4   ;;  %v4157_v49 = vpop.eup %4156 }
 0x45b   : > { %v2902_v60 = vrot.slane %v4157_v49, %v5145_v17  ;;  %v2906_v40 = vrot.slane %v4157_v49, %v5148_v0  ;;  %v2910_v17 = vrot.slane %v4157_v49, %v5151_v14  ;;  %v2914_v0 = vrot.slane %v4157_v49, %v5163_v39 }
 0x45c   : > { %v2898_v26 = vrot.slane %v4157_v49, %v5142_v11  ;;  %v2918_v14 = vrot.slane %v4157_v49, %v5171_v46  ;;  %v2922_v5 = vrot.slane %v4157_v49, %v5179_v54  ;;  %v2926_v39 = vrot.slane %v4157_v49, %v5184_v38 }
 0x45d   : > { %v3048_v37 = vmul.f32 %v6151_v23, %v2902_v60  ;;  %v3049_v44 = vmul.f32 %v6153_v1, %v2906_v40  ;;  %v3050_v24 = vmul.f32 %v6155_v29, %v2910_v17  ;;  %v3051_v51 = vmul.f32 %v6157_v59, %v2914_v0 }
 0x45e   : > { %3201 = vperm.xlu0 %3884, %v3018_v63   ;;  %3276 = vperm.xlu1 %3885, %v3043_v52   ;;  %v3047_v10 = vmul.f32 %v6158_v31, %v2898_v26  ;;  %v3052_v8 = vmul.f32 %v6159_v34, %v2918_v14  ;;  %v3053_v25 = vmul.f32 %v6160_v16, %v2922_v5 }
 0x45f   : > { %v2894_v11 = vrot.slane %v5761_v50, %v5184_v38  ;;  %v3054_v43 = vmul.f32 %v6161_v9, %v2926_v39 }
 0x461   : > { %v3046_v36 = vmul.f32 %v6162_v21, %v2894_v11 }
 0x462   : > { %3207 = vperm.xlu0 %3884, %v3020_v42   ;;  %3279 = vperm.xlu1 %3885, %v3044_v28  }
 0x466   : > { %3213 = vperm.xlu0 %3884, %v3022_v22   ;;  %3192 = vperm.xlu1 %3885, %v3015_v32  }
 0x46a   : > { %3291 = vperm.xlu0 %3884, %v3048_v37   ;;  %3198 = vperm.xlu1 %3885, %v3017_v45  }
 0x46e   : > { %3294 = vperm.xlu0 %3884, %v3049_v44   ;;  %3204 = vperm.xlu1 %3885, %v3019_v6  }
 0x472   : > { %3297 = vperm.xlu0 %3884, %v3050_v24   ;;  %3210 = vperm.xlu1 %3885, %v3021_v33  }
 0x476   : > { %3300 = vperm.xlu0 %3884, %v3051_v51   ;;  %3288 = vperm.xlu1 %3885, %v3047_v10  }
 0x47a   : > { %3303 = vperm.xlu0 %3884, %v3052_v8   ;;  %3306 = vperm.xlu1 %3885, %v3053_v25  }
 0x47d   : > { %v3124_v46 = vpop.permute.xlu1 %3123  ;;  %v3121_v47 = vpop.permute.xlu0 %3120 }
 0x47e   : > { %3309 = vperm.xlu0 %3884, %v3054_v43   ;;  %3285 = vperm.xlu1 %3885, %v3046_v36   ;;  %v3318_v54 = vrot.slane %v3124_v46, %v6127_v62  ;;  %v3314_v7 = vrot.slane %v3121_v47, %v6127_v62 }
 0x480   : > { %v3567_v50 = vsel %vm1439_vm0, %v3318_v54, %v3314_v7 }
 0x481   : > { %v3127_v48 = vpop.permute.xlu1 %3126  ;;  %v3130_v4 = vpop.permute.xlu0 %3129 }
 0x482   : > { %v3322_v38 = vrot.slane %v3127_v48, %v6127_v62  ;;  %v3326_v2 = vrot.slane %v3130_v4, %v6127_v62 }
 0x484   : > { %v3568_v30 = vsel %vm1441_vm1, %v3322_v38, %v3567_v50 }
 0x485   : > { %v3133_v19 = vpop.permute.xlu1 %3132  ;;  %v3136_v63 = vpop.permute.xlu0 %3135  ;;  %v3569_v52 = vsel %vm1443_vm2, %v3326_v2, %v3568_v30 }
 0x486   : > { %v3330_v35 = vrot.slane %v3133_v19, %v6127_v62  ;;  %v3334_v3 = vrot.slane %v3136_v63, %v6127_v62 }
 0x488   : > { %v3570_v20 = vsel %vm1445_vm3, %v3330_v35, %v3569_v52 }
 0x489   : > { %v3139_v58 = vpop.permute.xlu1 %3138  ;;  %v3142_v42 = vpop.permute.xlu0 %3141  ;;  %v3571_v12 = vsel %vm1447_vm4, %v3334_v3, %v3570_v20 }
 0x48a   : > { %v3338_v41 = vrot.slane %v3139_v58, %v6127_v62  ;;  %v3342_v28 = vrot.slane %v3142_v42, %v6127_v62 }
 0x48c   : > { %v3572_v13 = vsel %vm1449_vm5, %v3338_v41, %v3571_v12 }
 0x48d   : > { %v3573_v49 = vsel %vm1451_vm6, %v3342_v28, %v3572_v13  ;;  %v3217_v27 = vpop.permute.xlu1 %3216  ;;  %v3220_v22 = vpop.permute.xlu0 %3219 }
 0x48e   : > { %3631 = vst.msk [vmem:[%s5838_s13] sm:$0xff] %vm1510_vm7, %v3573_v49  ;;  %v3442_v55 = vrot.slane %v3217_v27, %v6127_v62  ;;  %v3446_v32 = vrot.slane %v3220_v22, %v6127_v62 }
 0x490   : > { %v3595_v37 = vsel %vm1439_vm0, %v3446_v32, %v3442_v55 }
 0x491   : > { %v3223_v60 = vpop.permute.xlu1 %3222  ;;  %v3226_v18 = vpop.permute.xlu0 %3225 }
 0x492   : > { %v3450_v23 = vrot.slane %v3223_v60, %v6127_v62  ;;  %v3454_v53 = vrot.slane %v3226_v18, %v6127_v62 }
 0x494   : > { %v3596_v45 = vsel %vm1441_vm1, %v3450_v23, %v3595_v37 }
 0x495   : > { %v3229_v40 = vpop.permute.xlu1 %3228  ;;  %v3232_v15 = vpop.permute.xlu0 %3231  ;;  %v3597_v44 = vsel %vm1443_vm2, %v3454_v53, %v3596_v45 }
 0x496   : > { %v3458_v1 = vrot.slane %v3229_v40, %v6127_v62  ;;  %v3462_v61 = vrot.slane %v3232_v15, %v6127_v62 }
 0x498   : > { %v3598_v6 = vsel %vm1445_vm3, %v3458_v1, %v3597_v44 }
 0x499   : > { %v3235_v17 = vpop.permute.xlu1 %3234  ;;  %v3238_v57 = vpop.permute.xlu0 %3237  ;;  %v3599_v56 = vsel %vm1447_vm4, %v3462_v61, %v3598_v6 }
 0x49a   : > { %v3466_v29 = vrot.slane %v3235_v17, %v6127_v62  ;;  %v3470_v24 = vrot.slane %v3238_v57, %v6127_v62 }
 0x49c   : > { %v3600_v33 = vsel %vm1449_vm5, %v3466_v29, %v3599_v56 }
 0x49d   : > { %v3601_v0 = vsel %vm1451_vm6, %v3470_v24, %v3600_v33  ;;  %v3145_v26 = vpop.permute.xlu1 %3144  ;;  %v3148_v59 = vpop.permute.xlu0 %3147 }
 0x49e   : > { %3635 = vst.msk [vmem:[%s5838_s13 + $0x20] sm:$0xff] %vm1510_vm7, %v3601_v0  ;;  %v3346_v51 = vrot.slane %v3145_v26, %v6127_v62  ;;  %v3350_v31 = vrot.slane %v3148_v59, %v6127_v62 }
 0x4a0   : > { %v3574_v34 = vsel %vm1439_vm0, %v3350_v31, %v3346_v51 }
 0x4a1   : > { %v3151_v10 = vpop.permute.xlu1 %3150  ;;  %v3154_v14 = vpop.permute.xlu0 %3153 }
 0x4a2   : > { %v3354_v5 = vrot.slane %v3151_v10, %v6127_v62  ;;  %v3358_v8 = vrot.slane %v3154_v14, %v6127_v62 }
 0x4a4   : > { %v3575_v16 = vsel %vm1441_vm1, %v3354_v5, %v3574_v34 }
 0x4a5   : > { %v3157_v25 = vpop.permute.xlu1 %3156  ;;  %v3160_v39 = vpop.permute.xlu0 %3159  ;;  %v3576_v9 = vsel %vm1443_vm2, %v3358_v8, %v3575_v16 }
 0x4a6   : > { %v3362_v11 = vrot.slane %v3157_v25, %v6127_v62  ;;  %v3366_v43 = vrot.slane %v3160_v39, %v6127_v62 }
 0x4a8   : > { %v3577_v21 = vsel %vm1445_vm3, %v3362_v11, %v3576_v9 }
 0x4a9   : > { %v3163_v36 = vpop.permute.xlu1 %3162  ;;  %v3166_v46 = vpop.permute.xlu0 %3165  ;;  %v3578_v7 = vsel %vm1447_vm4, %v3366_v43, %v3577_v21 }
 0x4aa   : > { %v3370_v47 = vrot.slane %v3163_v36, %v6127_v62  ;;  %v3374_v54 = vrot.slane %v3166_v46, %v6127_v62 }
 0x4ac   : > { %v3579_v48 = vsel %vm1449_vm5, %v3370_v47, %v3578_v7 }
 0x4ad   : > { %v3580_v4 = vsel %vm1451_vm6, %v3374_v54, %v3579_v48  ;;  %v3241_v38 = vpop.permute.xlu1 %3240  ;;  %v3244_v50 = vpop.permute.xlu0 %3243 }
 0x4ae   : > { %3632 = vst.msk [vmem:[%s5838_s13 + $0x8] sm:$0xff] %vm1510_vm7, %v3580_v4  ;;  %v3474_v2 = vrot.slane %v3241_v38, %v6127_v62  ;;  %v3478_v30 = vrot.slane %v3244_v50, %v6127_v62 }
 0x4b0   : > { %v3602_v52 = vsel %vm1439_vm0, %v3478_v30, %v3474_v2 }
 0x4b1   : > { %v3247_v19 = vpop.permute.xlu1 %3246  ;;  %v3250_v63 = vpop.permute.xlu0 %3249 }
 0x4b2   : > { %v3482_v35 = vrot.slane %v3247_v19, %v6127_v62  ;;  %v3486_v3 = vrot.slane %v3250_v63, %v6127_v62 }
 0x4b4   : > { %v3603_v20 = vsel %vm1441_vm1, %v3482_v35, %v3602_v52 }
 0x4b5   : > { %v3253_v58 = vpop.permute.xlu1 %3252  ;;  %v3256_v42 = vpop.permute.xlu0 %3255  ;;  %v3604_v28 = vsel %vm1443_vm2, %v3486_v3, %v3603_v20 }
 0x4b6   : > { %v3490_v41 = vrot.slane %v3253_v58, %v6127_v62  ;;  %v3494_v12 = vrot.slane %v3256_v42, %v6127_v62 }
 0x4b8   : > { %v3605_v13 = vsel %vm1445_vm3, %v3490_v41, %v3604_v28 }
 0x4b9   : > { %v3259_v49 = vpop.permute.xlu1 %3258  ;;  %v3262_v27 = vpop.permute.xlu0 %3261  ;;  %v3606_v32 = vsel %vm1447_vm4, %v3494_v12, %v3605_v13 }
 0x4ba   : > { %v3498_v22 = vrot.slane %v3259_v49, %v6127_v62  ;;  %v3502_v55 = vrot.slane %v3262_v27, %v6127_v62 }
 0x4bc   : > { %v3607_v60 = vsel %vm1449_vm5, %v3498_v22, %v3606_v32 }
 0x4bd   : > { %v3608_v18 = vsel %vm1451_vm6, %v3502_v55, %v3607_v60  ;;  %v3169_v23 = vpop.permute.xlu1 %3168  ;;  %v3172_v37 = vpop.permute.xlu0 %3171 }
 0x4be   : > { %3636 = vst.msk [vmem:[%s5838_s13 + $0x28] sm:$0xff] %vm1510_vm7, %v3608_v18  ;;  %v3378_v53 = vrot.slane %v3169_v23, %v6127_v62  ;;  %v3382_v45 = vrot.slane %v3172_v37, %v6127_v62 }
 0x4c0   : > { %v3581_v44 = vsel %vm1439_vm0, %v3382_v45, %v3378_v53 }
 0x4c1   : > { %v3175_v40 = vpop.permute.xlu1 %3174  ;;  %v3178_v15 = vpop.permute.xlu0 %3177 }
 0x4c2   : > { %v3386_v1 = vrot.slane %v3175_v40, %v6127_v62  ;;  %v3390_v61 = vrot.slane %v3178_v15, %v6127_v62 }
 0x4c4   : > { %v3582_v6 = vsel %vm1441_vm1, %v3386_v1, %v3581_v44 }
 0x4c5   : > { %v3181_v17 = vpop.permute.xlu1 %3180  ;;  %v3184_v57 = vpop.permute.xlu0 %3183  ;;  %v3583_v24 = vsel %vm1443_vm2, %v3390_v61, %v3582_v6 }
 0x4c6   : > { %v3394_v29 = vrot.slane %v3181_v17, %v6127_v62  ;;  %v3398_v56 = vrot.slane %v3184_v57, %v6127_v62 }
 0x4c8   : > { %v3584_v33 = vsel %vm1445_vm3, %v3394_v29, %v3583_v24 }
 0x4c9   : > { %v3187_v0 = vpop.permute.xlu1 %3186  ;;  %v3190_v26 = vpop.permute.xlu0 %3189  ;;  %v3585_v31 = vsel %vm1447_vm4, %v3398_v56, %v3584_v33 }
 0x4ca   : > { %v3402_v59 = vrot.slane %v3187_v0, %v6127_v62  ;;  %v3406_v51 = vrot.slane %v3190_v26, %v6127_v62 }
 0x4cc   : > { %v3586_v10 = vsel %vm1449_vm5, %v3402_v59, %v3585_v31 }
 0x4cd   : > { %v3587_v14 = vsel %vm1451_vm6, %v3406_v51, %v3586_v10  ;;  %v3265_v5 = vpop.permute.xlu1 %3264  ;;  %v3268_v34 = vpop.permute.xlu0 %3267 }
 0x4ce   : > { %3633 = vst.msk [vmem:[%s5838_s13 + $0x10] sm:$0xff] %vm1510_vm7, %v3587_v14  ;;  %v3506_v12 = vrot.slane %v3265_v5, %v6127_v62  ;;  %v3510_v13 = vrot.slane %v3268_v34, %v6127_v62 }
 0x4d0   : > { %v3609_v45 = vsel %vm1439_vm0, %v3510_v13, %v3506_v12 }
 0x4d1   : > { %v3271_v8 = vpop.permute.xlu1 %3270  ;;  %v5912_v16 = vpop.permute.xlu0 %3282 }
 0x4d2   : > { %v3514_v27 = vrot.slane %v3271_v8, %v6127_v62  ;;  %v3530_v31 = vrot.slane %v5912_v16, %v6127_v62 }
 0x4d4   : > { %v3610_v44 = vsel %vm1441_vm1, %v3514_v27, %v3609_v45 }
 0x4d5   : > { %v3274_v25 = vpop.permute.xlu1 %3273  ;;  %v3196_v39 = vpop.permute.xlu0 %3195 }
 0x4d6   : > { %v3414_v54 = vrot.slane %v3196_v39, %v6127_v62  ;;  %v3518_v60 = vrot.slane %v3274_v25, %v6127_v62 }
 0x4d8   : > { %v3611_v29 = vsel %vm1443_vm2, %v3518_v60, %v3610_v44 }
 0x4d9   : > { %v3277_v11 = vpop.permute.xlu1 %3276  ;;  %v3202_v9 = vpop.permute.xlu0 %3201 }
 0x4da   : > { %v3422_v2 = vrot.slane %v3202_v9, %v6127_v62  ;;  %v3522_v37 = vrot.slane %v3277_v11, %v6127_v62 }
 0x4dc   : > { %v3612_v33 = vsel %vm1445_vm3, %v3522_v37, %v3611_v29 }
 0x4dd   : > { %v3280_v43 = vpop.permute.xlu1 %3279  ;;  %v3208_v21 = vpop.permute.xlu0 %3207 }
 0x4de   : > { %v3430_v3 = vrot.slane %v3208_v21, %v6127_v62  ;;  %v3526_v40 = vrot.slane %v3280_v43, %v6127_v62 }
 0x4e0   : > { %v3613_v59 = vsel %vm1447_vm4, %v3526_v40, %v3612_v33 }
 0x4e1   : > { %v3193_v36 = vpop.permute.xlu1 %3192  ;;  %v3214_v46 = vpop.permute.xlu0 %3213  ;;  %v3614_v8 = vsel %vm1449_vm5, %v3530_v31, %v3613_v59 }
 0x4e2   : > { %v3410_v47 = vrot.slane %v3193_v36, %v6127_v62  ;;  %v3438_v41 = vrot.slane %v3214_v46, %v6127_v62 }
 0x4e4   : > { %v3588_v38 = vsel %vm1439_vm0, %v3414_v54, %v3410_v47 }
 0x4e5   : > { %v3199_v7 = vpop.permute.xlu1 %3198  ;;  %v3292_v48 = vpop.permute.xlu0 %3291 }
 0x4e6   : > { %v3418_v4 = vrot.slane %v3199_v7, %v6127_v62  ;;  %v3542_v18 = vrot.slane %v3292_v48, %v6127_v62 }
 0x4e8   : > { %v3589_v50 = vsel %vm1441_vm1, %v3418_v4, %v3588_v38 }
 0x4e9   : > { %v3205_v30 = vpop.permute.xlu1 %3204  ;;  %v3295_v19 = vpop.permute.xlu0 %3294  ;;  %v3590_v35 = vsel %vm1443_vm2, %v3422_v2, %v3589_v50 }
 0x4ea   : > { %v3426_v63 = vrot.slane %v3205_v30, %v6127_v62  ;;  %v3546_v53 = vrot.slane %v3295_v19, %v6127_v62 }
 0x4ec   : > { %v3591_v52 = vsel %vm1445_vm3, %v3426_v63, %v3590_v35 }
 0x4ed   : > { %v3211_v20 = vpop.permute.xlu1 %3210  ;;  %v3298_v58 = vpop.permute.xlu0 %3297  ;;  %v3592_v28 = vsel %vm1447_vm4, %v3430_v3, %v3591_v52 }
 0x4ee   : > { %v3434_v42 = vrot.slane %v3211_v20, %v6127_v62  ;;  %v3550_v15 = vrot.slane %v3298_v58, %v6127_v62 }
 0x4f0   : > { %v3593_v49 = vsel %vm1449_vm5, %v3434_v42, %v3592_v28 }
 0x4f1   : > { %v3594_v22 = vsel %vm1451_vm6, %v3438_v41, %v3593_v49  ;;  %v3289_v55 = vpop.permute.xlu1 %3288  ;;  %v3301_v32 = vpop.permute.xlu0 %3300 }
 0x4f2   : > { %3634 = vst.msk [vmem:[%s5838_s13 + $0x18] sm:$0xff] %vm1510_vm7, %v3594_v22  ;;  %v3538_v23 = vrot.slane %v3289_v55, %v6127_v62  ;;  %v3554_v6 = vrot.slane %v3301_v32, %v6127_v62 }
 0x4f4   : > { %v3616_v1 = vsel %vm1439_vm0, %v3542_v18, %v3538_v23 }
 0x4f5   : > { %v3617_v61 = vsel %vm1441_vm1, %v3546_v53, %v3616_v1  ;;  %v3307_v17 = vpop.permute.xlu1 %3306  ;;  %v3304_v57 = vpop.permute.xlu0 %3303 }
 0x4f6   : > { %v3618_v24 = vsel %vm1443_vm2, %v3550_v15, %v3617_v61  ;;  %v3558_v56 = vrot.slane %v3304_v57, %v6127_v62  ;;  %v3562_v26 = vrot.slane %v3307_v17, %v6127_v62 }
 0x4f7   : > { %v3619_v0 = vsel %vm1445_vm3, %v3554_v6, %v3618_v24 }
 0x4f8   : > { %v3620_v51 = vsel %vm1447_vm4, %v3558_v56, %v3619_v0 }
 0x4f9   : > { %v3286_v10 = vpop.permute.xlu1 %3285  ;;  %v3310_v14 = vpop.permute.xlu0 %3309  ;;  %v3621_v25 = vsel %vm1449_vm5, %v3562_v26, %v3620_v51 }
 0x4fa   : > { %v3534_v5 = vrot.slane %v3286_v10, %v6127_v62  ;;  %v3566_v34 = vrot.slane %v3310_v14, %v6127_v62 }
 0x4fc   : > { %v3615_v39 = vsel %vm1451_vm6, %v3534_v5, %v3614_v8  ;;  %v3622_v11 = vsel %vm1451_vm6, %v3566_v34, %v3621_v25 }
 0x4fd   : > { %3637 = vst.msk [vmem:[%s5838_s13 + $0x30] sm:$0xff] %vm1510_vm7, %v3615_v39  ;;  %3638 = vst.msk [vmem:[%s5838_s13 + $0x38] sm:$0xff] %vm1510_vm7, %v3622_v11 }
 0x4fe PF: > { %p18_p6 = scmp.ge.s32.totalorder %s4365_s28, 6   ;;  %s6163_s18 = smov %s4274_s19 }
 0x4ff   : > { %s6164_s19 = smov %s4278_s20  ;;  %s6165_s20 = smov %s4385_s11 }
 0x500   : > { %s6166_s21 = smov %s4365_s28  ;;  %20 = sbr.rel (!%p18_p6) target bundleno = 5 (0x5), region = 97 }
 0x505   :  { %3661 = vsyncpa [#allocation3], 1 }
 0x506   :  { %3663 = vsyncpa [#allocation3 + $0x1], 1 }
 0x507   :  { %3664 = vsyncpa [#allocation5], 1 }
 0x508   :  { %3666 = vsyncpa [#allocation5 + $0x1], 1 }

</bundles_post_ra>
